<compile_context>
chip_gen: v7x
topology: tpu7x:2x2x1
jax: 0.10.0
libtpu: 0.0.40
codegen_flags: <defaults>
</compile_context>

<pallas_src>
import functools
import math

import jax
import jax.numpy as jnp
from jax import lax
from jax.experimental import pallas as pl
from jax.experimental.pallas import tpu as pltpu

_EPS = 1e-5  # nn.LayerNorm default eps


def _layernorm(x, w, b):
    mu = jnp.mean(x, axis=-1, keepdims=True)
    xc = x - mu
    var = jnp.mean(xc * xc, axis=-1, keepdims=True)
    return xc * lax.rsqrt(var + _EPS) * w + b


def _clip_stack_kernel(n_head,
                       x_ref, mask_ref,
                       ln1w_ref, ln1b_ref, wqkv_ref, bqkv_ref, wo_ref, bo_ref,
                       ln2w_ref, ln2b_ref, w1_ref, b1_ref, w2_ref, b2_ref,
                       lnfw_ref, lnfb_ref,
                       o_ref):
    layer = pl.program_id(1)
    n_layers = pl.num_programs(1)

    # Load the embedded activations into the VMEM-resident output block once
    # per batch block; o_ref is the residual-stream accumulator because its
    # BlockSpec returns the same block index across the (inner, "arbitrary")
    # layer axis.
    @pl.when(layer == 0)
    def _():
        o_ref[...] = x_ref[...]

    Bt, S, D = o_ref.shape
    dh = D // n_head
    scale = 1.0 / math.sqrt(dh)
    M = Bt * S

    x = o_ref[...].reshape(M, D)             # view: S is sublane-aligned

    # ----- residual 1: LayerNorm -> causal multi-head self-attention -----
    h = _layernorm(x, ln1w_ref[...], ln1b_ref[...])
    qkv = jnp.dot(h.astype(jnp.bfloat16), wqkv_ref[...],
                  preferred_element_type=jnp.float32) + bqkv_ref[...]
    # pre-scale q (equivalent to scaling the scores; the additive mask is
    # unaffected)
    q = (qkv[:, 0:D] * scale).reshape(Bt, S, D)
    k = qkv[:, D:2 * D].reshape(Bt, S, D)
    v = qkv[:, 2 * D:3 * D].reshape(Bt, S, D)

    # Additive causal bias (0 / -inf), built once in the wrapper; broadcast is
    # hoisted out of the head loop.
    bias = jnp.broadcast_to(mask_ref[...][None, :, :], (Bt, S, S))

    heads = []
    for hd in range(n_head):                 # static over heads, batched over Bt
        sl = slice(hd * dh, (hd + 1) * dh)
        qh = q[:, :, sl].astype(jnp.bfloat16)
        kh = k[:, :, sl].astype(jnp.bfloat16)
        vh = v[:, :, sl].astype(jnp.bfloat16)
        s = jnp.einsum('bqd,bkd->bqk', qh, kh,
                       preferred_element_type=jnp.float32) + bias   # (Bt,S,S)
        m = jnp.max(s, axis=-1, keepdims=True)
        p = jnp.exp(s - m)
        p = p * pl.reciprocal(jnp.sum(p, axis=-1, keepdims=True), approx=True)
        heads.append(
            jnp.einsum('bqk,bkd->bqd', p.astype(jnp.bfloat16), vh,
                       preferred_element_type=jnp.float32).astype(jnp.bfloat16))

    # Concatenate bf16 head outputs and do ONE output projection (K = D).
    attn = jnp.concatenate(heads, axis=-1).reshape(M, D)
    attn = jnp.dot(attn, wo_ref[...],
                   preferred_element_type=jnp.float32) + bo_ref[...]
    x = x + attn

    # ----- residual 2: LayerNorm -> Linear -> quickGELU -> Linear -----
    h = _layernorm(x, ln2w_ref[...], ln2b_ref[...])
    h1 = jnp.dot(h.astype(jnp.bfloat16), w1_ref[...],
                 preferred_element_type=jnp.float32) + b1_ref[...]
    h1 = (h1 * jax.nn.sigmoid(1.702 * h1)).astype(jnp.bfloat16)
    h2 = jnp.dot(h1, w2_ref[...],
                 preferred_element_type=jnp.float32) + b2_ref[...]
    x = x + h2

    is_last = layer == n_layers - 1

    @pl.when(jnp.logical_not(is_last))
    def _():
        o_ref[...] = x.reshape(Bt, S, D)

    # Fused final LayerNorm on the last layer step; the block is written back
    # to HBM only once per batch block.
    @pl.when(is_last)
    def _():
        o_ref[...] = _layernorm(x, lnfw_ref[...], lnfb_ref[...]).reshape(Bt, S, D)


def _pick_batch_tile(B, requested=None):
    if requested is not None:
        if B % requested != 0:
            raise ValueError(f"batch_tile={requested} must divide batch={B}")
        return requested
    bt = min(B, 8)
    while B % bt:
        bt -= 1
    # keep >= 2 batch blocks when possible so the "parallel" grid axis can
    # shard across the two TensorCores on v7x
    if B // bt < 2 and bt > 1 and bt % 2 == 0:
        bt //= 2
    return bt


def _default_vmem_limit(requested=None):
    if requested is not None:
        return requested
    cap = 128 * 1024 * 1024
    try:
        cap = int(getattr(pltpu.get_tpu_info(), "vmem_capacity_bytes", cap))
    except Exception:
        pass
    return int(min(100 * 1024 * 1024, int(cap * 0.85)))


def clip_transformer(x_emb, params, n_head, batch_tile=None,
                     vmem_limit_bytes=None):
    """Runs all CLIP layers + final LayerNorm in a single pallas_call."""
    B, S, D = x_emb.shape
    L = params["w_qkv"].shape[0]
    Bt = _pick_batch_tile(B, batch_tile)

    # Additive causal bias, built once and passed as a tiny constant input.
    row = lax.broadcasted_iota(jnp.int32, (S, S), 0)
    col = lax.broadcasted_iota(jnp.int32, (S, S), 1)
    mask = jnp.where(col <= row, jnp.float32(0.0), jnp.float32(-jnp.inf))

    act_spec = pl.BlockSpec((Bt, S, D), lambda b, l: (b, 0, 0))
    mask_spec = pl.BlockSpec((S, S), lambda b, l: (0, 0))

    layer_params = (
        params["ln1_w"], params["ln1_b"],
        params["w_qkv"], params["b_qkv"],
        params["w_out"], params["b_out"],
        params["ln2_w"], params["ln2_b"],
        params["w_fc1"], params["b_fc1"],
        params["w_fc2"], params["b_fc2"],
    )
    layer_specs = [
        pl.BlockSpec((None,) + p.shape[1:], lambda b, l: (l, 0, 0))
        for p in layer_params
    ]
    final_specs = [
        pl.BlockSpec(params["ln_f_w"].shape, lambda b, l: (0, 0)),
        pl.BlockSpec(params["ln_f_b"].shape, lambda b, l: (0, 0)),
    ]

    return pl.pallas_call(
        functools.partial(_clip_stack_kernel, n_head),
        out_shape=jax.ShapeDtypeStruct((B, S, D), jnp.float32),
        grid=(B // Bt, L),
        in_specs=[act_spec, mask_spec] + layer_specs + final_specs,
        out_specs=act_spec,
        compiler_params=pltpu.CompilerParams(
            dimension_semantics=("parallel", "arbitrary"),
            vmem_limit_bytes=_default_vmem_limit(vmem_limit_bytes),
        ),
    )(x_emb, mask, *layer_params, params["ln_f_w"], params["ln_f_b"])


def clip_forward(tokens, params, n_head, batch_tile=None, vmem_limit_bytes=None):
    tokens = tokens.astype(jnp.int32)            # tokens.type(torch.long)
    # Token-embedding gather + position add: plain-JAX indexing glue.
    state = params["tok_emb"][tokens] + params["pos_emb"][None, :, :]
    B, S, D = state.shape
    # Pad S to a sublane multiple so in-kernel reshapes stay views; padded key
    # columns are never attended by valid rows under the causal mask.
    Sp = max(8, ((S + 7) // 8) * 8)
    if Sp != S:
        state = jnp.pad(state, ((0, 0), (0, Sp - S), (0, 0)))
    out = clip_transformer(state, params, n_head, batch_tile=batch_tile,
                           vmem_limit_bytes=vmem_limit_bytes)
    return out[:, :S, :] if Sp != S else out


def init_params(key, n_vocab, n_embed, n_tokens, n_layers):
    def normal(k, shape, scale=0.02):
        return scale * jax.random.normal(k, shape, dtype=jnp.float32)

    D, L = n_embed, n_layers
    keys = jax.random.split(key, 8)
    # Per-layer parameters are stacked along a leading layer axis; matmul
    # weights are pre-transposed to (in, out) and stored in bf16 for the MXU.
    params = {
        "tok_emb": normal(keys[0], (n_vocab, D)),
        "pos_emb": normal(keys[1], (n_tokens, D)),
        "ln_f_w": jnp.ones((1, D), jnp.float32),
        "ln_f_b": jnp.zeros((1, D), jnp.float32),
        "ln1_w": jnp.ones((L, 1, D), jnp.float32),
        "ln1_b": jnp.zeros((L, 1, D), jnp.float32),
        "w_qkv": normal(keys[2], (L, D, 3 * D)).astype(jnp.bfloat16),
        "b_qkv": normal(keys[3], (L, 1, 3 * D)),
        "w_out": normal(keys[4], (L, D, D)).astype(jnp.bfloat16),
        "b_out": normal(keys[5], (L, 1, D)),
        "ln2_w": jnp.ones((L, 1, D), jnp.float32),
        "ln2_b": jnp.zeros((L, 1, D), jnp.float32),
        "w_fc1": normal(keys[6], (L, D, 4 * D)).astype(jnp.bfloat16),
        "b_fc1": jnp.zeros((L, 1, 4 * D), jnp.float32),
        "w_fc2": normal(keys[7], (L, 4 * D, D)).astype(jnp.bfloat16),
        "b_fc2": jnp.zeros((L, 1, D), jnp.float32),
    }
    return params


if __name__ == "__main__":
    # Scaled-down config (structure identical to CLIP(49408, 768, 77) x 12 layers).
    N_VOCAB, N_EMBED, N_TOKENS, N_HEAD, N_LAYERS, BATCH = 512, 64, 16, 4, 2, 4

    key = jax.random.PRNGKey(0)
    k_param, k_tok = jax.random.split(key)
    params = init_params(k_param, N_VOCAB, N_EMBED, N_TOKENS, N_LAYERS)
    tokens = jax.random.randint(k_tok, (BATCH, N_TOKENS), 0, N_VOCAB, dtype=jnp.int32)

    # batch_tile=2 keeps 2 batch blocks on the "parallel" axis; at production
    # scale (B >= 8, S=77->80, D=768) raise batch_tile to 8-16 so M = Bt*S
    # clears the weight-streaming roofline.
    fwd = jax.jit(functools.partial(clip_forward, n_head=N_HEAD, batch_tile=2))
    out = fwd(tokens, params)
    out = jax.block_until_ready(out)
    assert out.shape == (BATCH, N_TOKENS, N_EMBED) and out.dtype == jnp.float32
    assert bool(jnp.all(jnp.isfinite(out)))
    print("KERNEL_OK")
</pallas_src>

<mosaic_0001>
module attributes {stable_mosaic.version = 11 : i64} {
  func.func @_clip_stack_kernel(%arg0: i32, %arg1: i32, %arg2: memref<2x16x64xf32, #tpu.memory_space<vmem>>, %arg3: memref<16x16xf32, #tpu.memory_space<vmem>>, %arg4: memref<1x1x64xf32, #tpu.memory_space<vmem>>, %arg5: memref<1x1x64xf32, #tpu.memory_space<vmem>>, %arg6: memref<1x64x192xbf16, #tpu.memory_space<vmem>>, %arg7: memref<1x1x192xf32, #tpu.memory_space<vmem>>, %arg8: memref<1x64x64xbf16, #tpu.memory_space<vmem>>, %arg9: memref<1x1x64xf32, #tpu.memory_space<vmem>>, %arg10: memref<1x1x64xf32, #tpu.memory_space<vmem>>, %arg11: memref<1x1x64xf32, #tpu.memory_space<vmem>>, %arg12: memref<1x64x256xbf16, #tpu.memory_space<vmem>>, %arg13: memref<1x1x256xf32, #tpu.memory_space<vmem>>, %arg14: memref<1x256x64xbf16, #tpu.memory_space<vmem>>, %arg15: memref<1x1x64xf32, #tpu.memory_space<vmem>>, %arg16: memref<1x64xf32, #tpu.memory_space<vmem>>, %arg17: memref<1x64xf32, #tpu.memory_space<vmem>>, %arg18: memref<2x16x64xf32, #tpu.memory_space<vmem>>) attributes {dimension_semantics = [#tpu.dimension_semantics<parallel>, #tpu.dimension_semantics<arbitrary>], iteration_bounds = array<i64: 2, 2>, scalar_prefetch = 0 : i64, scratch_operands = 0 : i64, tpu.core_type = #tpu.core_type<tc>, window_params = [{transform_indices = @transform_0, window_bounds = array<i64: 2, 16, 64>}, {pipeline_mode = #tpu.pipeline_mode<synchronous>, transform_indices = @transform_1, window_bounds = array<i64: 16, 16>}, {transform_indices = @transform_2, window_bounds = array<i64: 1, 1, 64>}, {transform_indices = @transform_3, window_bounds = array<i64: 1, 1, 64>}, {transform_indices = @transform_4, window_bounds = array<i64: 1, 64, 192>}, {transform_indices = @transform_5, window_bounds = array<i64: 1, 1, 192>}, {transform_indices = @transform_6, window_bounds = array<i64: 1, 64, 64>}, {transform_indices = @transform_7, window_bounds = array<i64: 1, 1, 64>}, {transform_indices = @transform_8, window_bounds = array<i64: 1, 1, 64>}, {transform_indices = @transform_9, window_bounds = array<i64: 1, 1, 64>}, {transform_indices = @transform_10, window_bounds = array<i64: 1, 64, 256>}, {transform_indices = @transform_11, window_bounds = array<i64: 1, 1, 256>}, {transform_indices = @transform_12, window_bounds = array<i64: 1, 256, 64>}, {transform_indices = @transform_13, window_bounds = array<i64: 1, 1, 64>}, {pipeline_mode = #tpu.pipeline_mode<synchronous>, transform_indices = @transform_14, window_bounds = array<i64: 1, 64>}, {pipeline_mode = #tpu.pipeline_mode<synchronous>, transform_indices = @transform_15, window_bounds = array<i64: 1, 64>}, {transform_indices = @transform_16, window_bounds = array<i64: 2, 16, 64>}]} {
    %c0_i32 = arith.constant 0 : i32
    %0 = arith.cmpi eq, %arg1, %c0_i32 : i32
    %1 = arith.extui %0 : i1 to i32
    %c0_i32_0 = arith.constant 0 : i32
    %2 = arith.cmpi ne, %1, %c0_i32_0 : i32
    scf.if %2 {
      %c0_75 = arith.constant 0 : index
      %c0_76 = arith.constant 0 : index
      %c0_77 = arith.constant 0 : index
      %198 = vector.load %arg2[%c0_75, %c0_76, %c0_77] : memref<2x16x64xf32, #tpu.memory_space<vmem>>, vector<2x16x64xf32>
      %c0_78 = arith.constant 0 : index
      %c0_79 = arith.constant 0 : index
      %c0_80 = arith.constant 0 : index
      %199 = vector.load %arg18[%c0_78, %c0_79, %c0_80] : memref<2x16x64xf32, #tpu.memory_space<vmem>>, vector<2x16x64xf32>
      tpu.vector_store %arg18[%c0_78, %c0_79, %c0_80], %198 {strides = array<i32>} : memref<2x16x64xf32, #tpu.memory_space<vmem>>, vector<2x16x64xf32>,
    } else {
    }
    %c0 = arith.constant 0 : index
    %c0_1 = arith.constant 0 : index
    %c0_2 = arith.constant 0 : index
    %3 = vector.load %arg18[%c0, %c0_1, %c0_2] : memref<2x16x64xf32, #tpu.memory_space<vmem>>, vector<2x16x64xf32>
    %4 = vector.shape_cast %3 : vector<2x16x64xf32> to vector<32x64xf32>
    %c0_3 = arith.constant 0 : index
    %c0_4 = arith.constant 0 : index
    %c0_5 = arith.constant 0 : index
    %5 = vector.load %arg4[%c0_3, %c0_4, %c0_5] : memref<1x1x64xf32, #tpu.memory_space<vmem>>, vector<1x1x64xf32>
    %6 = vector.shape_cast %5 : vector<1x1x64xf32> to vector<1x64xf32>
    %c0_6 = arith.constant 0 : index
    %c0_7 = arith.constant 0 : index
    %c0_8 = arith.constant 0 : index
    %7 = vector.load %arg5[%c0_6, %c0_7, %c0_8] : memref<1x1x64xf32, #tpu.memory_space<vmem>>, vector<1x1x64xf32>
    %8 = vector.shape_cast %7 : vector<1x1x64xf32> to vector<1x64xf32>
    %cst = arith.constant dense<0.000000e+00> : vector<32xf32>
    %9 = vector.multi_reduction <add>, %4, %cst [1] : vector<32x64xf32> to vector<32xf32>
    %10 = vector.shape_cast %9 : vector<32xf32> to vector<32x1xf32>
    %cst_9 = arith.constant 6.400000e+01 : f32
    %11 = vector.broadcast %cst_9 : f32 to vector<32x1xf32>
    %12 = arith.divf %10, %11 : vector<32x1xf32>
    %13 = vector.broadcast %12 : vector<32x1xf32> to vector<32x64xf32>
    %14 = arith.subf %4, %13 : vector<32x64xf32>
    %15 = arith.mulf %14, %14 : vector<32x64xf32>
    %cst_10 = arith.constant dense<0.000000e+00> : vector<32xf32>
    %16 = vector.multi_reduction <add>, %15, %cst_10 [1] : vector<32x64xf32> to vector<32xf32>
    %17 = vector.shape_cast %16 : vector<32xf32> to vector<32x1xf32>
    %cst_11 = arith.constant 6.400000e+01 : f32
    %18 = vector.broadcast %cst_11 : f32 to vector<32x1xf32>
    %19 = arith.divf %17, %18 : vector<32x1xf32>
    %cst_12 = arith.constant 9.99999974E-6 : f32
    %20 = vector.broadcast %cst_12 : f32 to vector<32x1xf32>
    %21 = arith.addf %19, %20 : vector<32x1xf32>
    %22 = math.rsqrt %21 : vector<32x1xf32>
    %23 = vector.broadcast %22 : vector<32x1xf32> to vector<32x64xf32>
    %24 = arith.mulf %14, %23 : vector<32x64xf32>
    %25 = vector.broadcast %6 : vector<1x64xf32> to vector<32x64xf32>
    %26 = arith.mulf %24, %25 : vector<32x64xf32>
    %27 = vector.broadcast %8 : vector<1x64xf32> to vector<32x64xf32>
    %28 = arith.addf %26, %27 : vector<32x64xf32>
    %29 = arith.truncf %28 : vector<32x64xf32> to vector<32x64xbf16>
    %c0_13 = arith.constant 0 : index
    %c0_14 = arith.constant 0 : index
    %c0_15 = arith.constant 0 : index
    %30 = vector.load %arg6[%c0_13, %c0_14, %c0_15] : memref<1x64x192xbf16, #tpu.memory_space<vmem>>, vector<1x64x192xbf16>
    %31 = vector.shape_cast %30 : vector<1x64x192xbf16> to vector<64x192xbf16>
    %cst_16 = arith.constant dense<0.000000e+00> : vector<32x192xf32>
    %32 = tpu.matmul %29, %31, %cst_16 {dimension_numbers = #tpu.dot_dimension_numbers<[1], [0], [0], [1], [0, 0, 1, 1], [], []>} : vector<32x64xbf16>, vector<64x192xbf16>, vector<32x192xf32> -> vector<32x192xf32>
    %c0_17 = arith.constant 0 : index
    %c0_18 = arith.constant 0 : index
    %c0_19 = arith.constant 0 : index
    %33 = vector.load %arg7[%c0_17, %c0_18, %c0_19] : memref<1x1x192xf32, #tpu.memory_space<vmem>>, vector<1x1x192xf32>
    %34 = vector.shape_cast %33 : vector<1x1x192xf32> to vector<1x192xf32>
    %35 = vector.broadcast %34 : vector<1x192xf32> to vector<32x192xf32>
    %36 = arith.addf %32, %35 : vector<32x192xf32>
    %37 = vector.extract_strided_slice %36 {offsets = [0, 0], sizes = [32, 64], strides = [1, 1]} : vector<32x192xf32> to vector<32x64xf32>
    %cst_20 = arith.constant 2.500000e-01 : f32
    %38 = vector.broadcast %cst_20 : f32 to vector<32x64xf32>
    %39 = arith.mulf %37, %38 : vector<32x64xf32>
    %40 = vector.shape_cast %39 : vector<32x64xf32> to vector<2x16x64xf32>
    %41 = vector.extract_strided_slice %36 {offsets = [0, 64], sizes = [32, 64], strides = [1, 1]} : vector<32x192xf32> to vector<32x64xf32>
    %42 = vector.shape_cast %41 : vector<32x64xf32> to vector<2x16x64xf32>
    %43 = vector.extract_strided_slice %36 {offsets = [0, 128], sizes = [32, 64], strides = [1, 1]} : vector<32x192xf32> to vector<32x64xf32>
    %44 = vector.shape_cast %43 : vector<32x64xf32> to vector<2x16x64xf32>
    %c0_21 = arith.constant 0 : index
    %c0_22 = arith.constant 0 : index
    %45 = vector.load %arg3[%c0_21, %c0_22] : memref<16x16xf32, #tpu.memory_space<vmem>>, vector<16x16xf32>
    %46 = vector.shape_cast %45 : vector<16x16xf32> to vector<1x16x16xf32>
    %47 = vector.shape_cast %46 : vector<1x16x16xf32> to vector<1x16x16xf32>
    %48 = vector.broadcast %47 : vector<1x16x16xf32> to vector<2x16x16xf32>
    %49 = vector.extract_strided_slice %40 {offsets = [0, 0, 0], sizes = [2, 16, 16], strides = [1, 1, 1]} : vector<2x16x64xf32> to vector<2x16x16xf32>
    %50 = arith.truncf %49 : vector<2x16x16xf32> to vector<2x16x16xbf16>
    %51 = vector.extract_strided_slice %42 {offsets = [0, 0, 0], sizes = [2, 16, 16], strides = [1, 1, 1]} : vector<2x16x64xf32> to vector<2x16x16xf32>
    %52 = arith.truncf %51 : vector<2x16x16xf32> to vector<2x16x16xbf16>
    %53 = vector.extract_strided_slice %44 {offsets = [0, 0, 0], sizes = [2, 16, 16], strides = [1, 1, 1]} : vector<2x16x64xf32> to vector<2x16x16xf32>
    %54 = arith.truncf %53 : vector<2x16x16xf32> to vector<2x16x16xbf16>
    "tpu.trace_start"() <{level = 10 : i32, message = "bqd,bkd->bqk"}> : () -> ()
    %cst_23 = arith.constant dense<0.000000e+00> : vector<2x16x16xf32>
    %55 = tpu.matmul %50, %52, %cst_23 {dimension_numbers = #tpu.dot_dimension_numbers<[2], [2], [1], [1], [0, 0, 0, 1, 1, 1], [0], [0]>} : vector<2x16x16xbf16>, vector<2x16x16xbf16>, vector<2x16x16xf32> -> vector<2x16x16xf32>
    "tpu.trace_stop"() : () -> ()
    %56 = arith.addf %55, %48 : vector<2x16x16xf32>
    %cst_24 = arith.constant dense<0xFF800000> : vector<2x16xf32>
    %57 = vector.multi_reduction <maximumf>, %56, %cst_24 [2] : vector<2x16x16xf32> to vector<2x16xf32>
    %58 = vector.shape_cast %57 : vector<2x16xf32> to vector<2x16x1xf32>
    %59 = vector.broadcast %58 : vector<2x16x1xf32> to vector<2x16x16xf32>
    %60 = arith.subf %56, %59 : vector<2x16x16xf32>
    %61 = math.exp %60 : vector<2x16x16xf32>
    %cst_25 = arith.constant dense<0.000000e+00> : vector<2x16xf32>
    %62 = vector.multi_reduction <add>, %61, %cst_25 [2] : vector<2x16x16xf32> to vector<2x16xf32>
    %63 = vector.shape_cast %62 : vector<2x16xf32> to vector<2x16x1xf32>
    %64 = tpu.reciprocal %63 {approx = true} : vector<2x16x1xf32> -> vector<2x16x1xf32>
    %65 = vector.broadcast %64 : vector<2x16x1xf32> to vector<2x16x16xf32>
    %66 = arith.mulf %61, %65 : vector<2x16x16xf32>
    %67 = arith.truncf %66 : vector<2x16x16xf32> to vector<2x16x16xbf16>
    "tpu.trace_start"() <{level = 10 : i32, message = "bqk,bkd->bqd"}> : () -> ()
    %cst_26 = arith.constant dense<0.000000e+00> : vector<2x16x16xf32>
    %68 = tpu.matmul %67, %54, %cst_26 {dimension_numbers = #tpu.dot_dimension_numbers<[2], [1], [1], [2], [0, 0, 0, 1, 1, 2], [0], [0]>} : vector<2x16x16xbf16>, vector<2x16x16xbf16>, vector<2x16x16xf32> -> vector<2x16x16xf32>
    "tpu.trace_stop"() : () -> ()
    %69 = arith.truncf %68 : vector<2x16x16xf32> to vector<2x16x16xbf16>
    %70 = vector.extract_strided_slice %40 {offsets = [0, 0, 16], sizes = [2, 16, 16], strides = [1, 1, 1]} : vector<2x16x64xf32> to vector<2x16x16xf32>
    %71 = arith.truncf %70 : vector<2x16x16xf32> to vector<2x16x16xbf16>
    %72 = vector.extract_strided_slice %42 {offsets = [0, 0, 16], sizes = [2, 16, 16], strides = [1, 1, 1]} : vector<2x16x64xf32> to vector<2x16x16xf32>
    %73 = arith.truncf %72 : vector<2x16x16xf32> to vector<2x16x16xbf16>
    %74 = vector.extract_strided_slice %44 {offsets = [0, 0, 16], sizes = [2, 16, 16], strides = [1, 1, 1]} : vector<2x16x64xf32> to vector<2x16x16xf32>
    %75 = arith.truncf %74 : vector<2x16x16xf32> to vector<2x16x16xbf16>
    "tpu.trace_start"() <{level = 10 : i32, message = "bqd,bkd->bqk"}> : () -> ()
    %cst_27 = arith.constant dense<0.000000e+00> : vector<2x16x16xf32>
    %76 = tpu.matmul %71, %73, %cst_27 {dimension_numbers = #tpu.dot_dimension_numbers<[2], [2], [1], [1], [0, 0, 0, 1, 1, 1], [0], [0]>} : vector<2x16x16xbf16>, vector<2x16x16xbf16>, vector<2x16x16xf32> -> vector<2x16x16xf32>
    "tpu.trace_stop"() : () -> ()
    %77 = arith.addf %76, %48 : vector<2x16x16xf32>
    %cst_28 = arith.constant dense<0xFF800000> : vector<2x16xf32>
    %78 = vector.multi_reduction <maximumf>, %77, %cst_28 [2] : vector<2x16x16xf32> to vector<2x16xf32>
    %79 = vector.shape_cast %78 : vector<2x16xf32> to vector<2x16x1xf32>
    %80 = vector.broadcast %79 : vector<2x16x1xf32> to vector<2x16x16xf32>
    %81 = arith.subf %77, %80 : vector<2x16x16xf32>
    %82 = math.exp %81 : vector<2x16x16xf32>
    %cst_29 = arith.constant dense<0.000000e+00> : vector<2x16xf32>
    %83 = vector.multi_reduction <add>, %82, %cst_29 [2] : vector<2x16x16xf32> to vector<2x16xf32>
    %84 = vector.shape_cast %83 : vector<2x16xf32> to vector<2x16x1xf32>
    %85 = tpu.reciprocal %84 {approx = true} : vector<2x16x1xf32> -> vector<2x16x1xf32>
    %86 = vector.broadcast %85 : vector<2x16x1xf32> to vector<2x16x16xf32>
    %87 = arith.mulf %82, %86 : vector<2x16x16xf32>
    %88 = arith.truncf %87 : vector<2x16x16xf32> to vector<2x16x16xbf16>
    "tpu.trace_start"() <{level = 10 : i32, message = "bqk,bkd->bqd"}> : () -> ()
    %cst_30 = arith.constant dense<0.000000e+00> : vector<2x16x16xf32>
    %89 = tpu.matmul %88, %75, %cst_30 {dimension_numbers = #tpu.dot_dimension_numbers<[2], [1], [1], [2], [0, 0, 0, 1, 1, 2], [0], [0]>} : vector<2x16x16xbf16>, vector<2x16x16xbf16>, vector<2x16x16xf32> -> vector<2x16x16xf32>
    "tpu.trace_stop"() : () -> ()
    %90 = arith.truncf %89 : vector<2x16x16xf32> to vector<2x16x16xbf16>
    %91 = vector.extract_strided_slice %40 {offsets = [0, 0, 32], sizes = [2, 16, 16], strides = [1, 1, 1]} : vector<2x16x64xf32> to vector<2x16x16xf32>
    %92 = arith.truncf %91 : vector<2x16x16xf32> to vector<2x16x16xbf16>
    %93 = vector.extract_strided_slice %42 {offsets = [0, 0, 32], sizes = [2, 16, 16], strides = [1, 1, 1]} : vector<2x16x64xf32> to vector<2x16x16xf32>
    %94 = arith.truncf %93 : vector<2x16x16xf32> to vector<2x16x16xbf16>
    %95 = vector.extract_strided_slice %44 {offsets = [0, 0, 32], sizes = [2, 16, 16], strides = [1, 1, 1]} : vector<2x16x64xf32> to vector<2x16x16xf32>
    %96 = arith.truncf %95 : vector<2x16x16xf32> to vector<2x16x16xbf16>
    "tpu.trace_start"() <{level = 10 : i32, message = "bqd,bkd->bqk"}> : () -> ()
    %cst_31 = arith.constant dense<0.000000e+00> : vector<2x16x16xf32>
    %97 = tpu.matmul %92, %94, %cst_31 {dimension_numbers = #tpu.dot_dimension_numbers<[2], [2], [1], [1], [0, 0, 0, 1, 1, 1], [0], [0]>} : vector<2x16x16xbf16>, vector<2x16x16xbf16>, vector<2x16x16xf32> -> vector<2x16x16xf32>
    "tpu.trace_stop"() : () -> ()
    %98 = arith.addf %97, %48 : vector<2x16x16xf32>
    %cst_32 = arith.constant dense<0xFF800000> : vector<2x16xf32>
    %99 = vector.multi_reduction <maximumf>, %98, %cst_32 [2] : vector<2x16x16xf32> to vector<2x16xf32>
    %100 = vector.shape_cast %99 : vector<2x16xf32> to vector<2x16x1xf32>
    %101 = vector.broadcast %100 : vector<2x16x1xf32> to vector<2x16x16xf32>
    %102 = arith.subf %98, %101 : vector<2x16x16xf32>
    %103 = math.exp %102 : vector<2x16x16xf32>
    %cst_33 = arith.constant dense<0.000000e+00> : vector<2x16xf32>
    %104 = vector.multi_reduction <add>, %103, %cst_33 [2] : vector<2x16x16xf32> to vector<2x16xf32>
    %105 = vector.shape_cast %104 : vector<2x16xf32> to vector<2x16x1xf32>
    %106 = tpu.reciprocal %105 {approx = true} : vector<2x16x1xf32> -> vector<2x16x1xf32>
    %107 = vector.broadcast %106 : vector<2x16x1xf32> to vector<2x16x16xf32>
    %108 = arith.mulf %103, %107 : vector<2x16x16xf32>
    %109 = arith.truncf %108 : vector<2x16x16xf32> to vector<2x16x16xbf16>
    "tpu.trace_start"() <{level = 10 : i32, message = "bqk,bkd->bqd"}> : () -> ()
    %cst_34 = arith.constant dense<0.000000e+00> : vector<2x16x16xf32>
    %110 = tpu.matmul %109, %96, %cst_34 {dimension_numbers = #tpu.dot_dimension_numbers<[2], [1], [1], [2], [0, 0, 0, 1, 1, 2], [0], [0]>} : vector<2x16x16xbf16>, vector<2x16x16xbf16>, vector<2x16x16xf32> -> vector<2x16x16xf32>
    "tpu.trace_stop"() : () -> ()
    %111 = arith.truncf %110 : vector<2x16x16xf32> to vector<2x16x16xbf16>
    %112 = vector.extract_strided_slice %40 {offsets = [0, 0, 48], sizes = [2, 16, 16], strides = [1, 1, 1]} : vector<2x16x64xf32> to vector<2x16x16xf32>
    %113 = arith.truncf %112 : vector<2x16x16xf32> to vector<2x16x16xbf16>
    %114 = vector.extract_strided_slice %42 {offsets = [0, 0, 48], sizes = [2, 16, 16], strides = [1, 1, 1]} : vector<2x16x64xf32> to vector<2x16x16xf32>
    %115 = arith.truncf %114 : vector<2x16x16xf32> to vector<2x16x16xbf16>
    %116 = vector.extract_strided_slice %44 {offsets = [0, 0, 48], sizes = [2, 16, 16], strides = [1, 1, 1]} : vector<2x16x64xf32> to vector<2x16x16xf32>
    %117 = arith.truncf %116 : vector<2x16x16xf32> to vector<2x16x16xbf16>
    "tpu.trace_start"() <{level = 10 : i32, message = "bqd,bkd->bqk"}> : () -> ()
    %cst_35 = arith.constant dense<0.000000e+00> : vector<2x16x16xf32>
    %118 = tpu.matmul %113, %115, %cst_35 {dimension_numbers = #tpu.dot_dimension_numbers<[2], [2], [1], [1], [0, 0, 0, 1, 1, 1], [0], [0]>} : vector<2x16x16xbf16>, vector<2x16x16xbf16>, vector<2x16x16xf32> -> vector<2x16x16xf32>
    "tpu.trace_stop"() : () -> ()
    %119 = arith.addf %118, %48 : vector<2x16x16xf32>
    %cst_36 = arith.constant dense<0xFF800000> : vector<2x16xf32>
    %120 = vector.multi_reduction <maximumf>, %119, %cst_36 [2] : vector<2x16x16xf32> to vector<2x16xf32>
    %121 = vector.shape_cast %120 : vector<2x16xf32> to vector<2x16x1xf32>
    %122 = vector.broadcast %121 : vector<2x16x1xf32> to vector<2x16x16xf32>
    %123 = arith.subf %119, %122 : vector<2x16x16xf32>
    %124 = math.exp %123 : vector<2x16x16xf32>
    %cst_37 = arith.constant dense<0.000000e+00> : vector<2x16xf32>
    %125 = vector.multi_reduction <add>, %124, %cst_37 [2] : vector<2x16x16xf32> to vector<2x16xf32>
    %126 = vector.shape_cast %125 : vector<2x16xf32> to vector<2x16x1xf32>
    %127 = tpu.reciprocal %126 {approx = true} : vector<2x16x1xf32> -> vector<2x16x1xf32>
    %128 = vector.broadcast %127 : vector<2x16x1xf32> to vector<2x16x16xf32>
    %129 = arith.mulf %124, %128 : vector<2x16x16xf32>
    %130 = arith.truncf %129 : vector<2x16x16xf32> to vector<2x16x16xbf16>
    "tpu.trace_start"() <{level = 10 : i32, message = "bqk,bkd->bqd"}> : () -> ()
    %cst_38 = arith.constant dense<0.000000e+00> : vector<2x16x16xf32>
    %131 = tpu.matmul %130, %117, %cst_38 {dimension_numbers = #tpu.dot_dimension_numbers<[2], [1], [1], [2], [0, 0, 0, 1, 1, 2], [0], [0]>} : vector<2x16x16xbf16>, vector<2x16x16xbf16>, vector<2x16x16xf32> -> vector<2x16x16xf32>
    "tpu.trace_stop"() : () -> ()
    %132 = arith.truncf %131 : vector<2x16x16xf32> to vector<2x16x16xbf16>
    %133 = tpu.concatenate %69, %90, %111, %132 in 2 : vector<2x16x16xbf16>, vector<2x16x16xbf16>, vector<2x16x16xbf16>, vector<2x16x16xbf16> -> vector<2x16x64xbf16>
    %134 = vector.shape_cast %133 : vector<2x16x64xbf16> to vector<32x64xbf16>
    %c0_39 = arith.constant 0 : index
    %c0_40 = arith.constant 0 : index
    %c0_41 = arith.constant 0 : index
    %135 = vector.load %arg8[%c0_39, %c0_40, %c0_41] : memref<1x64x64xbf16, #tpu.memory_space<vmem>>, vector<1x64x64xbf16>
    %136 = vector.shape_cast %135 : vector<1x64x64xbf16> to vector<64x64xbf16>
    %cst_42 = arith.constant dense<0.000000e+00> : vector<32x64xf32>
    %137 = tpu.matmul %134, %136, %cst_42 {dimension_numbers = #tpu.dot_dimension_numbers<[1], [0], [0], [1], [0, 0, 1, 1], [], []>} : vector<32x64xbf16>, vector<64x64xbf16>, vector<32x64xf32> -> vector<32x64xf32>
    %c0_43 = arith.constant 0 : index
    %c0_44 = arith.constant 0 : index
    %c0_45 = arith.constant 0 : index
    %138 = vector.load %arg9[%c0_43, %c0_44, %c0_45] : memref<1x1x64xf32, #tpu.memory_space<vmem>>, vector<1x1x64xf32>
    %139 = vector.shape_cast %138 : vector<1x1x64xf32> to vector<1x64xf32>
    %140 = vector.broadcast %139 : vector<1x64xf32> to vector<32x64xf32>
    %141 = arith.addf %137, %140 : vector<32x64xf32>
    %142 = arith.addf %4, %141 : vector<32x64xf32>
    %c0_46 = arith.constant 0 : index
    %c0_47 = arith.constant 0 : index
    %c0_48 = arith.constant 0 : index
    %143 = vector.load %arg10[%c0_46, %c0_47, %c0_48] : memref<1x1x64xf32, #tpu.memory_space<vmem>>, vector<1x1x64xf32>
    %144 = vector.shape_cast %143 : vector<1x1x64xf32> to vector<1x64xf32>
    %c0_49 = arith.constant 0 : index
    %c0_50 = arith.constant 0 : index
    %c0_51 = arith.constant 0 : index
    %145 = vector.load %arg11[%c0_49, %c0_50, %c0_51] : memref<1x1x64xf32, #tpu.memory_space<vmem>>, vector<1x1x64xf32>
    %146 = vector.shape_cast %145 : vector<1x1x64xf32> to vector<1x64xf32>
    %cst_52 = arith.constant dense<0.000000e+00> : vector<32xf32>
    %147 = vector.multi_reduction <add>, %142, %cst_52 [1] : vector<32x64xf32> to vector<32xf32>
    %148 = vector.shape_cast %147 : vector<32xf32> to vector<32x1xf32>
    %cst_53 = arith.constant 6.400000e+01 : f32
    %149 = vector.broadcast %cst_53 : f32 to vector<32x1xf32>
    %150 = arith.divf %148, %149 : vector<32x1xf32>
    %151 = vector.broadcast %150 : vector<32x1xf32> to vector<32x64xf32>
    %152 = arith.subf %142, %151 : vector<32x64xf32>
    %153 = arith.mulf %152, %152 : vector<32x64xf32>
    %cst_54 = arith.constant dense<0.000000e+00> : vector<32xf32>
    %154 = vector.multi_reduction <add>, %153, %cst_54 [1] : vector<32x64xf32> to vector<32xf32>
    %155 = vector.shape_cast %154 : vector<32xf32> to vector<32x1xf32>
    %cst_55 = arith.constant 6.400000e+01 : f32
    %156 = vector.broadcast %cst_55 : f32 to vector<32x1xf32>
    %157 = arith.divf %155, %156 : vector<32x1xf32>
    %cst_56 = arith.constant 9.99999974E-6 : f32
    %158 = vector.broadcast %cst_56 : f32 to vector<32x1xf32>
    %159 = arith.addf %157, %158 : vector<32x1xf32>
    %160 = math.rsqrt %159 : vector<32x1xf32>
    %161 = vector.broadcast %160 : vector<32x1xf32> to vector<32x64xf32>
    %162 = arith.mulf %152, %161 : vector<32x64xf32>
    %163 = vector.broadcast %144 : vector<1x64xf32> to vector<32x64xf32>
    %164 = arith.mulf %162, %163 : vector<32x64xf32>
    %165 = vector.broadcast %146 : vector<1x64xf32> to vector<32x64xf32>
    %166 = arith.addf %164, %165 : vector<32x64xf32>
    %167 = arith.truncf %166 : vector<32x64xf32> to vector<32x64xbf16>
    %c0_57 = arith.constant 0 : index
    %c0_58 = arith.constant 0 : index
    %c0_59 = arith.constant 0 : index
    %168 = vector.load %arg12[%c0_57, %c0_58, %c0_59] : memref<1x64x256xbf16, #tpu.memory_space<vmem>>, vector<1x64x256xbf16>
    %169 = vector.shape_cast %168 : vector<1x64x256xbf16> to vector<64x256xbf16>
    %cst_60 = arith.constant dense<0.000000e+00> : vector<32x256xf32>
    %170 = tpu.matmul %167, %169, %cst_60 {dimension_numbers = #tpu.dot_dimension_numbers<[1], [0], [0], [1], [0, 0, 1, 1], [], []>} : vector<32x64xbf16>, vector<64x256xbf16>, vector<32x256xf32> -> vector<32x256xf32>
    %c0_61 = arith.constant 0 : index
    %c0_62 = arith.constant 0 : index
    %c0_63 = arith.constant 0 : index
    %171 = vector.load %arg13[%c0_61, %c0_62, %c0_63] : memref<1x1x256xf32, #tpu.memory_space<vmem>>, vector<1x1x256xf32>
    %172 = vector.shape_cast %171 : vector<1x1x256xf32> to vector<1x256xf32>
    %173 = vector.broadcast %172 : vector<1x256xf32> to vector<32x256xf32>
    %174 = arith.addf %170, %173 : vector<32x256xf32>
    %cst_64 = arith.constant 1.702000e+00 : f32
    %175 = vector.broadcast %cst_64 : f32 to vector<32x256xf32>
    %176 = arith.mulf %175, %174 : vector<32x256xf32>
    %177 = arith.negf %176 : vector<32x256xf32>
    %178 = math.exp %177 : vector<32x256xf32>
    %cst_65 = arith.constant 1.000000e+00 : f32
    %179 = vector.broadcast %cst_65 : f32 to vector<32x256xf32>
    %180 = arith.addf %179, %178 : vector<32x256xf32>
    %181 = arith.divf %179, %180 : vector<32x256xf32>
    %182 = arith.mulf %174, %181 : vector<32x256xf32>
    %183 = arith.truncf %182 : vector<32x256xf32> to vector<32x256xbf16>
    %c0_66 = arith.constant 0 : index
    %c0_67 = arith.constant 0 : index
    %c0_68 = arith.constant 0 : index
    %184 = vector.load %arg14[%c0_66, %c0_67, %c0_68] : memref<1x256x64xbf16, #tpu.memory_space<vmem>>, vector<1x256x64xbf16>
    %185 = vector.shape_cast %184 : vector<1x256x64xbf16> to vector<256x64xbf16>
    %cst_69 = arith.constant dense<0.000000e+00> : vector<32x64xf32>
    %186 = tpu.matmul %183, %185, %cst_69 {dimension_numbers = #tpu.dot_dimension_numbers<[1], [0], [0], [1], [0, 0, 1, 1], [], []>} : vector<32x256xbf16>, vector<256x64xbf16>, vector<32x64xf32> -> vector<32x64xf32>
    %c0_70 = arith.constant 0 : index
    %c0_71 = arith.constant 0 : index
    %c0_72 = arith.constant 0 : index
    %187 = vector.load %arg15[%c0_70, %c0_71, %c0_72] : memref<1x1x64xf32, #tpu.memory_space<vmem>>, vector<1x1x64xf32>
    %188 = vector.shape_cast %187 : vector<1x1x64xf32> to vector<1x64xf32>
    %189 = vector.broadcast %188 : vector<1x64xf32> to vector<32x64xf32>
    %190 = arith.addf %186, %189 : vector<32x64xf32>
    %191 = arith.addf %142, %190 : vector<32x64xf32>
    %c1_i32 = arith.constant 1 : i32
    %192 = arith.cmpi eq, %arg1, %c1_i32 : i32
    %true = arith.constant true
    %193 = arith.xori %192, %true : i1
    %194 = arith.extui %193 : i1 to i32
    %c0_i32_73 = arith.constant 0 : i32
    %195 = arith.cmpi ne, %194, %c0_i32_73 : i32
    scf.if %195 {
      %198 = vector.shape_cast %191 : vector<32x64xf32> to vector<2x16x64xf32>
      %c0_75 = arith.constant 0 : index
      %c0_76 = arith.constant 0 : index
      %c0_77 = arith.constant 0 : index
      %199 = vector.load %arg18[%c0_75, %c0_76, %c0_77] : memref<2x16x64xf32, #tpu.memory_space<vmem>>, vector<2x16x64xf32>
      tpu.vector_store %arg18[%c0_75, %c0_76, %c0_77], %198 {strides = array<i32>} : memref<2x16x64xf32, #tpu.memory_space<vmem>>, vector<2x16x64xf32>,
    } else {
    }
    %196 = arith.extui %192 : i1 to i32
    %c0_i32_74 = arith.constant 0 : i32
    %197 = arith.cmpi ne, %196, %c0_i32_74 : i32
    scf.if %197 {
      %c0_75 = arith.constant 0 : index
      %c0_76 = arith.constant 0 : index
      %198 = vector.load %arg16[%c0_75, %c0_76] : memref<1x64xf32, #tpu.memory_space<vmem>>, vector<1x64xf32>
      %c0_77 = arith.constant 0 : index
      %c0_78 = arith.constant 0 : index
      %199 = vector.load %arg17[%c0_77, %c0_78] : memref<1x64xf32, #tpu.memory_space<vmem>>, vector<1x64xf32>
      %cst_79 = arith.constant dense<0.000000e+00> : vector<32xf32>
      %200 = vector.multi_reduction <add>, %191, %cst_79 [1] : vector<32x64xf32> to vector<32xf32>
      %201 = vector.shape_cast %200 : vector<32xf32> to vector<32x1xf32>
      %cst_80 = arith.constant 6.400000e+01 : f32
      %202 = vector.broadcast %cst_80 : f32 to vector<32x1xf32>
      %203 = arith.divf %201, %202 : vector<32x1xf32>
      %204 = vector.broadcast %203 : vector<32x1xf32> to vector<32x64xf32>
      %205 = arith.subf %191, %204 : vector<32x64xf32>
      %206 = arith.mulf %205, %205 : vector<32x64xf32>
      %cst_81 = arith.constant dense<0.000000e+00> : vector<32xf32>
      %207 = vector.multi_reduction <add>, %206, %cst_81 [1] : vector<32x64xf32> to vector<32xf32>
      %208 = vector.shape_cast %207 : vector<32xf32> to vector<32x1xf32>
      %cst_82 = arith.constant 6.400000e+01 : f32
      %209 = vector.broadcast %cst_82 : f32 to vector<32x1xf32>
      %210 = arith.divf %208, %209 : vector<32x1xf32>
      %cst_83 = arith.constant 9.99999974E-6 : f32
      %211 = vector.broadcast %cst_83 : f32 to vector<32x1xf32>
      %212 = arith.addf %210, %211 : vector<32x1xf32>
      %213 = math.rsqrt %212 : vector<32x1xf32>
      %214 = vector.broadcast %213 : vector<32x1xf32> to vector<32x64xf32>
      %215 = arith.mulf %205, %214 : vector<32x64xf32>
      %216 = vector.broadcast %198 : vector<1x64xf32> to vector<32x64xf32>
      %217 = arith.mulf %215, %216 : vector<32x64xf32>
      %218 = vector.broadcast %199 : vector<1x64xf32> to vector<32x64xf32>
      %219 = arith.addf %217, %218 : vector<32x64xf32>
      %220 = vector.shape_cast %219 : vector<32x64xf32> to vector<2x16x64xf32>
      %c0_84 = arith.constant 0 : index
      %c0_85 = arith.constant 0 : index
      %c0_86 = arith.constant 0 : index
      %221 = vector.load %arg18[%c0_84, %c0_85, %c0_86] : memref<2x16x64xf32, #tpu.memory_space<vmem>>, vector<2x16x64xf32>
      tpu.vector_store %arg18[%c0_84, %c0_85, %c0_86], %220 {strides = array<i32>} : memref<2x16x64xf32, #tpu.memory_space<vmem>>, vector<2x16x64xf32>,
    } else {
    }
    return
  }
  func.func @transform_0(%arg0: i32, %arg1: i32) -> (i32, i32, i32) {
    %c0_i32 = arith.constant 0 : i32
    %c0_i32_0 = arith.constant 0 : i32
    %c0_i32_1 = arith.constant 0 : i32
    return %arg0, %c0_i32, %c0_i32_0 : i32, i32, i32
  }
  func.func @transform_1(%arg0: i32, %arg1: i32) -> (i32, i32) {
    %c0_i32 = arith.constant 0 : i32
    %c0_i32_0 = arith.constant 0 : i32
    %c0_i32_1 = arith.constant 0 : i32
    return %c0_i32, %c0_i32_0 : i32, i32
  }
  func.func @transform_2(%arg0: i32, %arg1: i32) -> (i32, i32, i32) {
    %c0_i32 = arith.constant 0 : i32
    %c0_i32_0 = arith.constant 0 : i32
    %c0_i32_1 = arith.constant 0 : i32
    return %arg1, %c0_i32, %c0_i32_0 : i32, i32, i32
  }
  func.func @transform_3(%arg0: i32, %arg1: i32) -> (i32, i32, i32) {
    %c0_i32 = arith.constant 0 : i32
    %c0_i32_0 = arith.constant 0 : i32
    %c0_i32_1 = arith.constant 0 : i32
    return %arg1, %c0_i32, %c0_i32_0 : i32, i32, i32
  }
  func.func @transform_4(%arg0: i32, %arg1: i32) -> (i32, i32, i32) {
    %c0_i32 = arith.constant 0 : i32
    %c0_i32_0 = arith.constant 0 : i32
    %c0_i32_1 = arith.constant 0 : i32
    return %arg1, %c0_i32, %c0_i32_0 : i32, i32, i32
  }
  func.func @transform_5(%arg0: i32, %arg1: i32) -> (i32, i32, i32) {
    %c0_i32 = arith.constant 0 : i32
    %c0_i32_0 = arith.constant 0 : i32
    %c0_i32_1 = arith.constant 0 : i32
    return %arg1, %c0_i32, %c0_i32_0 : i32, i32, i32
  }
  func.func @transform_6(%arg0: i32, %arg1: i32) -> (i32, i32, i32) {
    %c0_i32 = arith.constant 0 : i32
    %c0_i32_0 = arith.constant 0 : i32
    %c0_i32_1 = arith.constant 0 : i32
    return %arg1, %c0_i32, %c0_i32_0 : i32, i32, i32
  }
  func.func @transform_7(%arg0: i32, %arg1: i32) -> (i32, i32, i32) {
    %c0_i32 = arith.constant 0 : i32
    %c0_i32_0 = arith.constant 0 : i32
    %c0_i32_1 = arith.constant 0 : i32
    return %arg1, %c0_i32, %c0_i32_0 : i32, i32, i32
  }
  func.func @transform_8(%arg0: i32, %arg1: i32) -> (i32, i32, i32) {
    %c0_i32 = arith.constant 0 : i32
    %c0_i32_0 = arith.constant 0 : i32
    %c0_i32_1 = arith.constant 0 : i32
    return %arg1, %c0_i32, %c0_i32_0 : i32, i32, i32
  }
  func.func @transform_9(%arg0: i32, %arg1: i32) -> (i32, i32, i32) {
    %c0_i32 = arith.constant 0 : i32
    %c0_i32_0 = arith.constant 0 : i32
    %c0_i32_1 = arith.constant 0 : i32
    return %arg1, %c0_i32, %c0_i32_0 : i32, i32, i32
  }
  func.func @transform_10(%arg0: i32, %arg1: i32) -> (i32, i32, i32) {
    %c0_i32 = arith.constant 0 : i32
    %c0_i32_0 = arith.constant 0 : i32
    %c0_i32_1 = arith.constant 0 : i32
    return %arg1, %c0_i32, %c0_i32_0 : i32, i32, i32
  }
  func.func @transform_11(%arg0: i32, %arg1: i32) -> (i32, i32, i32) {
    %c0_i32 = arith.constant 0 : i32
    %c0_i32_0 = arith.constant 0 : i32
    %c0_i32_1 = arith.constant 0 : i32
    return %arg1, %c0_i32, %c0_i32_0 : i32, i32, i32
  }
  func.func @transform_12(%arg0: i32, %arg1: i32) -> (i32, i32, i32) {
    %c0_i32 = arith.constant 0 : i32
    %c0_i32_0 = arith.constant 0 : i32
    %c0_i32_1 = arith.constant 0 : i32
    return %arg1, %c0_i32, %c0_i32_0 : i32, i32, i32
  }
  func.func @transform_13(%arg0: i32, %arg1: i32) -> (i32, i32, i32) {
    %c0_i32 = arith.constant 0 : i32
    %c0_i32_0 = arith.constant 0 : i32
    %c0_i32_1 = arith.constant 0 : i32
    return %arg1, %c0_i32, %c0_i32_0 : i32, i32, i32
  }
  func.func @transform_14(%arg0: i32, %arg1: i32) -> (i32, i32) {
    %c0_i32 = arith.constant 0 : i32
    %c0_i32_0 = arith.constant 0 : i32
    %c0_i32_1 = arith.constant 0 : i32
    return %c0_i32, %c0_i32_0 : i32, i32
  }
  func.func @transform_15(%arg0: i32, %arg1: i32) -> (i32, i32) {
    %c0_i32 = arith.constant 0 : i32
    %c0_i32_0 = arith.constant 0 : i32
    %c0_i32_1 = arith.constant 0 : i32
    return %c0_i32, %c0_i32_0 : i32, i32
  }
  func.func @transform_16(%arg0: i32, %arg1: i32) -> (i32, i32, i32) {
    %c0_i32 = arith.constant 0 : i32
    %c0_i32_0 = arith.constant 0 : i32
    %c0_i32_1 = arith.constant 0 : i32
    return %arg0, %c0_i32, %c0_i32_0 : i32, i32, i32
  }
}

</mosaic_0001>

<bundles_post_ra>
// kernel: clip_forward.1
= control target key start
LH: loop header
LB: loop body
LE: loop exit
PB: predicated region body
PF: predicated region fallthrough
CT: control target
= control target key end

     0   :  { %s5783_s0 = inlined_call_operand.hbm [shape: f32[4,16,64], index: 0, kind: input, shape index: {}]   ;;  %s5784_s1 = inlined_call_operand.hbm [shape: f32[16,16], index: 1, kind: input, shape index: {}]   ;;  %s5785_s2 = inlined_call_operand.hbm [shape: f32[2,1,64], index: 2, kind: input, shape index: {}]   ;;  %s5786_s3 = inlined_call_operand.hbm [shape: f32[2,1,64], index: 3, kind: input, shape index: {}]   ;;  %s5787_s4 = inlined_call_operand.hbm [shape: bf16[2,64,192], index: 4, kind: input, shape index: {}]   ;;  %s5788_s5 = inlined_call_operand.hbm [shape: f32[2,1,192], index: 5, kind: input, shape index: {}]   ;;  %s5789_s6 = inlined_call_operand.hbm [shape: bf16[2,64,64], index: 6, kind: input, shape index: {}]   ;;  %s5790_s7 = inlined_call_operand.hbm [shape: f32[2,1,64], index: 7, kind: input, shape index: {}]   ;;  %s5791_s8 = inlined_call_operand.hbm [shape: f32[2,1,64], index: 8, kind: input, shape index: {}]   ;;  %s5792_s9 = inlined_call_operand.hbm [shape: f32[2,1,64], index: 9, kind: input, shape index: {}]   ;;  %s5793_s10 = inlined_call_operand.hbm [shape: bf16[2,64,256], index: 10, kind: input, shape index: {}]   ;;  %s5794_s11 = inlined_call_operand.hbm [shape: f32[2,1,256], index: 11, kind: input, shape index: {}]   ;;  %s5795_s12 = inlined_call_operand.hbm [shape: bf16[2,256,64], index: 12, kind: input, shape index: {}]   ;;  %s5796_s13 = inlined_call_operand.hbm [shape: f32[2,1,64], index: 13, kind: input, shape index: {}]   ;;  %s5797_s14 = inlined_call_operand.hbm [shape: f32[1,64], index: 14, kind: input, shape index: {}]   ;;  %s5798_s15 = inlined_call_operand.hbm [shape: f32[1,64], index: 15, kind: input, shape index: {}]   ;;  %s5799_s16 = inlined_call_operand.hbm [shape: f32[4,16,64], index: 16, kind: output, shape index: {}]  }
   0x1   :  { %5847 = sst [smem:[#allocation43_spill]] %s5783_s0 }
   0x2   :  { %5848 = sst [smem:[#allocation44_spill]] %s5784_s1 }
   0x3   :  { %5849 = sst [smem:[#allocation45_spill]] %s5785_s2 }
   0x4   :  { %5850 = sst [smem:[#allocation46_spill]] %s5786_s3 }
   0x5   :  { %5851 = sst [smem:[#allocation47_spill]] %s5787_s4 }
   0x6   :  { %5852 = sst [smem:[#allocation48_spill]] %s5788_s5 }
   0x7   :  { %5853 = sst [smem:[#allocation49_spill]] %s5789_s6 }
   0x8   :  { %5854 = sst [smem:[#allocation50_spill]] %s5790_s7 }
   0x9   :  { %5855 = sst [smem:[#allocation51_spill]] %s5791_s8 }
   0xa   :  { %5856 = sst [smem:[#allocation52_spill]] %s5792_s9 }
   0xb   :  { %5857 = sst [smem:[#allocation53_spill]] %s5793_s10 }
   0xc   :  { %5858 = sst [smem:[#allocation54_spill]] %s5794_s11 }
   0xd   :  { %5859 = sst [smem:[#allocation55_spill]] %s5795_s12 }
   0xe   :  { %5860 = sst [smem:[#allocation56_spill]] %s5796_s13 }
   0xf   :  { %5861 = sst [smem:[#allocation57_spill]] %s5797_s14 }
  0x10   :  { %5862 = sst [smem:[#allocation58_spill]] %s5798_s15 }
  0x11   :  { %5863 = sst [smem:[#allocation59_spill]] %s5799_s16 }
  0x12   :  { %21 = vsyncpa [#allocation3], 0 }
  0x13   :  { %23 = vsyncpa [#allocation3 + $0x1], 0 }
  0x14   :  { %24 = vsyncpa [#allocation6], 0 }
  0x15   :  { %25 = vsyncpa [#allocation21], 0 }
  0x16   :  { %26 = vsyncpa [#allocation4], 0 }
  0x17   :  { %28 = vsyncpa [#allocation4 + $0x1], 0  ;;  %s4643_s21 = smov 0   ;;  %s4645_s22 = smov 0  }
  0x18   :  { %s4647_s23 = smov 0   ;;  %s4649_s24 = smov 0  }
  0x19   :  { %s4651_s25 = smov 0   ;;  %s4653_s26 = smov 0  }
  0x1a   :  { %s4655_s27 = smov 0   ;;  %s4657_s28 = smov 0  }
  0x1b   :  { %s4659_s29 = smov 0   ;;  %s4661_s30 = smov 0  }
  0x1c   :  { %s4663_s0 = smov 0  }
  0x1d LB: > { %5864 = sst [smem:[#allocation29_spill]] %s4483_s21  ;;  %s43_s17 = sadd.s32 1, %s4515_s29  ;;  %s4523_s0 = sphi %s4663_s0, %s34_s0   ;;  %s4519_s30 = sphi %s4661_s30, %s5964_s30   ;;  %s4515_s29 = sphi %s4659_s29, %s5963_s29   ;;  %s4511_s28 = sphi %s4657_s28, %s5962_s28   ;;  %s4507_s27 = sphi %s4655_s27, %s5961_s27   ;;  %s4503_s26 = sphi %s4653_s26, %s5960_s26   ;;  %s4499_s25 = sphi %s4651_s25, %s5959_s25   ;;  %s4495_s24 = sphi %s4649_s24, %s5958_s24   ;;  %s4491_s23 = sphi %s4647_s23, %s5957_s23   ;;  %s4487_s22 = sphi %s4645_s22, %s5956_s22   ;;  %s4483_s21 = sphi %s4643_s21, %s5955_s21  }
  0x1e   : > { %5865 = sst [smem:[#allocation30_spill]] %s4487_s22  ;;  %s46_s18 = sadd.s32 1, %s4519_s30 }
  0x1f   : > { %5866 = sst [smem:[#allocation31_spill]] %s4491_s23  ;;  %p44_p0 = scmp.ge.s32.totalorder %s43_s17, 2 }
  0x20   : > { %5867 = sst [smem:[#allocation32_spill]] %s4495_s24  ;;  %s53_s19 = sadd.s32 1, %s4503_s26 }
  0x21   : > { %5868 = sst [smem:[#allocation33_spill]] %s4499_s25  ;;  %p5814_p1 = scmp.ne.s32.totalorder %s4503_s26, %s4499_s25 }
  0x22   : > { %5869 = sst [smem:[#allocation34_spill]] %s4503_s26  ;;  %p61_p2 = scmp.eq.s32.totalorder %s4523_s0, 0 }
  0x23   : > { %5870 = sst [smem:[#allocation35_spill]] %s4507_s27  ;;  %s5966_s17 = smov (%p44_p0, %s43_s17), 0 }
  0x24   : > { %5871 = sst [smem:[#allocation36_spill]] %s4511_s28  ;;  %s5968_s18 = smov (!%p44_p0, %s46_s18), %s4519_s30 }
  0x25   : > { %5872 = sst [smem:[#allocation37_spill]] %s4515_s29  ;;  %p4710_p3 = por %p61_p2, %p5814_p1 }
  0x26   : > { %5873 = sst [smem:[#allocation38_spill]] %s4519_s30  ;;  %s97_s16 = ssub.s32 %s4515_s29, %s5966_s17 }
  0x27   : > { %5874 = sst [smem:[#allocation39_spill]] %s5966_s17  ;;  %p48_p4 = scmp.ge.s32.totalorder %s5968_s18, 2 }
  0x28   : > { %p98_p5 = scmp.eq.s32.totalorder %s97_s16, 0  ;;  %s100_s28 = sadd.s32 1, %s4491_s23 }
  0x29   : > { %p107_p6 = scmp.ne.s32.totalorder %s4491_s23, %s4487_s22  ;;  %s5970_s18 = smov (%p48_p4, %s5968_s18), 0 }
  0x2a   : > { %5876 = sst [smem:[#allocation40_spill]] %s5970_s18  ;;  %s50_s13 = ssub.s32 %s4519_s30, %s5970_s18 }
  0x2b   : > { %s4722_s27 = scalar_select %p98_p5, %s4491_s23, %s100_s28  }
  0x2c   : > { %p4726_p7 = por %p107_p6, %p61_p2  ;;  %p51_p8 = scmp.eq.s32.totalorder %s50_s13, 0 }
  0x2d   : > { %5877 = sst [smem:[#allocation41_spill]] %s4722_s27  ;;  %p3631_p9 = scmp.lt.s32.totalorder %s4523_s0, 4 }
  0x2e   : > { %s4731_s14 = scalar_select %p51_p8, %s4503_s26, %s53_s19  }
  0x2f   : > { %s526_s16 = sand.u32 1, %s4523_s0   ;;  %s528_s17 = sand.u32 1, %s4503_s26  }
  0x30   : > { %5879 = sst [smem:[#allocation42_spill]] %s4731_s14  ;;  %s3227_s1 = sshll.u32 %s528_s17, 5 }
  0x31   : > { %s3351_s12 = sshll.u32 %s4519_s30, 9  ;;  %s5880_s25 = sld [smem:[#allocation43_spill]] }
  0x32   : > { %s530_s18 = scalar_lea.vmem [#allocation2], %s3227_s1  ;;  %p4744_p10 = pnand %p3631_p9, %p4710_p3 }
  0x33   : > { %s538_s27 = sshll.u32 %s530_s18, 4  ;;  %p4752_p11 = pnand %p3631_p9, %p4726_p7  ;;  %s4748_s27 = int_to_ptr.vmem [resolvable:$true] %s538_s27 }
  0x34   : > { %s4759_s22 = scalar_lea.sflag [#allocation3], %s526_s16  ;;  %p3913_p13 = pneg %p4744_p10 }
  0x35   : > { %s5883_s21 = scalar_select %p4752_p11, 1, 0 }
  0x37   : > { %s5881_s11 = smov %s5880_s25  ;;  %s4740_s28 = scalar_lea.hbm %s5880_s25, %s3351_s12 }
  0x38   : > { %s4757_s12 = sand.u32 1, %s4491_s23   ;;  %s3911_s1 = scalar_lea.hbm %s4740_s28, 512 }
  0x39   : > { %p3912_p12 = scmp.ne.s32.totalorder %s4740_s28, %s3911_s1  ;;  %s3916_s15 = scalar_lea.hbm %s5881_s11, 1024 }
  0x3a   : > { %p3917_p3 = scmp.lt.u32.totalorder %s4740_s28, %s5881_s11  ;;  %p3918_p4 = scmp.lt.u32.totalorder %s3916_s15, %s3911_s1 }
  0x3b   : > { %p3914_p0 = pnand %p3913_p13, %p3912_p12  ;;  %p3920_p6 = scmp.lt.u32.totalorder %s3911_s1, %s4740_s28 }
  0x3c   : > { %p3919_p5 = por %p3918_p4, %p3917_p3 }
  0x3d   : > { %p3915_p2 = pneg %p3914_p0 }
  0x3e   : > { %p3921_p7 = por %p3920_p6, %p3919_p5 }
  0x40   : > { %p3922_p8 = pnand %p3921_p7, %p3915_p2 }
  0x42   : > { %3925 = shalt.err (!%p3922_p8)
}
  0x43   : > { %s3926_s20 = scalar_lea.vmem %s4748_s27, 512  ;;  %s4525_s16 = smov [#allocation2]  }
  0x44   : > { %p3927_p9 = scmp.ne.s32.totalorder %s4748_s27, %s3926_s20  ;;  %s3931_s25 = sshll.u32 %s4525_s16, 4  ;;  %s3932_s25 = int_to_ptr.vmem [resolvable:$false] %s3931_s25 }
  0x45   : > { %s3933_s17 = scalar_lea.vmem %s3932_s25, 1024  ;;  %p3934_p1 = scmp.lt.s32.totalorder %s4748_s27, %s3932_s25 }
  0x46   : > { %p3929_p12 = pnand %p3927_p9, %p3913_p13  ;;  %p3935_p3 = scmp.lt.s32.totalorder %s3933_s17, %s3926_s20 }
  0x48   : > { %p3930_p0 = pneg %p3929_p12  ;;  %p3936_p4 = por %p3935_p3, %p3934_p1 }
  0x4a   : > { %p3937_p5 = pnand %p3936_p4, %p3930_p0 }
  0x4c   : > { %3940 = shalt.err (!%p3937_p5)
}
  0x4d   : > { %s5815_s1 = smov 128   ;;  %s5817_s15 = smov 8  }
  0x4e   : > { %3587 = dma.hbm_to_vmem [thread:$0]  (!%p4744_p10), %s4740_s28, 512, %s4748_s27, %s4759_s22, %s5815_s1, %s5815_s1, %s5817_s15  }
  0x4f   : > { %s4791_s18 = sshll.u32 %s4515_s29, 4  ;;  %s551_s19 = scalar_lea.vmem [#allocation7], %s4757_s12 }
  0x50   : > { %s558_s20 = sshll.u32 %s551_s19, 4  ;;  %s5884_s2 = sld [smem:[#allocation45_spill]]  ;;  %s559_s20 = int_to_ptr.vmem [resolvable:$true] %s558_s20 }
  0x51   : > { %p4804_p13 = pneg %p4752_p11 }
  0x53   : > { %s5885_s27 = scalar_select %p4804_p13, 1, 0 }
  0x56   : > { %s4798_s17 = scalar_lea.hbm %s5884_s2, %s4791_s18  ;;  %s3946_s16 = scalar_lea.hbm %s5884_s2, 32 }
  0x57   : > { %s3941_s13 = scalar_lea.hbm %s4798_s17, 16  ;;  %p3947_p6 = scmp.lt.u32.totalorder %s4798_s17, %s5884_s2 }
  0x58   : > { %p3942_p1 = scmp.ne.s32.totalorder %s4798_s17, %s3941_s13  ;;  %p3948_p7 = scmp.lt.u32.totalorder %s3946_s16, %s3941_s13 }
  0x59   : > { %p3950_p9 = scmp.lt.u32.totalorder %s3941_s13, %s4798_s17 }
  0x5a   : > { %p3944_p10 = pnand %p4804_p13, %p3942_p1  ;;  %p3949_p8 = por %p3948_p7, %p3947_p6 }
  0x5c   : > { %p3945_p2 = pneg %p3944_p10  ;;  %p3951_p12 = por %p3950_p9, %p3949_p8 }
  0x5e   : > { %p3952_p0 = pnand %p3951_p12, %p3945_p2 }
  0x60   : > { %3955 = shalt.err (!%p3952_p0)
}
  0x61   : > { %s3956_s15 = scalar_lea.vmem %s559_s20, 16  ;;  %s4528_s11 = smov [#allocation7]  }
  0x62   : > { %p3957_p3 = scmp.ne.s32.totalorder %s559_s20, %s3956_s15  ;;  %s3961_s30 = sshll.u32 %s4528_s11, 4  ;;  %s3962_s30 = int_to_ptr.vmem [resolvable:$false] %s3961_s30 }
  0x63   : > { %s3963_s28 = scalar_lea.vmem %s3962_s30, 32  ;;  %p3964_p1 = scmp.lt.s32.totalorder %s559_s20, %s3962_s30 }
  0x64   : > { %p3959_p4 = pnand %p3957_p3, %p4804_p13  ;;  %p3965_p10 = scmp.lt.s32.totalorder %s3963_s28, %s3956_s15 }
  0x66   : > { %p3960_p5 = pneg %p3959_p4  ;;  %p3966_p11 = por %p3965_p10, %p3964_p1 }
  0x68   : > { %p3967_p6 = pnand %p3966_p11, %p3960_p5 }
  0x6a   : > { %3970 = shalt.err (!%p3967_p6)
}
  0x6b   : > { %p5886_p7 = scmp.ne.s32.totalorder %s5883_s21, 0  ;;  %s5887_s3 = sld [smem:[#allocation46_spill]] }
  0x6c   : > { %s568_s30 = scalar_lea.vmem [#allocation8], %s4757_s12 }
  0x6d   : > { %3590 = dma.hbm_to_vmem [thread:$0]  (!%p5886_p7), %s4798_s17, 16, %s559_s20, %s4759_s22  }
  0x6e   : > { %s575_s15 = sshll.u32 %s568_s30, 4  ;;  %s576_s15 = int_to_ptr.vmem [resolvable:$true] %s575_s15 }
  0x71   : > { %s4828_s11 = scalar_lea.hbm %s5887_s3, %s4791_s18  ;;  %s3976_s17 = scalar_lea.hbm %s5887_s3, 32 }
  0x72   : > { %s3971_s16 = scalar_lea.hbm %s4828_s11, 16  ;;  %p3977_p9 = scmp.lt.u32.totalorder %s4828_s11, %s5887_s3 }
  0x73   : > { %p3972_p11 = scmp.ne.s32.totalorder %s4828_s11, %s3971_s16  ;;  %p3978_p12 = scmp.lt.u32.totalorder %s3976_s17, %s3971_s16 }
  0x74   : > { %p3980_p3 = scmp.lt.u32.totalorder %s3971_s16, %s4828_s11 }
  0x75   : > { %p3974_p2 = pnand %p3972_p11, %p4804_p13  ;;  %p3979_p0 = por %p3978_p12, %p3977_p9 }
  0x77   : > { %p3975_p8 = pneg %p3974_p2  ;;  %p3981_p4 = por %p3980_p3, %p3979_p0 }
  0x79   : > { %p3982_p5 = pnand %p3981_p4, %p3975_p8 }
  0x7b   : > { %3985 = shalt.err (!%p3982_p5)
}
  0x7c   : > { %s3986_s13 = scalar_lea.vmem %s576_s15, 16  ;;  %s4529_s30 = smov [#allocation8]  }
  0x7d   : > { %p3987_p1 = scmp.ne.s32.totalorder %s576_s15, %s3986_s13  ;;  %s3991_s19 = sshll.u32 %s4529_s30, 4  ;;  %s3992_s19 = int_to_ptr.vmem [resolvable:$false] %s3991_s19 }
  0x7e   : > { %s3993_s25 = scalar_lea.vmem %s3992_s19, 32  ;;  %p3994_p11 = scmp.lt.s32.totalorder %s576_s15, %s3992_s19 }
  0x7f   : > { %p3989_p10 = pnand %p3987_p1, %p4804_p13  ;;  %p3995_p2 = scmp.lt.s32.totalorder %s3993_s25, %s3986_s13 }
  0x81   : > { %p3990_p6 = pneg %p3989_p10  ;;  %p3996_p7 = por %p3995_p2, %p3994_p11 }
  0x83   : > { %p3997_p9 = pnand %p3996_p7, %p3990_p6 }
  0x85   : > { %4000 = shalt.err (!%p3997_p9)
}
  0x86   : > { %p5888_p12 = scmp.ne.s32.totalorder %s5883_s21, 0  ;;  %s5823_s16 = sshll.u32 %s4515_s29, 10 }
  0x87   : > { %s5889_s20 = sshll.u32 %s4757_s12, 6  ;;  %s5890_s4 = sld [smem:[#allocation47_spill]] }
  0x88   : > { %3593 = dma.hbm_to_vmem [thread:$0]  (!%p5888_p12), %s4828_s11, 16, %s576_s15, %s4759_s22  }
  0x89   : > { %s586_s17 = scalar_lea.vmem [#allocation9], %s5889_s20 }
  0x8a   : > { %s593_s28 = sshll.u32 %s586_s17, 4  ;;  %s4860_s28 = int_to_ptr.vmem [resolvable:$true] %s593_s28 }
  0x8d   : > { %s4858_s13 = scalar_lea.hbm %s5890_s4, %s5823_s16  ;;  %s4006_s25 = scalar_lea.hbm %s5890_s4, 2048 }
  0x8e   : > { %s4001_s30 = scalar_lea.hbm %s4858_s13, 1024  ;;  %p4007_p3 = scmp.lt.u32.totalorder %s4858_s13, %s5890_s4 }
  0x8f   : > { %p4002_p7 = scmp.ne.s32.totalorder %s4858_s13, %s4001_s30  ;;  %p4008_p4 = scmp.lt.u32.totalorder %s4006_s25, %s4001_s30 }
  0x90   : > { %p4010_p1 = scmp.lt.u32.totalorder %s4001_s30, %s4858_s13 }
  0x91   : > { %p4004_p8 = pnand %p4002_p7, %p4804_p13  ;;  %p4009_p5 = por %p4008_p4, %p4007_p3 }
  0x93   : > { %p4005_p0 = pneg %p4004_p8  ;;  %p4011_p10 = por %p4010_p1, %p4009_p5 }
  0x95   : > { %p4012_p6 = pnand %p4011_p10, %p4005_p0 }
  0x97   : > { %4015 = shalt.err (!%p4012_p6)
}
  0x98   : > { %s4016_s1 = scalar_lea.vmem %s4860_s28, 1024  ;;  %s4530_s19 = smov [#allocation9]  }
  0x99   : > { %p4017_p11 = scmp.ne.s32.totalorder %s4860_s28, %s4016_s1  ;;  %s4021_s11 = sshll.u32 %s4530_s19, 4  ;;  %s4022_s11 = int_to_ptr.vmem [resolvable:$false] %s4021_s11 }
  0x9a   : > { %s4023_s15 = scalar_lea.vmem %s4022_s11, 2048  ;;  %p4024_p7 = scmp.lt.s32.totalorder %s4860_s28, %s4022_s11 }
  0x9b   : > { %p4019_p2 = pnand %p4017_p11, %p4804_p13  ;;  %p4025_p8 = scmp.lt.s32.totalorder %s4023_s15, %s4016_s1 }
  0x9d   : > { %p4020_p9 = pneg %p4019_p2  ;;  %p4026_p3 = por %p4025_p8, %p4024_p7 }
  0x9f   : > { %p4027_p4 = pnand %p4026_p3, %p4020_p9 }
  0xa1   : > { %4030 = shalt.err (!%p4027_p4)
}
  0xa2   : > { %s5891_s30 = smov 8   ;;  %s5892_s25 = smov 128  }
  0xa3   : > { %3596 = dma.hbm_to_vmem [thread:$0]  (!%p5888_p12), %s4858_s13, 1024, %s4860_s28, %s4759_s22, %s5892_s25, %s5892_s25, %s5891_s30  }
  0xa4   : > { %s5825_s20 = sshll.u32 %s4757_s12, 1  ;;  %s5824_s17 = sshll.u32 %s4515_s29, 5 }
  0xa5   : > { %s5893_s5 = sld [smem:[#allocation48_spill]]  ;;  %s607_s15 = scalar_lea.vmem [#allocation10], %s5825_s20 }
  0xa6   : > { %s615_s16 = sshll.u32 %s607_s15, 4  ;;  %s616_s16 = int_to_ptr.vmem [resolvable:$true] %s615_s16 }
  0xab   : > { %s4894_s11 = scalar_lea.hbm %s5893_s5, %s5824_s17  ;;  %s4036_s1 = scalar_lea.hbm %s5893_s5, 64 }
  0xac   : > { %s4031_s3 = scalar_lea.hbm %s4894_s11, 32  ;;  %p4037_p10 = scmp.lt.u32.totalorder %s4894_s11, %s5893_s5 }
  0xad   : > { %p4032_p0 = scmp.ne.s32.totalorder %s4894_s11, %s4031_s3  ;;  %p4038_p6 = scmp.lt.u32.totalorder %s4036_s1, %s4031_s3 }
  0xae   : > { %p4040_p2 = scmp.lt.u32.totalorder %s4031_s3, %s4894_s11 }
  0xaf   : > { %p4034_p5 = pnand %p4032_p0, %p4804_p13  ;;  %p4039_p11 = por %p4038_p6, %p4037_p10 }
  0xb1   : > { %p4035_p1 = pneg %p4034_p5  ;;  %p4041_p9 = por %p4040_p2, %p4039_p11 }
  0xb3   : > { %p4042_p7 = pnand %p4041_p9, %p4035_p1 }
  0xb5   : > { %4045 = shalt.err (!%p4042_p7)
}
  0xb6   : > { %s4046_s15 = scalar_lea.vmem %s616_s16, 32  ;;  %s4531_s20 = smov [#allocation10]  }
  0xb7   : > { %p4047_p8 = scmp.ne.s32.totalorder %s616_s16, %s4046_s15  ;;  %s4051_s2 = sshll.u32 %s4531_s20, 4  ;;  %s4052_s2 = int_to_ptr.vmem [resolvable:$false] %s4051_s2 }
  0xb8   : > { %s4053_s28 = scalar_lea.vmem %s4052_s2, 64  ;;  %p4054_p0 = scmp.lt.s32.totalorder %s616_s16, %s4052_s2 }
  0xb9   : > { %p4049_p3 = pnand %p4047_p8, %p4804_p13  ;;  %p4055_p5 = scmp.lt.s32.totalorder %s4053_s28, %s4046_s15 }
  0xbb   : > { %p4050_p4 = pneg %p4049_p3  ;;  %p4056_p12 = por %p4055_p5, %p4054_p0 }
  0xbd   : > { %p4057_p6 = pnand %p4056_p12, %p4050_p4 }
  0xbf   : > { %4060 = shalt.err (!%p4057_p6)
}
  0xc0   : > { %p5894_p10 = scmp.ne.s32.totalorder %s5883_s21, 0  ;;  %s3354_s3 = sshll.u32 %s4515_s29, 9 }
  0xc1   : > { %s5895_s17 = sshll.u32 %s4757_s12, 5  ;;  %s5896_s6 = sld [smem:[#allocation49_spill]] }
  0xc2   : > { %3599 = dma.hbm_to_vmem [thread:$0]  (!%p5894_p10), %s4894_s11, 32, %s616_s16, %s4759_s22  }
  0xc3   : > { %s626_s13 = scalar_lea.vmem [#allocation11], %s5895_s17 }
  0xc4   : > { %s633_s1 = sshll.u32 %s626_s13, 4  ;;  %s4925_s1 = int_to_ptr.vmem [resolvable:$true] %s633_s1 }
  0xc7   : > { %s4923_s2 = scalar_lea.hbm %s5896_s6, %s3354_s3  ;;  %s4066_s28 = scalar_lea.hbm %s5896_s6, 1024 }
  0xc8   : > { %s4061_s15 = scalar_lea.hbm %s4923_s2, 512  ;;  %p4067_p2 = scmp.lt.u32.totalorder %s4923_s2, %s5896_s6 }
  0xc9   : > { %p4062_p12 = scmp.ne.s32.totalorder %s4923_s2, %s4061_s15  ;;  %p4068_p9 = scmp.lt.u32.totalorder %s4066_s28, %s4061_s15 }
  0xca   : > { %p4070_p8 = scmp.lt.u32.totalorder %s4061_s15, %s4923_s2 }
  0xcb   : > { %p4064_p1 = pnand %p4062_p12, %p4804_p13  ;;  %p4069_p7 = por %p4068_p9, %p4067_p2 }
  0xcd   : > { %p4065_p11 = pneg %p4064_p1  ;;  %p4071_p3 = por %p4070_p8, %p4069_p7 }
  0xcf   : > { %p4072_p4 = pnand %p4071_p3, %p4065_p11 }
  0xd1   : > { %4075 = shalt.err (!%p4072_p4)
}
  0xd2   : > { %s4076_s3 = scalar_lea.vmem %s4925_s1, 512  ;;  %s4532_s20 = smov [#allocation11]  }
  0xd3   : > { %p4077_p0 = scmp.ne.s32.totalorder %s4925_s1, %s4076_s3  ;;  %s4081_s19 = sshll.u32 %s4532_s20, 4  ;;  %s4082_s19 = int_to_ptr.vmem [resolvable:$false] %s4081_s19 }
  0xd4   : > { %s4083_s16 = scalar_lea.vmem %s4082_s19, 1024  ;;  %p4084_p12 = scmp.lt.s32.totalorder %s4925_s1, %s4082_s19 }
  0xd5   : > { %p4079_p5 = pnand %p4077_p0, %p4804_p13  ;;  %p4085_p1 = scmp.lt.s32.totalorder %s4083_s16, %s4076_s3 }
  0xd7   : > { %p4080_p6 = pneg %p4079_p5  ;;  %p4086_p2 = por %p4085_p1, %p4084_p12 }
  0xd9   : > { %p4087_p9 = pnand %p4086_p2, %p4080_p6 }
  0xdb   : > { %4090 = shalt.err (!%p4087_p9)
}
  0xdc   : > { %s5827_s15 = smov 64   ;;  %s5829_s11 = smov 4  }
  0xdd   : > { %3602 = dma.hbm_to_vmem [thread:$0]  (!%p5894_p10), %s4923_s2, 512, %s4925_s1, %s4759_s22, %s5827_s15, %s5827_s15, %s5829_s11  }
  0xde   : > { %s5897_s7 = sld [smem:[#allocation50_spill]]  ;;  %s646_s3 = scalar_lea.vmem [#allocation12], %s4757_s12 }
  0xdf   : > { %s653_s20 = sshll.u32 %s646_s3, 4  ;;  %s5898_s8 = sld [smem:[#allocation51_spill]]  ;;  %s654_s20 = int_to_ptr.vmem [resolvable:$true] %s653_s20 }
  0xe4   : > { %s4956_s13 = scalar_lea.hbm %s5897_s7, %s4791_s18  ;;  %s4096_s28 = scalar_lea.hbm %s5897_s7, 32 }
  0xe5   : > { %s4963_s4 = scalar_lea.hbm %s5898_s8, %s4791_s18  ;;  %s4091_s5 = scalar_lea.hbm %s4956_s13, 16 }
  0xe6   : > { %p4092_p11 = scmp.ne.s32.totalorder %s4956_s13, %s4091_s5  ;;  %p4097_p3 = scmp.lt.u32.totalorder %s4956_s13, %s5897_s7 }
  0xe7   : > { %p4098_p4 = scmp.lt.u32.totalorder %s4096_s28, %s4091_s5  ;;  %p4100_p5 = scmp.lt.u32.totalorder %s4091_s5, %s4956_s13 }
  0xe8   : > { %p4094_p7 = pnand %p4092_p11, %p4804_p13 }
  0xe9   : > { %p4099_p0 = por %p4098_p4, %p4097_p3 }
  0xea   : > { %p4095_p8 = pneg %p4094_p7 }
  0xeb   : > { %p4101_p6 = por %p4100_p5, %p4099_p0 }
  0xed   : > { %p4102_p12 = pnand %p4101_p6, %p4095_p8 }
  0xef   : > { %4105 = shalt.err (!%p4102_p12)
}
  0xf0   : > { %s4106_s3 = scalar_lea.vmem %s654_s20, 16  ;;  %s4535_s19 = smov [#allocation12]  }
  0xf1   : > { %p4107_p1 = scmp.ne.s32.totalorder %s654_s20, %s4106_s3  ;;  %s4111_s16 = sshll.u32 %s4535_s19, 4  ;;  %s4112_s16 = int_to_ptr.vmem [resolvable:$false] %s4111_s16 }
  0xf2   : > { %s4113_s1 = scalar_lea.vmem %s4112_s16, 32  ;;  %p4114_p11 = scmp.lt.s32.totalorder %s654_s20, %s4112_s16 }
  0xf3   : > { %p4109_p2 = pnand %p4107_p1, %p4804_p13  ;;  %p4115_p7 = scmp.lt.s32.totalorder %s4113_s1, %s4106_s3 }
  0xf5   : > { %p4110_p9 = pneg %p4109_p2  ;;  %p4116_p10 = por %p4115_p7, %p4114_p11 }
  0xf7   : > { %p4117_p3 = pnand %p4116_p10, %p4110_p9 }
  0xf9   : > { %4120 = shalt.err (!%p4117_p3)
}
  0xfa   : > { %p5899_p4 = scmp.ne.s32.totalorder %s5883_s21, 0  ;;  %s663_s5 = scalar_lea.vmem [#allocation13], %s4757_s12 }
  0xfb   : > { %s670_s15 = sshll.u32 %s663_s5, 4  ;;  %s5900_s9 = sld [smem:[#allocation52_spill]]  ;;  %s671_s15 = int_to_ptr.vmem [resolvable:$true] %s670_s15 }
  0xfc   : > { %3605 = dma.hbm_to_vmem [thread:$0]  (!%p5899_p4), %s4956_s13, 16, %s654_s20, %s4759_s22  }
  0xfd   : > { %s4121_s3 = scalar_lea.hbm %s4963_s4, 16  ;;  %s4126_s1 = scalar_lea.hbm %s5898_s8, 32 }
  0xfe   : > { %p4122_p10 = scmp.ne.s32.totalorder %s4963_s4, %s4121_s3  ;;  %p4127_p5 = scmp.lt.u32.totalorder %s4963_s4, %s5898_s8 }
  0xff   : > { %p4128_p6 = scmp.lt.u32.totalorder %s4126_s1, %s4121_s3  ;;  %p4130_p1 = scmp.lt.u32.totalorder %s4121_s3, %s4963_s4 }
 0x100   : > { %p4124_p8 = pnand %p4122_p10, %p4804_p13 }
 0x101   : > { %s4988_s17 = scalar_lea.hbm %s5900_s9, %s4791_s18  ;;  %p4129_p12 = por %p4128_p6, %p4127_p5 }
 0x102   : > { %p4125_p0 = pneg %p4124_p8 }
 0x103   : > { %p4131_p2 = por %p4130_p1, %p4129_p12 }
 0x105   : > { %p4132_p9 = pnand %p4131_p2, %p4125_p0 }
 0x107   : > { %4135 = shalt.err (!%p4132_p9)
}
 0x108   : > { %s4136_s13 = scalar_lea.vmem %s671_s15, 16  ;;  %s4536_s20 = smov [#allocation13]  }
 0x109   : > { %p4137_p11 = scmp.ne.s32.totalorder %s671_s15, %s4136_s13  ;;  %s4141_s5 = sshll.u32 %s4536_s20, 4  ;;  %s4142_s5 = int_to_ptr.vmem [resolvable:$false] %s4141_s5 }
 0x10a   : > { %s4143_s2 = scalar_lea.vmem %s4142_s5, 32  ;;  %p4144_p10 = scmp.lt.s32.totalorder %s671_s15, %s4142_s5 }
 0x10b   : > { %p4139_p7 = pnand %p4137_p11, %p4804_p13  ;;  %p4145_p8 = scmp.lt.s32.totalorder %s4143_s2, %s4136_s13 }
 0x10d   : > { %p4140_p3 = pneg %p4139_p7  ;;  %p4146_p4 = por %p4145_p8, %p4144_p10 }
 0x10f   : > { %p4147_p5 = pnand %p4146_p4, %p4140_p3 }
 0x111   : > { %4150 = shalt.err (!%p4147_p5)
}
 0x112   : > { %p5901_p6 = scmp.ne.s32.totalorder %s5883_s21, 0  ;;  %s680_s6 = scalar_lea.vmem [#allocation14], %s4757_s12 }
 0x113   : > { %s687_s11 = sshll.u32 %s680_s6, 4  ;;  %s5902_s28 = sshll.u32 %s4515_s29, 10  ;;  %s688_s11 = int_to_ptr.vmem [resolvable:$true] %s687_s11 }
 0x114   : > { %3608 = dma.hbm_to_vmem [thread:$0]  (!%p5901_p6), %s4963_s4, 16, %s671_s15, %s4759_s22  }
 0x115   : > { %s5903_s10 = sld [smem:[#allocation53_spill]]  ;;  %s4151_s1 = scalar_lea.hbm %s4988_s17, 16 }
 0x116   : > { %p4152_p4 = scmp.ne.s32.totalorder %s4988_s17, %s4151_s1  ;;  %s4156_s5 = scalar_lea.hbm %s5900_s9, 32 }
 0x117   : > { %p4157_p1 = scmp.lt.u32.totalorder %s4988_s17, %s5900_s9  ;;  %p4158_p2 = scmp.lt.u32.totalorder %s4156_s5, %s4151_s1 }
 0x118   : > { %p4154_p0 = pnand %p4152_p4, %p4804_p13  ;;  %p4160_p11 = scmp.lt.u32.totalorder %s4151_s1, %s4988_s17 }
 0x119   : > { %p4159_p9 = por %p4158_p2, %p4157_p1 }
 0x11a   : > { %p4155_p12 = pneg %p4154_p0 }
 0x11b   : > { %s5014_s16 = scalar_lea.hbm %s5903_s10, %s5902_s28  ;;  %p4161_p7 = por %p4160_p11, %p4159_p9 }
 0x11d   : > { %p4162_p3 = pnand %p4161_p7, %p4155_p12 }
 0x11f   : > { %4165 = shalt.err (!%p4162_p3)
}
 0x120   : > { %s4166_s15 = scalar_lea.vmem %s688_s11, 16  ;;  %s4537_s6 = smov [#allocation14]  }
 0x121   : > { %p4167_p10 = scmp.ne.s32.totalorder %s688_s11, %s4166_s15  ;;  %s4171_s28 = sshll.u32 %s4537_s6, 4  ;;  %s4172_s28 = int_to_ptr.vmem [resolvable:$false] %s4171_s28 }
 0x122   : > { %s4173_s3 = scalar_lea.vmem %s4172_s28, 32  ;;  %p4174_p4 = scmp.lt.s32.totalorder %s688_s11, %s4172_s28 }
 0x123   : > { %p4169_p8 = pnand %p4167_p10, %p4804_p13  ;;  %p4175_p0 = scmp.lt.s32.totalorder %s4173_s3, %s4166_s15 }
 0x125   : > { %p4170_p5 = pneg %p4169_p8  ;;  %p4176_p6 = por %p4175_p0, %p4174_p4 }
 0x127   : > { %p4177_p1 = pnand %p4176_p6, %p4170_p5 }
 0x129   : > { %4180 = shalt.err (!%p4177_p1)
}
 0x12a   : > { %p5904_p2 = scmp.ne.s32.totalorder %s5883_s21, 0  ;;  %s5905_s19 = sshll.u32 %s4757_s12, 6 }
 0x12b   : > { %s698_s1 = scalar_lea.vmem [#allocation15], %s5905_s19  ;;  %s5906_s20 = sshll.u32 %s4515_s29, 5 }
 0x12c   : > { %3611 = dma.hbm_to_vmem [thread:$0]  (!%p5904_p2), %s4988_s17, 16, %s688_s11, %s4759_s22  }
 0x12d   : > { %s705_s13 = sshll.u32 %s698_s1, 4  ;;  %s5907_s4 = sld [smem:[#allocation54_spill]]  ;;  %s5036_s13 = int_to_ptr.vmem [resolvable:$true] %s705_s13 }
 0x12e   : > { %s4181_s6 = scalar_lea.hbm %s5014_s16, 1024  ;;  %s4186_s17 = scalar_lea.hbm %s5903_s10, 2048 }
 0x12f   : > { %p4182_p6 = scmp.ne.s32.totalorder %s5014_s16, %s4181_s6  ;;  %p4187_p11 = scmp.lt.u32.totalorder %s5014_s16, %s5903_s10 }
 0x130   : > { %p4188_p7 = scmp.lt.u32.totalorder %s4186_s17, %s4181_s6  ;;  %p4190_p10 = scmp.lt.u32.totalorder %s4181_s6, %s5014_s16 }
 0x131   : > { %p4184_p12 = pnand %p4182_p6, %p4804_p13 }
 0x132   : > { %p4189_p3 = por %p4188_p7, %p4187_p11 }
 0x133   : > { %s5043_s15 = scalar_lea.hbm %s5907_s4, %s5906_s20  ;;  %p4185_p9 = pneg %p4184_p12 }
 0x134   : > { %p4191_p8 = por %p4190_p10, %p4189_p3 }
 0x136   : > { %p4192_p5 = pnand %p4191_p8, %p4185_p9 }
 0x138   : > { %4195 = shalt.err (!%p4192_p5)
}
 0x139   : > { %s4196_s1 = scalar_lea.vmem %s5036_s13, 1024  ;;  %s4538_s20 = smov [#allocation15]  }
 0x13a   : > { %p4197_p4 = scmp.ne.s32.totalorder %s5036_s13, %s4196_s1  ;;  %s4201_s5 = sshll.u32 %s4538_s20, 4  ;;  %s4202_s5 = int_to_ptr.vmem [resolvable:$false] %s4201_s5 }
 0x13b   : > { %s4203_s2 = scalar_lea.vmem %s4202_s5, 2048  ;;  %p4204_p6 = scmp.lt.s32.totalorder %s5036_s13, %s4202_s5 }
 0x13c   : > { %p4199_p0 = pnand %p4197_p4, %p4804_p13  ;;  %p4205_p12 = scmp.lt.s32.totalorder %s4203_s2, %s4196_s1 }
 0x13e   : > { %p4200_p1 = pneg %p4199_p0  ;;  %p4206_p11 = por %p4205_p12, %p4204_p6 }
 0x140   : > { %p4207_p7 = pnand %p4206_p11, %p4200_p1 }
 0x142   : > { %4210 = shalt.err (!%p4207_p7)
}
 0x143   : > { %3614 = dma.hbm_to_vmem [thread:$0]  (!%p5904_p2), %s5014_s16, 1024, %s5036_s13, %s4759_s22, %s5892_s25, %s5892_s25, %s5891_s30  }
 0x144   : > { %s5908_s6 = sshll.u32 %s4757_s12, 1  ;;  %s4211_s17 = scalar_lea.hbm %s5043_s15, 32 }
 0x145   : > { %s719_s28 = scalar_lea.vmem [#allocation16], %s5908_s6  ;;  %p4212_p9 = scmp.ne.s32.totalorder %s5043_s15, %s4211_s17 }
 0x146   : > { %s727_s3 = sshll.u32 %s719_s28, 4  ;;  %s4216_s1 = scalar_lea.hbm %s5907_s4, 64  ;;  %s728_s3 = int_to_ptr.vmem [resolvable:$true] %s727_s3 }
 0x147   : > { %p4214_p3 = pnand %p4212_p9, %p4804_p13  ;;  %p4217_p8 = scmp.lt.u32.totalorder %s5043_s15, %s5907_s4 }
 0x148   : > { %p4218_p5 = scmp.lt.u32.totalorder %s4216_s1, %s4211_s17  ;;  %p4220_p0 = scmp.lt.u32.totalorder %s4211_s17, %s5043_s15 }
 0x149   : > { %p4215_p10 = pneg %p4214_p3 }
 0x14a   : > { %p4219_p4 = por %p4218_p5, %p4217_p8 }
 0x14c   : > { %p4221_p1 = por %p4220_p0, %p4219_p4 }
 0x14e   : > { %p4222_p6 = pnand %p4221_p1, %p4215_p10 }
 0x150   : > { %4225 = shalt.err (!%p4222_p6)
}
 0x151   : > { %s4226_s16 = scalar_lea.vmem %s728_s3, 32  ;;  %s4539_s13 = smov [#allocation16]  }
 0x152   : > { %p4227_p12 = scmp.ne.s32.totalorder %s728_s3, %s4226_s16  ;;  %s4231_s2 = sshll.u32 %s4539_s13, 4  ;;  %s4232_s2 = int_to_ptr.vmem [resolvable:$false] %s4231_s2 }
 0x153   : > { %s4233_s6 = scalar_lea.vmem %s4232_s2, 64  ;;  %p4234_p9 = scmp.lt.s32.totalorder %s728_s3, %s4232_s2 }
 0x154   : > { %p4229_p11 = pnand %p4227_p12, %p4804_p13  ;;  %p4235_p3 = scmp.lt.s32.totalorder %s4233_s6, %s4226_s16 }
 0x156   : > { %p4230_p7 = pneg %p4229_p11  ;;  %p4236_p2 = por %p4235_p3, %p4234_p9 }
 0x158   : > { %p4237_p5 = pnand %p4236_p2, %p4230_p7 }
 0x15a   : > { %4240 = shalt.err (!%p4237_p5)
}
 0x15b   : > { %p5909_p8 = scmp.ne.s32.totalorder %s5883_s21, 0  ;;  %s5910_s28 = sld [smem:[#allocation33_spill]] }
 0x15c   : > { %s5911_s17 = sld [smem:[#allocation29_spill]]  ;;  %s5912_s11 = sld [smem:[#allocation30_spill]] }
 0x15d   : > { %3617 = dma.hbm_to_vmem [thread:$0]  (!%p5909_p8), %s5043_s15, 32, %s728_s3, %s4759_s22  }
 0x15e   : > { %s5091_s19 = sadd.s32 4294967295, %s4523_s0   ;;  %s3221_s1 = sadd.s32 4294967294, %s4523_s0  }
 0x15f   : > { %p5834_p10 = scmp.eq.s32.totalorder %s5091_s19, 0  ;;  %p465_p0 = scmp.eq.s32.totalorder %s5091_s19, 3 }
 0x160   : > { %p471_p6 = scmp.eq.s32.totalorder %s3221_s1, 3  ;;  %p3222_p3 = scmp.ge.s32.totalorder %s4523_s0, 1 }
 0x161   : > { %p66_p2 = scmp.ne.s32.totalorder %s5910_s28, %s4495_s24  ;;  %p5915_p11 = scmp.ne.s32.totalorder %s4503_s26, %s5910_s28 }
 0x162   : > { %p113_p4 = scmp.ne.s32.totalorder %s5912_s11, %s5911_s17  ;;  %p478_p5 = scmp.lt.s32.totalorder %s4523_s0, 5 }
 0x163   : > { %p5102_p1 = por %p5834_p10, %p66_p2  ;;  %p5115_p7 = por %p465_p0, %p5915_p11 }
 0x164   : > { %p5108_p12 = por %p113_p4, %p5834_p10  ;;  %p5119_p9 = por %p471_p6, %p66_p2 }
 0x165   : > { %s5913_s20 = scalar_select %p5102_p1, 1, 0 }
 0x166   : > { %s5914_s15 = scalar_select %p5108_p12, 1, 0 }
 0x167   : > { %s5916_s3 = scalar_select %p5115_p7, 1, 0 }
 0x168   : > { %s5917_s5 = scalar_select %p5119_p9, 1, 0 }
 0x169   : > { %s3251_s16 = sshll.u32 %s4757_s12, 7  ;;  %p5126_p1 = pnand %p3222_p3, %p478_p5 }
 0x16a   : > { %5918 = sst [smem:[#allocation29_spill]] %s5917_s5  ;;  %s4540_s2 = smov [#allocation5]  }
 0x16b   : > { %s5919_s13 = scalar_select %p5126_p1, 1, 0 }
 0x16c   : > { %s490_s6 = sshll.u32 %s4540_s2, 4  ;;  %p3574_p4 = pneg %p5126_p1  ;;  %s5130_s6 = int_to_ptr.vmem [resolvable:$true] %s490_s6 }
 0x16d   : > { %s3357_s28 = sshll.u32 %s4515_s29, 11  ;;  %s5920_s1 = sld [smem:[#allocation55_spill]] }
 0x16e   : > { %s738_s7 = scalar_lea.vmem [#allocation17], %s3251_s16  ;;  %p5142_p2 = pnand %p3574_p4, %p5834_p10 }
 0x16f   : > { %s745_s8 = sshll.u32 %s738_s7, 4  ;;  %s5146_s8 = int_to_ptr.vmem [resolvable:$true] %s745_s8 }
 0x170   : > { %s5921_s9 = scalar_select %p5142_p2, 1, 0 }
 0x173   : > { %s5138_s4 = scalar_lea.hbm %s5920_s1, %s3357_s28  ;;  %s4246_s11 = scalar_lea.hbm %s5920_s1, 4096 }
 0x174   : > { %s4241_s2 = scalar_lea.hbm %s5138_s4, 2048  ;;  %p4247_p3 = scmp.lt.u32.totalorder %s5138_s4, %s5920_s1 }
 0x175   : > { %p4242_p0 = scmp.ne.s32.totalorder %s5138_s4, %s4241_s2  ;;  %p4248_p5 = scmp.lt.u32.totalorder %s4246_s11, %s4241_s2 }
 0x176   : > { %p4250_p10 = scmp.lt.u32.totalorder %s4241_s2, %s5138_s4 }
 0x177   : > { %p4244_p6 = pnand %p4242_p0, %p4804_p13  ;;  %p4249_p4 = por %p4248_p5, %p4247_p3 }
 0x179   : > { %p4245_p11 = pneg %p4244_p6  ;;  %p4251_p9 = por %p4250_p10, %p4249_p4 }
 0x17b   : > { %p4252_p7 = pnand %p4251_p9, %p4245_p11 }
 0x17d   : > { %4255 = shalt.err (!%p4252_p7)
}
 0x17e   : > { %s4256_s7 = scalar_lea.vmem %s5146_s8, 2048  ;;  %s4541_s16 = smov [#allocation17]  }
 0x17f   : > { %p4257_p0 = scmp.ne.s32.totalorder %s5146_s8, %s4256_s7  ;;  %s4261_s28 = sshll.u32 %s4541_s16, 4  ;;  %s4262_s28 = int_to_ptr.vmem [resolvable:$false] %s4261_s28 }
 0x180   : > { %s4263_s10 = scalar_lea.vmem %s4262_s28, 4096  ;;  %p4264_p1 = scmp.lt.s32.totalorder %s5146_s8, %s4262_s28 }
 0x181   : > { %p4259_p6 = pnand %p4257_p0, %p4804_p13  ;;  %p4265_p2 = scmp.lt.s32.totalorder %s4263_s10, %s4256_s7 }
 0x183   : > { %p4260_p12 = pneg %p4259_p6  ;;  %p4266_p3 = por %p4265_p2, %p4264_p1 }
 0x185   : > { %p4267_p5 = pnand %p4266_p3, %p4260_p12 }
 0x187   : > { %4270 = shalt.err (!%p4267_p5)
}
 0x188   : > { %s5922_s29 = smov 4   ;;  %s5923_s2 = smov 64  }
 0x189   : > { %3620 = dma.hbm_to_vmem [thread:$0]  (!%p5909_p8), %s5138_s4, 2048, %s5146_s8, %s4759_s22, %s5923_s2, %s5923_s2, %s5922_s29  }
 0x18a   : > { %s5924_s16 = sld [smem:[#allocation44_spill]]  ;;  %p5925_p1 = scmp.ne.s32.totalorder %s5921_s9, 0 }
 0x18c   : > { %p5181_p12 = pneg %p5925_p1 }
 0x190   : > { %s4271_s1 = scalar_lea.hbm %s5924_s16, 256 }
 0x191   : > { %p4272_p10 = scmp.ne.s32.totalorder %s5924_s16, %s4271_s1  ;;  %p4278_p2 = scmp.lt.u32.totalorder %s4271_s1, %s5924_s16 }
 0x193   : > { %p4274_p7 = pnand %p5181_p12, %p4272_p10 }
 0x195   : > { %p4275_p9 = pneg %p4274_p7 }
 0x197   : > { %p4280_p11 = pnand %p4278_p2, %p4275_p9 }
 0x199   : > { %4283 = shalt.err (!%p4280_p11)
}
 0x19a   : > { %s4284_s8 = scalar_lea.vmem %s5130_s6, 256  ;;  %p4292_p3 = scmp.lt.s32.totalorder %s5130_s6, %s5130_s6 }
 0x19b   : > { %p4285_p4 = scmp.ne.s32.totalorder %s5130_s6, %s4284_s8  ;;  %p4293_p5 = scmp.lt.s32.totalorder %s4284_s8, %s4284_s8 }
 0x19d   : > { %p4287_p0 = pnand %p4285_p4, %p5181_p12  ;;  %p4294_p10 = por %p4293_p5, %p4292_p3 }
 0x19f   : > { %p4288_p6 = pneg %p4287_p0 }
 0x1a1   : > { %p4295_p7 = pnand %p4294_p10, %p4288_p6 }
 0x1a3   : > { %4298 = shalt.err (!%p4295_p7)
}
 0x1a4   : > { %3577 = dma.hbm_to_vmem [thread:$0]  (!%p5925_p1), %s5924_s16, 256, %s5130_s6, [#allocation6], %s5892_s25, %s5892_s25, %s5891_s30  }
 0x1a5   : > { %s4542_s4 = smov [#allocation19]   ;;  %s4543_s29 = smov [#allocation20]  }
 0x1a6   : > { %s504_s1 = sshll.u32 %s4542_s4, 4  ;;  %s515_s2 = sshll.u32 %s4543_s29, 4  ;;  %s505_s1 = int_to_ptr.vmem [resolvable:$true] %s504_s1  ;;  %s516_s2 = int_to_ptr.vmem [resolvable:$true] %s515_s2 }
 0x1a7   : > { %s5927_s28 = sld [smem:[#allocation57_spill]] }
 0x1ad   : > { %s5928_s10 = smov %s5927_s28  ;;  %s4299_s8 = scalar_lea.hbm %s5927_s28, 16 }
 0x1ae   : > { %p4300_p9 = scmp.ne.s32.totalorder %s5928_s10, %s4299_s8  ;;  %p4306_p4 = scmp.lt.u32.totalorder %s4299_s8, %s5928_s10 }
 0x1b0   : > { %p4302_p2 = pnand %p4300_p9, %p5181_p12 }
 0x1b2   : > { %p4303_p11 = pneg %p4302_p2 }
 0x1b4   : > { %p4308_p0 = pnand %p4306_p4, %p4303_p11 }
 0x1b6   : > { %4311 = shalt.err (!%p4308_p0)
}
 0x1b7   : > { %s4312_s30 = scalar_lea.vmem %s505_s1, 16  ;;  %s4319_s25 = scalar_lea.vmem %s505_s1, 32 }
 0x1b8   : > { %p4313_p6 = scmp.ne.s32.totalorder %s505_s1, %s4312_s30  ;;  %p4320_p10 = scmp.lt.s32.totalorder %s505_s1, %s505_s1 }
 0x1b9   : > { %p4321_p7 = scmp.lt.s32.totalorder %s4319_s25, %s4312_s30 }
 0x1ba   : > { %p4315_p3 = pnand %p4313_p6, %p5181_p12 }
 0x1bb   : > { %p4322_p8 = por %p4321_p7, %p4320_p10 }
 0x1bc   : > { %p4316_p5 = pneg %p4315_p3 }
 0x1be   : > { %p4323_p13 = pnand %p4322_p8, %p4316_p5 }
 0x1c0   : > { %4326 = shalt.err (!%p4323_p13)
}
 0x1c1   : > { %3580 = dma.hbm_to_vmem [thread:$0]  (!%p5925_p1), %s5928_s10, 16, %s505_s1, [#allocation6]  }
 0x1c2   : > { %s5929_s26 = sld [smem:[#allocation58_spill]] }
 0x1c8   : > { %s5930_s4 = smov %s5929_s26  ;;  %s4327_s29 = scalar_lea.hbm %s5929_s26, 16 }
 0x1c9   : > { %p4328_p9 = scmp.ne.s32.totalorder %s5930_s4, %s4327_s29  ;;  %p4334_p13 = scmp.lt.u32.totalorder %s4327_s29, %s5930_s4 }
 0x1cb   : > { %p4330_p2 = pnand %p4328_p9, %p5181_p12 }
 0x1cd   : > { %p4331_p8 = pneg %p4330_p2 }
 0x1cf   : > { %p4336_p11 = pnand %p4334_p13, %p4331_p8 }
 0x1d1   : > { %4339 = shalt.err (!%p4336_p11)
}
 0x1d2   : > { %s4340_s14 = scalar_lea.vmem %s516_s2, 16  ;;  %s4347_s1 = scalar_lea.vmem %s516_s2, 32 }
 0x1d3   : > { %p4341_p4 = scmp.ne.s32.totalorder %s516_s2, %s4340_s14  ;;  %p4348_p3 = scmp.lt.s32.totalorder %s516_s2, %s516_s2 }
 0x1d4   : > { %p4349_p5 = scmp.lt.s32.totalorder %s4347_s1, %s4340_s14 }
 0x1d5   : > { %p4343_p0 = pnand %p4341_p4, %p5181_p12 }
 0x1d6   : > { %p4350_p10 = por %p4349_p5, %p4348_p3 }
 0x1d7   : > { %p4344_p6 = pneg %p4343_p0 }
 0x1d9   : > { %p4351_p7 = pnand %p4350_p10, %p4344_p6 }
 0x1db   : > { %4354 = shalt.err (!%p4351_p7)
}
 0x1dc   : > { %3583 = dma.hbm_to_vmem [thread:$0]  (!%p5925_p1), %s5930_s4, 16, %s516_s2, [#allocation21]  }
 0x1dd   : > { %s5931_s7 = sld [smem:[#allocation56_spill]]  ;;  %s758_s6 = scalar_lea.vmem [#allocation18], %s4757_s12 }
 0x1de   : > { %s765_s26 = sshll.u32 %s758_s6, 4  ;;  %p5932_p9 = scmp.ne.s32.totalorder %s5885_s27, 0  ;;  %s766_s26 = int_to_ptr.vmem [resolvable:$true] %s765_s26 }
 0x1e3   : > { %s5245_s24 = scalar_lea.hbm %s5931_s7, %s4791_s18  ;;  %s4360_s2 = scalar_lea.hbm %s5931_s7, 32 }
 0x1e4   : > { %s4355_s9 = scalar_lea.hbm %s5245_s24, 16  ;;  %p4361_p1 = scmp.lt.u32.totalorder %s5245_s24, %s5931_s7 }
 0x1e5   : > { %p4356_p12 = scmp.ne.s32.totalorder %s5245_s24, %s4355_s9  ;;  %p4362_p13 = scmp.lt.u32.totalorder %s4360_s2, %s4355_s9 }
 0x1e6   : > { %p4364_p4 = scmp.lt.u32.totalorder %s4355_s9, %s5245_s24 }
 0x1e7   : > { %p4358_p2 = pnand %p4356_p12, %p5932_p9  ;;  %p4363_p11 = por %p4362_p13, %p4361_p1 }
 0x1e9   : > { %p4359_p8 = pneg %p4358_p2  ;;  %p4365_p0 = por %p4364_p4, %p4363_p11 }
 0x1eb   : > { %p4366_p6 = pnand %p4365_p0, %p4359_p8 }
 0x1ed   : > { %4369 = shalt.err (!%p4366_p6)
}
 0x1ee   : > { %s4370_s12 = scalar_lea.vmem %s766_s26, 16  ;;  %s4544_s18 = smov [#allocation18]  }
 0x1ef   : > { %p4371_p3 = scmp.ne.s32.totalorder %s766_s26, %s4370_s12  ;;  %s4375_s8 = sshll.u32 %s4544_s18, 4  ;;  %s4376_s8 = int_to_ptr.vmem [resolvable:$false] %s4375_s8 }
 0x1f0   : > { %s4377_s14 = scalar_lea.vmem %s4376_s8, 32  ;;  %p4378_p7 = scmp.lt.s32.totalorder %s766_s26, %s4376_s8 }
 0x1f1   : > { %p4373_p5 = pnand %p4371_p3, %p5932_p9  ;;  %p4379_p12 = scmp.lt.s32.totalorder %s4377_s14, %s4370_s12 }
 0x1f3   : > { %p4374_p10 = pneg %p4373_p5  ;;  %p4380_p2 = por %p4379_p12, %p4378_p7 }
 0x1f5   : > { %p4381_p1 = pnand %p4380_p2, %p4374_p10 }
 0x1f7   : > { %4384 = shalt.err (!%p4381_p1)
}
 0x1f8   : > { %p5933_p13 = scmp.ne.s32.totalorder %s5883_s21, 0  ;;  %p5934_p8 = scmp.ne.s32.totalorder %s5919_s13, 0 }
 0x1f9   : > { %s5935_s27 = sld [smem:[#allocation33_spill]] (!%p5934_p8)  ;;  %s776_s1 = sand.u32 (!%p5934_p8), 1, %s5091_s19  }
 0x1fa   : > { %3623 = dma.hbm_to_vmem [thread:$0]  (!%p5933_p13), %s5245_s24, 16, %s766_s26, %s4759_s22  }
 0x1fb   : > { %774 = sbr.rel (%p5934_p8) target bundleno = 5178 (0x143a), region = 84  ;;  %s777_s23 = scalar_lea.sflag (!%p5934_p8), [#allocation3], %s776_s1 }
 0x1fc   : > { %p5936_p9 = scmp.ne.s32.totalorder (!%p5934_p8), %s5913_s20, 0 }
 0x1ff   : > { %s778_s30 = sand.u32 (!%p5934_p8), 1, %s5935_s27  }
 0x200   : > { %s3256_s25 = sshll.u32 (!%p5934_p8), %s778_s30, 5 }
 0x201   : > { %s5272_s5 = scalar_lea.vmem (!%p5934_p8), [#allocation2], %s3256_s25 }
 0x202   : > { %4458 = dma.done.wait (%p5936_p9), %s777_s23, 512  }
 0x203   : > { %4460 = vsyncadd (%p5936_p9), %s777_s23, 4294966784  ;;  %p5937_p11 = scmp.eq.s32.totalorder %s5091_s19, 0 }
 0x205   : > { %4462 = dma.done.wait (%p5937_p11), [#allocation6], 256   ;;  %p5938_p4 = pmov %p5937_p11 }
 0x206   : > { %s5939_s21 = sld [smem:[#allocation30_spill]]  ;;  %p5940_p0 = scmp.ne.s32.totalorder %s5914_s15, 0 }
 0x207   : > { %4464 = vsyncadd (%p5938_p4), [#allocation6], 4294967040 }
 0x20c   : > { %s5283_s22 = sand.u32 1, %s5939_s21  }
 0x20d   : > { %s792_s13 = scalar_lea.vmem [#allocation7], %s5283_s22 }
 0x20e   : > { %4466 = dma.done.wait (%p5940_p0), %s777_s23, 4768  }
 0x20f   : > { %4468 = vsyncadd (%p5940_p0), %s777_s23, 4294962528  ;;  %s3258_s20 = sshll.u32 %s5283_s22, 6  ;;  %s3259_s24 = sshll.u32 %s5283_s22, 1 }
 0x210   : > { %s3260_s6 = sshll.u32 %s5283_s22, 5  ;;  %s3263_s26 = sshll.u32 %s5283_s22, 7 }
 0x211   : > { %s800_s9 = scalar_lea.vmem [#allocation8], %s5283_s22  ;;  %s5295_s29 = scalar_lea.vmem [#allocation9], %s3258_s20 }
 0x212   : > { %s5297_s17 = scalar_lea.vmem [#allocation10], %s3259_s24  ;;  %s5299_s15 = scalar_lea.vmem [#allocation11], %s3260_s6 }
 0x213   : > { %s835_s2 = scalar_lea.vmem [#allocation12], %s5283_s22  ;;  %s843_s11 = scalar_lea.vmem [#allocation13], %s5283_s22 }
 0x214   : > { %s851_s28 = scalar_lea.vmem [#allocation14], %s5283_s22  ;;  %s5304_s12 = scalar_lea.vmem [#allocation15], %s3258_s20 }
 0x215   : > { %s5306_s18 = scalar_lea.vmem [#allocation16], %s3259_s24  ;;  %s5308_s8 = scalar_lea.vmem [#allocation17], %s3263_s26 }
 0x216   : > { %s886_s14 = scalar_lea.vmem [#allocation18], %s5283_s22  ;;  %p5941_p6 = pmov %p5938_p4 }
 0x217   : > { %p5942_p3 = pmov %p5938_p4 }
 0x218   : > { %4470 = dma.done.wait (%p5941_p6), [#allocation6], 16  }
 0x219   : > { %4472 = vsyncadd (%p5942_p3), [#allocation6], 4294967280  ;;  %p5943_p5 = pmov %p5942_p3 }
 0x21a   : > { %p5944_p10 = pmov %p5942_p3 }
 0x21b   : > { %4474 = dma.done.wait (%p5943_p5), [#allocation21], 16  }
 0x21c   : > { %4476 = vsyncadd (%p5944_p10), [#allocation21], 4294967280  ;;  %s5319_s27 = scalar_lea.vmem [#allocation22], %s3256_s25  ;;  %s5945_s1 = sld [smem:[#allocation35_spill]] }
 0x222   : > { %p3267_p7 = scmp.ne.s32.totalorder %s5945_s1, 0 }
 0x223   : > { %v1004_v0 = vld [vmem:[%s5272_s5] sm:$0xff] (!%p3267_p7)  ;;  %vm1008_vm0 = vcmask (!%p3267_p7), 523264   ;;  %v1005_v1 = vld [vmem:[%s5272_s5 + $0x8] sm:$0xff] (!%p3267_p7)  ;;  %v1006_v2 = vld [vmem:[%s5272_s5 + $0x10] sm:$0xff] (!%p3267_p7) }
 0x224   : > { %1003 = sbr.rel (%p3267_p7) target bundleno = 555 (0x22b), region = 152  ;;  %1009 = vst.msk [vmem:[%s5319_s27] sm:$0xff] (!%p3267_p7), %vm1008_vm0, %v1004_v0  ;;  %1010 = vst.msk [vmem:[%s5319_s27 + $0x8] sm:$0xff] (!%p3267_p7), %vm1008_vm0, %v1005_v1  ;;  %v1007_v3 = vld [vmem:[%s5272_s5 + $0x18] sm:$0xff] (!%p3267_p7) }
 0x225   : > { %1011 = vst.msk [vmem:[%s5319_s27 + $0x10] sm:$0xff] (!%p3267_p7), %vm1008_vm0, %v1006_v2  ;;  %1012 = vst.msk [vmem:[%s5319_s27 + $0x18] sm:$0xff] (!%p3267_p7), %vm1008_vm0, %v1007_v3 }
 0x22b PF: > { %v1013_v4 = vld [vmem:[%s5319_s27] sm:$0xff]  ;;  %vm1019_vm1 = vcmask 523264   ;;  %v1014_v6 = vld [vmem:[%s5319_s27 + $0x8] sm:$0xff]  ;;  %v3743_v32 = vld [vmem:[%s5295_s29 + $0x4] ss:$8 sps:$4 sm:$0xff]   ;;  %v4545_v40 = vmov 0  }
 0x22c   : > { %v1015_v5 = vld [vmem:[%s5319_s27 + $0x10] sm:$0xff]  ;;  %v1020_v7 = vsel %vm1019_vm1, %v1013_v4, 0.0  ;;  %v1016_v9 = vld [vmem:[%s5319_s27 + $0x18] sm:$0xff]  ;;  %v1023_v10 = vsel %vm1019_vm1, %v1014_v6, 0.0  ;;  %1161 = vmatprep.subr.bf16.mxu0 %v3743_v32  ;;  %v3746_v34 = vld [vmem:[%s5295_s29 + $0x14] ss:$8 sps:$4 sm:$0xff]   ;;  %1193 = vmatprep.mubr.bf16.mxu0 %v4545_v40 }
 0x22d   : > { %v1026_v8 = vsel %vm1019_vm1, %v1015_v5, 0.0  ;;  %1021 = vadd.xlane.f32.xlu0 %v1020_v7  ;;  %v1029_v11 = vsel %vm1019_vm1, %v1016_v9, 0.0  ;;  %v3745_v33 = vld [vmem:[%s5295_s29] ss:$8 sps:$4 sm:$0xff]   ;;  %v3748_v35 = vld [vmem:[%s5295_s29 + $0x10] ss:$8 sps:$4 sm:$0xff]  }
 0x22e   : > { %1027 = vadd.xlane.f32.xlu1 %v1026_v8  ;;  %1162 = vmatpush1.bf16.msra.mxu0 %v3745_v33  ;;  %v3749_v36 = vld [vmem:[%s5295_s29 + $0x24] ss:$8 sps:$4 sm:$0xff]   ;;  %v3751_v37 = vld [vmem:[%s5295_s29 + $0x20] ss:$8 sps:$4 sm:$0xff]   ;;  %v3752_v38 = vld [vmem:[%s5295_s29 + $0x34] ss:$8 sps:$4 sm:$0xff]  }
 0x22f   : > { %1163 = vmatprep.subr.bf16.mxu0 %v3746_v34  ;;  %v3754_v39 = vld [vmem:[%s5295_s29 + $0x30] ss:$8 sps:$4 sm:$0xff]   ;;  %v3268_v55 = vld [vmem:[%s792_s13] ss:$0 sm:$0xff]  ;;  %vm4547_vm2 = vmmov 0   ;;  %s4548_s19 = smov 64  }
 0x230   : > { %v3269_v60 = vld [vmem:[%s800_s9] ss:$0 sm:$0xff]  ;;  %vm1229_vm3 = vcmask 130048   ;;  %s4549_s25 = smov 48   ;;  %s4550_s23 = smov 112   ;;  %vm2223_vm4 = vcmask 261120  }
 0x231   : > { %1024 = vadd.xlane.f32.xlu0 %v1023_v10  ;;  %s4551_s5 = smov 32   ;;  %s4552_s21 = smov 96   ;;  %vm2228_vm5 = vcmask 392192  }
 0x232   : > { %1030 = vadd.xlane.f32.xlu1 %v1029_v11  ;;  %1164 = vmatpush1.bf16.msra.mxu0 %v3748_v35  ;;  %s4553_s13 = smov 16   ;;  %s4554_s20 = smov 80  }
 0x233   : > { %1165 = vmatprep.subr.bf16.mxu0 %v3749_v36  ;;  %s5946_s22 = sld [smem:[#allocation35_spill]] }
 0x236   : > { %1166 = vmatpush1.bf16.msra.mxu0 %v3751_v37 }
 0x237   : > { %1167 = vmatprep.subr.bf16.mxu0 %v3752_v38 }
 0x239   : > { %p3340_p12 = scmp.eq.s32.totalorder %s5946_s22, 1 }
 0x23a   : > { %1168 = vmatpush1.bf16.msra.mxu0 %v3754_v39 }
 0x2ba   : > { %v1022_v12 = vpop.xlane.xlu0 %1021 }
 0x2bb   : > { %v1028_v13 = vpop.xlane.xlu1 %1027  ;;  %v1033_v14 = vmul.f32 0.015625, %v1022_v12  ;;  %v1103_v12 = vld [vmem:[%s5297_s17] sm:$0x3] }
 0x2bc   : > { %v1035_v15 = vmul.f32 0.015625, %v1028_v13  ;;  %v4546_v13 = vmov 0.0  }
 0x2bd   : > { %v1037_v16 = vsub.f32 %v1013_v4, %v1033_v14  ;;  %3426 = vmatprep.subr.bf16.mxu0 %v4546_v13  ;;  %3432 = vmatprep.subr.bf16.mxu1 %v4546_v13 }
 0x2be   : > { %v5338_v17 = vsub.f32 %v1015_v5, %v1035_v15  ;;  %v1025_v18 = vpop.xlane.xlu0 %1024  ;;  %3434 = vmatprep.mubr.msk.bf16.mxu1 %vm4547_vm2, %v4546_v13 }
 0x2bf   : > { %v1031_v19 = vpop.xlane.xlu1 %1030  ;;  %v1034_v20 = vmul.f32 0.015625, %v1025_v18  ;;  %v1041_v22 = vmul.f32 %v1037_v16, %v1037_v16 }
 0x2c0   : > { %v1036_v21 = vmul.f32 0.015625, %v1031_v19  ;;  %v1043_v23 = vmul.f32 %v5338_v17, %v5338_v17 }
 0x2c1   : > { %v1038_v24 = vsub.f32 %v1014_v6, %v1034_v20  ;;  %v1045_v26 = vsel %vm1019_vm1, %v1041_v22, 0.0 }
 0x2c2   : > { %v1040_v25 = vsub.f32 %v1016_v9, %v1036_v21  ;;  %1046 = vadd.xlane.f32.xlu0 %v1045_v26  ;;  %v1051_v27 = vsel %vm1019_vm1, %v1043_v23, 0.0  ;;  %v1105_v9 = vlaneseq }
 0x2c3   : > { %v1042_v28 = vmul.f32 %v1038_v24, %v1038_v24 }
 0x2c4   : > { %v1044_v29 = vmul.f32 %v1040_v25, %v1040_v25  ;;  %v5363_v10 = vshrl.u32 %v1105_v9, 7 }
 0x2c5   : > { %v1048_v30 = vsel %vm1019_vm1, %v1042_v28, 0.0 }
 0x2c6   : > { %1052 = vadd.xlane.f32.xlu0 %v1051_v27  ;;  %1049 = vadd.xlane.f32.xlu1 %v1048_v30  ;;  %v1054_v31 = vsel %vm1019_vm1, %v1044_v29, 0.0  ;;  %v1107_v11 = vsub.s32 0, %v5363_v10  ;;  %v1111_v14 = vsub.s32 1, %v5363_v10 }
 0x2c8   : > { %v1108_v15 = vrot.slane %v1103_v12, %v1107_v11 }
 0x2ca   : > { %1055 = vadd.xlane.f32.xlu1 %v1054_v31 }
 0x34f   : > { %v1047_v41 = vpop.xlane.xlu0 %1046 }
 0x350   : > { %v1057_v42 = vmul.f32 0.015625, %v1047_v41 }
 0x352   : > { %v1061_v43 = vadd.f32 1e-05, %v1057_v42 }
 0x353   : > { %v1050_v44 = vpop.xlane.xlu1 %1049  ;;  %v1053_v45 = vpop.xlane.xlu0 %1052 }
 0x354   : > { %3787 = vrsqrt.f32 %v1061_v43  ;;  %v1058_v46 = vmul.f32 0.015625, %v1050_v44  ;;  %v1059_v47 = vmul.f32 0.015625, %v1053_v45 }
 0x356   : > { %v1062_v48 = vadd.f32 1e-05, %v1058_v46  ;;  %v1063_v49 = vadd.f32 1e-05, %v1059_v47 }
 0x357   : > { %v1056_v50 = vpop.xlane.xlu1 %1055 }
 0x358   : > { %3789 = vrsqrt.f32 %v1062_v48  ;;  %v1060_v51 = vmul.f32 0.015625, %v1056_v50  ;;  %v5408_v48 = vld [vmem:[#allocation5] sm:$0xff]  ;;  %v5410_v50 = vld [vmem:[#allocation5 + $0x8] sm:$0xff] }
 0x359   : > { %3791 = vrsqrt.f32 %v1063_v49 }
 0x35a   : > { %v1064_v52 = vadd.f32 1e-05, %v1060_v51 }
 0x35c   : > { %3793 = vrsqrt.f32 %v1064_v52 }
 0x35e   : > { %v3788_v53 = vpop.eup %3787 }
 0x35f   : > { %v1069_v54 = vmul.f32 %v3788_v53, %v1037_v16 }
 0x361   : > { %v1079_v58 = vmul.f32 %v3268_v55, %v1069_v54 }
 0x362   : > { %v3790_v56 = vpop.eup %3789 }
 0x363   : > { %v1070_v57 = vmul.f32 %v3790_v56, %v1038_v24  ;;  %v3792_v59 = vpop.eup %3791  ;;  %v1089_v1 = vadd.f32 %v3269_v60, %v1079_v58 }
 0x364   : > { %v1071_v63 = vmul.f32 %v3792_v59, %v5338_v17  ;;  %v1112_v17 = vrot.slane %v1103_v12, %v1111_v14 }
 0x365   : > { %v1080_v61 = vmul.f32 %v3268_v55, %v1070_v57 }
 0x366   : > { %v3794_v62 = vpop.eup %3793  ;;  %v1081_v5 = vmul.f32 %v3268_v55, %v1071_v63 }
 0x367   : > { %v1072_v0 = vmul.f32 %v3794_v62, %v1040_v25  ;;  %v1090_v2 = vadd.f32 %v3269_v60, %v1080_v61 }
 0x368   : > { %v1091_v7 = vadd.f32 %v3269_v60, %v1081_v5 }
 0x369   : > { %v1093_v3 = vpack.c.bf16 %v1090_v2, %v1089_v1  ;;  %v1082_v4 = vmul.f32 %v3268_v55, %v1072_v0 }
 0x36b   : > { %3278 = vmatmul.mubr.msk.bf16.vlgmr.msra.gmra.mrb[0].mxu0 %vm1019_vm1, %v1093_v3  ;;  %v1092_v6 = vadd.f32 %v3269_v60, %v1082_v4 }
 0x36c   : > { %1203 = vmatprep.mubr.bf16.mxu0 %v4545_v40 }
 0x36d   : > { %v1094_v8 = vpack.c.bf16 %v1092_v6, %v1091_v7 }
 0x373   : > { %3279 = vmatmul.mubr.msk.bf16.gmra.mrb[4].mxu0 %vm1019_vm1, %v1094_v8 }
 0x374   : > { %3428 = vmatprep.mubr.msk.bf16.mxu0 %vm4547_vm2, %v4546_v13 }
 0x43e   : > { %v1195_v16 = vpop.f32.mrb[0].mxu0 }
 0x43f   : > { %v1196_v18 = vadd.f32 %v1195_v16, %v1108_v15  ;;  %v1197_v19 = vpop.f32.mrb[1].mxu0 }
 0x440   : > { %v1199_v20 = vpop.f32.mrb[2].mxu0  ;;  %v1198_v23 = vadd.f32 %v1197_v19, %v1112_v17 }
 0x441   : > { %v1200_v21 = vadd.f32 %v1199_v20, %v1108_v15  ;;  %v1201_v22 = vpop.f32.mrb[3].mxu0  ;;  %v1214_v25 = vmul.f32 0.25, %v1196_v18 }
 0x442   : > { %v1202_v24 = vadd.f32 %v1201_v22, %v1112_v17 }
 0x443   : > { %v1215_v26 = vmul.f32 0.25, %v1200_v21  ;;  %v5378_v27 = vpack.c.bf16 %v1200_v21, %v1196_v18 }
 0x444   : > { %v5380_v28 = vpack.c.bf16 %v1202_v24, %v1198_v23 }
 0x445   : > { %v5382_v29 = vpack.c.bf16 %v1215_v26, %v1214_v25  ;;  %1227 = vrot.lane.b32.xlu0 %v5378_v27, %s4548_s19 }
 0x446   : > { %v1205_v30 = vpop.f32.mrb[4].mxu0 }
 0x447   : > { %v1206_v31 = vadd.f32 %v1205_v30, %v1108_v15  ;;  %v1207_v32 = vpop.f32.mrb[5].mxu0 }
 0x448   : > { %v1209_v33 = vpop.f32.mrb[6].mxu0  ;;  %v1208_v36 = vadd.f32 %v1207_v32, %v1112_v17 }
 0x449   : > { %v1210_v34 = vadd.f32 %v1209_v33, %v1108_v15  ;;  %v1211_v35 = vpop.f32.mrb[7].mxu0  ;;  %v1216_v38 = vmul.f32 0.25, %v1206_v31 }
 0x44a   : > { %v1212_v37 = vadd.f32 %v1211_v35, %v1112_v17 }
 0x44b   : > { %v1217_v39 = vmul.f32 0.25, %v1210_v34  ;;  %v5385_v41 = vpack.c.bf16 %v1210_v34, %v1206_v31 }
 0x44c   : > { %v5387_v42 = vpack.c.bf16 %v1212_v37, %v1208_v36 }
 0x44d   : > { %v5389_v43 = vpack.c.bf16 %v1217_v39, %v1216_v38  ;;  %1278 = vrot.lane.b32.xlu1 %v5385_v41, %s4548_s19 }
 0x4b7   : > { %v1228_v44 = vpop.permute.xlu0 %1227 }
 0x4b8   : > { %v1234_v45 = vsel %vm1229_vm3, %v1228_v44, 0 }
 0x4b9   : > { %3427 = vmatpush3.bf16.xpose.msra.mxu0 %v1234_v45 }
 0x4ba   : > { %3444 = vmatprep.subr.bf16.mxu0 %v4546_v13 }
 0x4bf   : > { %v1279_v46 = vpop.permute.xlu1 %1278 }
 0x4c0   : > { %3429 = vmatmul.mubr.msk.bf16.vlgmr.msra.gmra.mrb[8].mxu0 %vm1229_vm3, %v5382_v29  ;;  %v1284_v47 = vsel %vm1229_vm3, %v1279_v46, 0 }
 0x4c1   : > { %3433 = vmatpush3.bf16.xpose.msra.mxu1 %v1284_v47  ;;  %3445 = vmatpush3.bf16.msra.mxu0 %v5387_v42 }
 0x4c2   : > { %3438 = vmatprep.subr.bf16.mxu1 %v4546_v13  ;;  %3446 = vmatprep.mubr.msk.bf16.mxu0 %vm4547_vm2, %v4546_v13 }
 0x4c3   : > { %3456 = vmatprep.subr.bf16.mxu0 %v4546_v13 }
 0x4c8   : > { %3435 = vmatmul.mubr.msk.bf16.vlgmr.msra.gmra.mrb[0].mxu1 %vm1229_vm3, %v5389_v43 }
 0x4c9   : > { %3439 = vmatpush3.bf16.msra.mxu1 %v5380_v28  ;;  %3440 = vmatprep.mubr.msk.bf16.mxu1 %vm4547_vm2, %v4546_v13 }
 0x4ca   : > { %3450 = vmatprep.subr.bf16.mxu1 %v4546_v13 }
 0x593   : > { %v1270_v49 = vpop.f32.mrb[8].mxu0 }
 0x594   : > { %v1271_v51 = vadd.f32 %v1270_v49, %v5408_v48  ;;  %v3430_v52 = vpop.f32.mrb[9].mxu0 }
 0x595   : > { %v1273_v53 = vpop.f32.mrb[10].mxu0 }
 0x596   : > { %v1274_v54 = vadd.f32 %v1273_v53, %v5410_v50  ;;  %v3431_v55 = vpop.f32.mrb[11].mxu0  ;;  %v1327_v56 = vsel %vm1229_vm3, %v1271_v51, -inf }
 0x597   : > { %1328 = vmax.xlane.f32.xlu1 %v1327_v56 }
 0x598   : > { %v1330_v57 = vsel %vm1229_vm3, %v1274_v54, -inf }
 0x599   : > { %1331 = vmax.xlane.f32.xlu0 %v1330_v57 }
 0x59b   : > { %v1320_v58 = vpop.f32.mrb[0].mxu1 }
 0x59c   : > { %v1321_v59 = vadd.f32 %v1320_v58, %v5408_v48  ;;  %v3436_v60 = vpop.f32.mrb[1].mxu1 }
 0x59d   : > { %v1323_v61 = vpop.f32.mrb[2].mxu1 }
 0x59e   : > { %v1324_v62 = vadd.f32 %v1323_v61, %v5410_v50  ;;  %v3437_v63 = vpop.f32.mrb[3].mxu1  ;;  %v1333_v0 = vsel %vm1229_vm3, %v1321_v59, -inf }
 0x59f   : > { %1334 = vmax.xlane.f32.xlu0 %v1333_v0 }
 0x5a0   : > { %v1336_v1 = vsel %vm1229_vm3, %v1324_v62, -inf }
 0x5a1   : > { %1337 = vmax.xlane.f32.xlu1 %v1336_v1 }
 0x624   : > { %v1329_v2 = vpop.xlane.xlu1 %1328 }
 0x625   : > { %v1339_v3 = vsub.f32 %v1271_v51, %v1329_v2 }
 0x626   : > { %v1332_v4 = vpop.xlane.xlu0 %1331 }
 0x627   : > { %v1343_v5 = vmul.f32 1.442695, %v1339_v3  ;;  %v1340_v6 = vsub.f32 %v1274_v54, %v1332_v4 }
 0x629   : > { %3795 = vpow2.f32 %v1343_v5  ;;  %v1345_v7 = vmul.f32 1.442695, %v1340_v6 }
 0x62b   : > { %3797 = vpow2.f32 %v1345_v7 }
 0x62c   : > { %v1335_v8 = vpop.xlane.xlu0 %1334 }
 0x62d   : > { %v1341_v9 = vsub.f32 %v1321_v59, %v1335_v8 }
 0x62e   : > { %v1338_v21 = vpop.xlane.xlu1 %1337 }
 0x62f   : > { %v1347_v12 = vmul.f32 1.442695, %v1341_v9  ;;  %v1342_v22 = vsub.f32 %v1324_v62, %v1338_v21 }
 0x631   : > { %3799 = vpow2.f32 %v1347_v12  ;;  %v1349_v23 = vmul.f32 1.442695, %v1342_v22 }
 0x633   : > { %v3796_v15 = vpop.eup %3795  ;;  %3801 = vpow2.f32 %v1349_v23 }
 0x634   : > { %v1351_v16 = vsel %vm1229_vm3, %v3796_v15, 0.0 }
 0x635   : > { %v3798_v17 = vpop.eup %3797  ;;  %1352 = vadd.xlane.f32.xlu0 %v1351_v16 }
 0x636   : > { %v1354_v18 = vsel %vm1229_vm3, %v3798_v17, 0.0 }
 0x637   : > { %1355 = vadd.xlane.f32.xlu1 %v1354_v18 }
 0x63b   : > { %v3800_v19 = vpop.eup %3799 }
 0x63c   : > { %v1357_v20 = vsel %vm1229_vm3, %v3800_v19, 0.0 }
 0x63d   : > { %1358 = vadd.xlane.f32.xlu0 %v1357_v20  ;;  %v3802_v24 = vpop.eup %3801 }
 0x63e   : > { %v1360_v25 = vsel %vm1229_vm3, %v3802_v24, 0.0 }
 0x648   : > { %1518 = vrot.lane.b32.xlu1 %v5385_v41, %s4549_s25 }
 0x653   : > { %1466 = vrot.lane.b32.xlu0 %v5378_v27, %s4549_s25 }
 0x66c   : > { %1361 = vadd.xlane.f32.xlu1 %v1360_v25 }
 0x67d   : > { %1464 = vrot.lane.b32.xlu1 %v5382_v29, %s4550_s23 }
 0x681   : > { %1516 = vrot.lane.b32.xlu1 %v5389_v43, %s4550_s23 }
 0x6c2   : > { %v1353_v26 = vpop.xlane.xlu0 %1352 }
 0x6c3   : > { %3803 = vrcp.f32 %v1353_v26 }
 0x6c4   : > { %v1356_v30 = vpop.xlane.xlu1 %1355 }
 0x6c5   : > { %3805 = vrcp.f32 %v1356_v30 }
 0x6c8   : > { %v1519_v39 = vpop.permute.xlu1 %1518 }
 0x6c9   : > { %v1524_v53 = vsel %vm1229_vm3, %v1519_v39, 0 }
 0x6ca   : > { %v1359_v31 = vpop.xlane.xlu0 %1358 }
 0x6cb   : > { %3807 = vrcp.f32 %v1359_v31 }
 0x6cd   : > { %v3804_v32 = vpop.eup %3803 }
 0x6ce   : > { %v1367_v34 = vmul.f32 %v3804_v32, %v3796_v15  ;;  %v1467_v36 = vpop.permute.xlu0 %1466 }
 0x6cf   : > { %v3806_v33 = vpop.eup %3805  ;;  %v1472_v38 = vsel %vm1229_vm3, %v1467_v36, 0 }
 0x6d0   : > { %v1368_v35 = vmul.f32 %v3806_v33, %v3798_v17 }
 0x6d2   : > { %v1371_v37 = vpack.c.bf16 %v1368_v35, %v1367_v34 }
 0x6d4   : > { %3441 = vmatmul.mubr.msk.bf16.vlgmr.msra.gmra.mrb[4].mxu1 %vm1229_vm3, %v1371_v37 }
 0x6d5   : > { %3451 = vmatpush3.bf16.xpose.msra.mxu1 %v1472_v38  ;;  %3452 = vmatprep.mubr.msk.bf16.mxu1 %vm4547_vm2, %v4546_v13  ;;  %v3808_v46 = vpop.eup %3807 }
 0x6d6   : > { %3462 = vmatprep.subr.bf16.mxu1 %v4546_v13  ;;  %v1369_v49 = vmul.f32 %v3808_v46, %v3800_v19 }
 0x6f9   : > { %v1362_v44 = vpop.xlane.xlu1 %1361 }
 0x6fa   : > { %3809 = vrcp.f32 %v1362_v44 }
 0x6fd   : > { %v1465_v45 = vpop.permute.xlu1 %1464 }
 0x6fe   : > { %3453 = vmatmul.mubr.msk.bf16.vlgmr.msra.gmra.mrb[8].mxu1 %vm1229_vm3, %v1465_v45 }
 0x6ff   : > { %3464 = vmatprep.mubr.msk.bf16.mxu1 %vm4547_vm2, %v4546_v13 }
 0x701   : > { %v1517_v54 = vpop.permute.xlu1 %1516 }
 0x704   : > { %v3810_v47 = vpop.eup %3809 }
 0x705   : > { %v1370_v51 = vmul.f32 %v3810_v47, %v3802_v24 }
 0x707   : > { %v1372_v52 = vpack.c.bf16 %v1370_v51, %v1369_v49 }
 0x709   : > { %3447 = vmatmul.mubr.msk.bf16.vlgmr.msra.gmra.mrb[12].mxu0 %vm1229_vm3, %v1372_v52 }
 0x70a   : > { %3457 = vmatpush3.bf16.xpose.msra.mxu0 %v1524_v53  ;;  %3458 = vmatprep.mubr.msk.bf16.mxu0 %vm4547_vm2, %v4546_v13 }
 0x70b   : > { %3468 = vmatprep.subr.bf16.mxu0 %v4546_v13 }
 0x711   : > { %3459 = vmatmul.mubr.msk.bf16.vlgmr.msra.gmra.mrb[16].mxu0 %vm1229_vm3, %v1517_v54 }
 0x712   : > { %3470 = vmatprep.mubr.msk.bf16.mxu0 %vm4547_vm2, %v4546_v13 }
 0x7a7   : > { %v5448_v55 = vpop.f32.mrb[4].mxu1 }
 0x7a8   : > { %v3442_v56 = vpop.f32.mrb[5].mxu1 }
 0x7a9   : > { %v5450_v57 = vpop.f32.mrb[6].mxu1 }
 0x7aa   : > { %v1461_v58 = vpack.c.bf16 %v5450_v57, %v5448_v55  ;;  %v3443_v59 = vpop.f32.mrb[7].mxu1 }
 0x7d1   : > { %v1508_v60 = vpop.f32.mrb[8].mxu1 }
 0x7d2   : > { %v1509_v61 = vadd.f32 %v1508_v60, %v5408_v48  ;;  %v3454_v62 = vpop.f32.mrb[9].mxu1 }
 0x7d3   : > { %v1511_v63 = vpop.f32.mrb[10].mxu1 }
 0x7d4   : > { %v1512_v0 = vadd.f32 %v1511_v63, %v5410_v50  ;;  %v3455_v1 = vpop.f32.mrb[11].mxu1  ;;  %v1567_v2 = vsel %vm1229_vm3, %v1509_v61, -inf }
 0x7d5   : > { %1568 = vmax.xlane.f32.xlu0 %v1567_v2 }
 0x7d6   : > { %v1570_v3 = vsel %vm1229_vm3, %v1512_v0, -inf }
 0x7d7   : > { %1571 = vmax.xlane.f32.xlu1 %v1570_v3 }
 0x7dc   : > { %v5458_v4 = vpop.f32.mrb[12].mxu0 }
 0x7dd   : > { %v3448_v5 = vpop.f32.mrb[13].mxu0 }
 0x7de   : > { %v5460_v6 = vpop.f32.mrb[14].mxu0 }
 0x7df   : > { %v1462_v7 = vpack.c.bf16 %v5460_v6, %v5458_v4  ;;  %v3449_v8 = vpop.f32.mrb[15].mxu0 }
 0x7e4   : > { %v1560_v9 = vpop.f32.mrb[16].mxu0 }
 0x7e5   : > { %v1561_v12 = vadd.f32 %v1560_v9, %v5408_v48  ;;  %v3460_v15 = vpop.f32.mrb[17].mxu0 }
 0x7e6   : > { %v1563_v16 = vpop.f32.mrb[18].mxu0 }
 0x7e7   : > { %v1564_v17 = vadd.f32 %v1563_v16, %v5410_v50  ;;  %v3461_v18 = vpop.f32.mrb[19].mxu0  ;;  %v1573_v19 = vsel %vm1229_vm3, %v1561_v12, -inf }
 0x7e8   : > { %1574 = vmax.xlane.f32.xlu0 %v1573_v19 }
 0x7e9   : > { %v1576_v20 = vsel %vm1229_vm3, %v1564_v17, -inf }
 0x7ec   : > { %1577 = vmax.xlane.f32.xlu0 %v1576_v20 }
 0x862   : > { %v1569_v21 = vpop.xlane.xlu0 %1568 }
 0x863   : > { %v1579_v22 = vsub.f32 %v1509_v61, %v1569_v21 }
 0x864   : > { %v1572_v23 = vpop.xlane.xlu1 %1571 }
 0x865   : > { %v1583_v24 = vmul.f32 1.442695, %v1579_v22  ;;  %v1580_v25 = vsub.f32 %v1512_v0, %v1572_v23 }
 0x867   : > { %3811 = vpow2.f32 %v1583_v24  ;;  %v1585_v26 = vmul.f32 1.442695, %v1580_v25 }
 0x869   : > { %3813 = vpow2.f32 %v1585_v26 }
 0x871   : > { %v3812_v30 = vpop.eup %3811 }
 0x872   : > { %v1591_v31 = vsel %vm1229_vm3, %v3812_v30, 0.0 }
 0x873   : > { %v3814_v32 = vpop.eup %3813  ;;  %1592 = vadd.xlane.f32.xlu0 %v1591_v31 }
 0x874   : > { %v1594_v33 = vsel %vm1229_vm3, %v3814_v32, 0.0 }
 0x875   : > { %1595 = vadd.xlane.f32.xlu1 %v1594_v33  ;;  %v1575_v34 = vpop.xlane.xlu0 %1574 }
 0x876   : > { %v1581_v35 = vsub.f32 %v1561_v12, %v1575_v34 }
 0x878   : > { %v1587_v36 = vmul.f32 1.442695, %v1581_v35 }
 0x879   : > { %v1578_v39 = vpop.xlane.xlu0 %1577 }
 0x87a   : > { %3815 = vpow2.f32 %v1587_v36  ;;  %v1582_v44 = vsub.f32 %v1564_v17, %v1578_v39 }
 0x87c   : > { %v1589_v45 = vmul.f32 1.442695, %v1582_v44 }
 0x87e   : > { %3817 = vpow2.f32 %v1589_v45 }
 0x884   : > { %v3816_v37 = vpop.eup %3815 }
 0x885   : > { %v1597_v38 = vsel %vm1229_vm3, %v3816_v37, 0.0 }
 0x886   : > { %1662 = vrot.lane.b32.xlu1 %v5387_v42, %s4550_s23  ;;  %1598 = vadd.xlane.f32.xlu0 %v1597_v38 }
 0x888   : > { %v3818_v46 = vpop.eup %3817 }
 0x889   : > { %v1600_v47 = vsel %vm1229_vm3, %v3818_v46, 0.0 }
 0x88a   : > { %1713 = vrot.lane.b32.xlu1 %v5378_v27, %s4551_s5 }
 0x89c   : > { %1614 = vrot.lane.b32.xlu0 %v5380_v28, %s4550_s23 }
 0x8a0   : > { %1711 = vrot.lane.b32.xlu0 %v5382_v29, %s4552_s21 }
 0x8ae   : > { %1601 = vadd.xlane.f32.xlu1 %v1600_v47 }
 0x8bf   : > { %1764 = vrot.lane.b32.xlu1 %v5385_v41, %s4551_s5 }
 0x8c3   : > { %1762 = vrot.lane.b32.xlu1 %v5389_v43, %s4552_s21 }
 0x900   : > { %v1593_v52 = vpop.xlane.xlu0 %1592 }
 0x902   : > { %v1596_v49 = vpop.xlane.xlu1 %1595 }
 0x903   : > { %3819 = vrcp.f32 %v1596_v49 }
 0x904   : > { %3821 = vrcp.f32 %v1593_v52 }
 0x906   : > { %v1663_v51 = vpop.permute.xlu1 %1662 }
 0x907   : > { %3469 = vmatpush3.bf16.msra.mxu0 %v1663_v51 }
 0x908   : > { %3480 = vmatprep.subr.bf16.mxu0 %v4546_v13 }
 0x90a   : > { %v1714_v63 = vpop.permute.xlu1 %1713 }
 0x90b   : > { %v1719_v0 = vsel %vm1229_vm3, %v1714_v63, 0 }
 0x90d   : > { %v3820_v53 = vpop.eup %3819 }
 0x90e   : > { %v3822_v56 = vpop.eup %3821  ;;  %v1608_v59 = vmul.f32 %v3820_v53, %v3814_v32 }
 0x90f   : > { %v1607_v60 = vmul.f32 %v3822_v56, %v3812_v30 }
 0x911   : > { %v1611_v62 = vpack.c.bf16 %v1608_v59, %v1607_v60 }
 0x913   : > { %v1599_v54 = vpop.xlane.xlu0 %1598 }
 0x914   : > { %3823 = vrcp.f32 %v1599_v54 }
 0x917   : > { %v1615_v61 = vpop.permute.xlu0 %1614 }
 0x918   : > { %3463 = vmatpush3.bf16.msra.mxu1 %v1615_v61 }
 0x919   : > { %3474 = vmatprep.subr.bf16.mxu1 %v4546_v13 }
 0x91b   : > { %3465 = vmatmul.mubr.msk.bf16.vlgmr.msra.gmra.mrb[12].mxu1 %vm1229_vm3, %v1611_v62  ;;  %v1712_v1 = vpop.permute.xlu0 %1711 }
 0x91c   : > { %3476 = vmatprep.mubr.msk.bf16.mxu1 %vm4547_vm2, %v4546_v13 }
 0x91e   : > { %v3824_v3 = vpop.eup %3823 }
 0x91f   : > { %v1609_v8 = vmul.f32 %v3824_v3, %v3816_v37 }
 0x921   : > { %3475 = vmatpush3.bf16.xpose.msra.mxu1 %v1719_v0 }
 0x922   : > { %3486 = vmatprep.subr.bf16.mxu1 %v4546_v13 }
 0x928   : > { %3477 = vmatmul.mubr.msk.bf16.vlgmr.msra.gmra.mrb[16].mxu1 %vm1229_vm3, %v1712_v1 }
 0x929   : > { %3488 = vmatprep.mubr.msk.bf16.mxu1 %vm4547_vm2, %v4546_v13 }
 0x93b   : > { %v1602_v2 = vpop.xlane.xlu1 %1601 }
 0x93c   : > { %3825 = vrcp.f32 %v1602_v2 }
 0x93f   : > { %v1765_v12 = vpop.permute.xlu1 %1764 }
 0x940   : > { %v1770_v16 = vsel %vm1229_vm3, %v1765_v12, 0 }
 0x943   : > { %v1763_v17 = vpop.permute.xlu1 %1762 }
 0x946   : > { %v3826_v5 = vpop.eup %3825 }
 0x947   : > { %v1610_v9 = vmul.f32 %v3826_v5, %v3818_v46 }
 0x949   : > { %v1612_v15 = vpack.c.bf16 %v1610_v9, %v1609_v8 }
 0x94b   : > { %3471 = vmatmul.mubr.msk.bf16.vlgmr.msra.gmra.mrb[20].mxu0 %vm1229_vm3, %v1612_v15 }
 0x94c   : > { %3481 = vmatpush3.bf16.xpose.msra.mxu0 %v1770_v16  ;;  %3482 = vmatprep.mubr.msk.bf16.mxu0 %vm4547_vm2, %v4546_v13 }
 0x94d   : > { %3492 = vmatprep.subr.bf16.mxu0 %v4546_v13 }
 0x953   : > { %3483 = vmatmul.mubr.msk.bf16.vlgmr.msra.gmra.mrb[24].mxu0 %vm1229_vm3, %v1763_v17 }
 0x954   : > { %3494 = vmatprep.mubr.msk.bf16.mxu0 %vm4547_vm2, %v4546_v13 }
 0x9ee   : > { %v5502_v18 = vpop.f32.mrb[12].mxu1 }
 0x9ef   : > { %v3466_v19 = vpop.f32.mrb[13].mxu1 }
 0x9f0   : > { %v5504_v20 = vpop.f32.mrb[14].mxu1 }
 0x9f1   : > { %v1709_v21 = vpack.c.bf16 %v5504_v20, %v5502_v18  ;;  %v3467_v22 = vpop.f32.mrb[15].mxu1 }
 0x9fb   : > { %v1755_v23 = vpop.f32.mrb[16].mxu1 }
 0x9fc   : > { %v1756_v24 = vadd.f32 %v1755_v23, %v5408_v48  ;;  %v3478_v25 = vpop.f32.mrb[17].mxu1 }
 0x9fd   : > { %v1758_v26 = vpop.f32.mrb[18].mxu1 }
 0x9fe   : > { %v1759_v30 = vadd.f32 %v1758_v26, %v5410_v50  ;;  %v3479_v31 = vpop.f32.mrb[19].mxu1  ;;  %v1813_v32 = vsel %vm1229_vm3, %v1756_v24, -inf }
 0x9ff   : > { %1814 = vmax.xlane.f32.xlu0 %v1813_v32 }
 0xa00   : > { %v1816_v33 = vsel %vm1229_vm3, %v1759_v30, -inf }
 0xa01   : > { %1817 = vmax.xlane.f32.xlu1 %v1816_v33 }
 0xa1e   : > { %v5512_v34 = vpop.f32.mrb[20].mxu0 }
 0xa1f   : > { %v3472_v35 = vpop.f32.mrb[21].mxu0 }
 0xa20   : > { %v5514_v36 = vpop.f32.mrb[22].mxu0 }
 0xa21   : > { %v1710_v37 = vpack.c.bf16 %v5514_v36, %v5512_v34  ;;  %v3473_v38 = vpop.f32.mrb[23].mxu0 }
 0xa26   : > { %v1806_v39 = vpop.f32.mrb[24].mxu0 }
 0xa27   : > { %v1807_v44 = vadd.f32 %v1806_v39, %v5408_v48  ;;  %v3484_v45 = vpop.f32.mrb[25].mxu0 }
 0xa28   : > { %v1809_v46 = vpop.f32.mrb[26].mxu0 }
 0xa29   : > { %v1810_v47 = vadd.f32 %v1809_v46, %v5410_v50  ;;  %v3485_v49 = vpop.f32.mrb[27].mxu0  ;;  %v1819_v51 = vsel %vm1229_vm3, %v1807_v44, -inf }
 0xa2a   : > { %1820 = vmax.xlane.f32.xlu0 %v1819_v51 }
 0xa2b   : > { %v1822_v52 = vsel %vm1229_vm3, %v1810_v47, -inf }
 0xa2e   : > { %1823 = vmax.xlane.f32.xlu0 %v1822_v52 }
 0xa8c   : > { %v1815_v53 = vpop.xlane.xlu0 %1814 }
 0xa8d   : > { %v1825_v54 = vsub.f32 %v1756_v24, %v1815_v53 }
 0xa8e   : > { %v1818_v56 = vpop.xlane.xlu1 %1817 }
 0xa8f   : > { %v1829_v59 = vmul.f32 1.442695, %v1825_v54  ;;  %v1826_v60 = vsub.f32 %v1759_v30, %v1818_v56 }
 0xa91   : > { %3827 = vpow2.f32 %v1829_v59  ;;  %v1831_v61 = vmul.f32 1.442695, %v1826_v60 }
 0xa93   : > { %3829 = vpow2.f32 %v1831_v61 }
 0xa9b   : > { %v3828_v62 = vpop.eup %3827 }
 0xa9c   : > { %v1837_v63 = vsel %vm1229_vm3, %v3828_v62, 0.0 }
 0xa9d   : > { %v3830_v0 = vpop.eup %3829  ;;  %1838 = vadd.xlane.f32.xlu0 %v1837_v63 }
 0xa9e   : > { %v1840_v1 = vsel %vm1229_vm3, %v3830_v0, 0.0 }
 0xa9f   : > { %1841 = vadd.xlane.f32.xlu1 %v1840_v1 }
 0xab0   : > { %1906 = vrot.lane.b32.xlu1 %v5387_v42, %s4552_s21 }
 0xab4   : > { %1957 = vrot.lane.b32.xlu1 %v5378_v27, %s4553_s13 }
 0xab7   : > { %v1821_v2 = vpop.xlane.xlu0 %1820 }
 0xab8   : > { %v1827_v3 = vsub.f32 %v1807_v44, %v1821_v2 }
 0xaba   : > { %v1833_v5 = vmul.f32 1.442695, %v1827_v3 }
 0xabb   : > { %v1824_v8 = vpop.xlane.xlu0 %1823 }
 0xabc   : > { %3831 = vpow2.f32 %v1833_v5  ;;  %v1828_v9 = vsub.f32 %v1810_v47, %v1824_v8 }
 0xabe   : > { %v1835_v15 = vmul.f32 1.442695, %v1828_v9 }
 0xac0   : > { %3833 = vpow2.f32 %v1835_v15 }
 0xac6   : > { %v3832_v12 = vpop.eup %3831 }
 0xac7   : > { %v1843_v16 = vsel %vm1229_vm3, %v3832_v12, 0.0 }
 0xac8   : > { %1844 = vadd.xlane.f32.xlu0 %v1843_v16 }
 0xaca   : > { %v3834_v17 = vpop.eup %3833 }
 0xacb   : > { %v1846_v19 = vsel %vm1229_vm3, %v3834_v17, 0.0 }
 0xad8   : > { %1847 = vadd.xlane.f32.xlu1 %v1846_v19 }
 0xade   : > { %1859 = vrot.lane.b32.xlu0 %v5380_v28, %s4552_s21 }
 0xae2   : > { %1955 = vrot.lane.b32.xlu0 %v5382_v29, %s4554_s20 }
 0xae9   : > { %2008 = vrot.lane.b32.xlu1 %v5385_v41, %s4553_s13 }
 0xaed   : > { %2006 = vrot.lane.b32.xlu1 %v5389_v43, %s4554_s20 }
 0xb2a   : > { %v1839_v23 = vpop.xlane.xlu0 %1838 }
 0xb2c   : > { %v1842_v27 = vpop.xlane.xlu1 %1841 }
 0xb2d   : > { %3835 = vrcp.f32 %v1842_v27 }
 0xb2e   : > { %3837 = vrcp.f32 %v1839_v23 }
 0xb30   : > { %v1907_v22 = vpop.permute.xlu1 %1906 }
 0xb31   : > { %3493 = vmatpush3.bf16.msra.mxu0 %v1907_v22 }
 0xb32   : > { %3504 = vmatprep.subr.bf16.mxu0 %v4546_v13 }
 0xb34   : > { %v1958_v41 = vpop.permute.xlu1 %1957 }
 0xb35   : > { %v1963_v43 = vsel %vm1229_vm3, %v1958_v41, 0 }
 0xb37   : > { %v3836_v24 = vpop.eup %3835 }
 0xb38   : > { %v3838_v26 = vpop.eup %3837  ;;  %v1854_v30 = vmul.f32 %v3836_v24, %v3830_v0 }
 0xb39   : > { %v1853_v31 = vmul.f32 %v3838_v26, %v3828_v62 }
 0xb3b   : > { %v1857_v32 = vpack.c.bf16 %v1854_v30, %v1853_v31 }
 0xb55   : > { %v1845_v25 = vpop.xlane.xlu0 %1844 }
 0xb56   : > { %3839 = vrcp.f32 %v1845_v25 }
 0xb59   : > { %v1860_v29 = vpop.permute.xlu0 %1859 }
 0xb5a   : > { %3487 = vmatpush3.bf16.msra.mxu1 %v1860_v29 }
 0xb5b   : > { %3498 = vmatprep.subr.bf16.mxu1 %v4546_v13 }
 0xb5d   : > { %3489 = vmatmul.mubr.msk.bf16.vlgmr.msra.gmra.mrb[20].mxu1 %vm1229_vm3, %v1857_v32  ;;  %v1956_v35 = vpop.permute.xlu0 %1955 }
 0xb5e   : > { %3500 = vmatprep.mubr.msk.bf16.mxu1 %vm4547_vm2, %v4546_v13 }
 0xb60   : > { %v3840_v38 = vpop.eup %3839 }
 0xb61   : > { %v1855_v44 = vmul.f32 %v3840_v38, %v3832_v12 }
 0xb63   : > { %3499 = vmatpush3.bf16.xpose.msra.mxu1 %v1963_v43 }
 0xb64   : > { %3510 = vmatprep.subr.bf16.mxu1 %v4546_v13 }
 0xb65   : > { %v1848_v33 = vpop.xlane.xlu1 %1847 }
 0xb66   : > { %3841 = vrcp.f32 %v1848_v33 }
 0xb69   : > { %v2009_v46 = vpop.permute.xlu1 %2008 }
 0xb6a   : > { %3501 = vmatmul.mubr.msk.bf16.vlgmr.msra.gmra.mrb[24].mxu1 %vm1229_vm3, %v1956_v35  ;;  %v2014_v49 = vsel %vm1229_vm3, %v2009_v46, 0 }
 0xb6b   : > { %3512 = vmatprep.mubr.msk.bf16.mxu1 %vm4547_vm2, %v4546_v13 }
 0xb6d   : > { %v2007_v51 = vpop.permute.xlu1 %2006 }
 0xb70   : > { %v3842_v39 = vpop.eup %3841 }
 0xb71   : > { %v1856_v45 = vmul.f32 %v3842_v39, %v3834_v17 }
 0xb73   : > { %v1858_v47 = vpack.c.bf16 %v1856_v45, %v1855_v44 }
 0xb75   : > { %3495 = vmatmul.mubr.msk.bf16.vlgmr.msra.gmra.mrb[28].mxu0 %vm1229_vm3, %v1858_v47 }
 0xb76   : > { %3505 = vmatpush3.bf16.xpose.msra.mxu0 %v2014_v49  ;;  %3506 = vmatprep.mubr.msk.bf16.mxu0 %vm4547_vm2, %v4546_v13 }
 0xb77   : > { %3516 = vmatprep.subr.bf16.mxu0 %v4546_v13 }
 0xb7d   : > { %3507 = vmatmul.mubr.msk.bf16.vlgmr.msra.gmra.mrb[32].mxu0 %vm1229_vm3, %v2007_v51 }
 0xb7e   : > { %3518 = vmatprep.mubr.msk.bf16.mxu0 %vm4547_vm2, %v4546_v13 }
 0xc30   : > { %v1899_v52 = vpop.f32.mrb[20].mxu1 }
 0xc31   : > { %v3490_v53 = vpop.f32.mrb[21].mxu1 }
 0xc32   : > { %v1902_v54 = vpop.f32.mrb[22].mxu1 }
 0xc33   : > { %v1953_v56 = vpack.c.bf16 %v1902_v54, %v1899_v52  ;;  %v3491_v59 = vpop.f32.mrb[23].mxu1 }
 0xc3d   : > { %v1999_v60 = vpop.f32.mrb[24].mxu1 }
 0xc3e   : > { %v2000_v61 = vadd.f32 %v1999_v60, %v5408_v48  ;;  %v3502_v62 = vpop.f32.mrb[25].mxu1 }
 0xc3f   : > { %v2002_v63 = vpop.f32.mrb[26].mxu1 }
 0xc40   : > { %v2003_v0 = vadd.f32 %v2002_v63, %v5410_v50  ;;  %v3503_v1 = vpop.f32.mrb[27].mxu1  ;;  %v2057_v2 = vsel %vm1229_vm3, %v2000_v61, -inf  ;;  %v3755_v63 = vld [vmem:[%s5299_s15] sm:$0xff]  }
 0xc41   : > { %2058 = vmax.xlane.f32.xlu0 %v2057_v2  ;;  %v3757_v1 = vld [vmem:[%s5299_s15 + $0x10] sm:$0xff]   ;;  %v3758_v2 = vld [vmem:[%s5299_s15 + $0x18] sm:$0xff]  }
 0xc42   : > { %v2060_v3 = vsel %vm1229_vm3, %v2003_v0, -inf }
 0xc43   : > { %2061 = vmax.xlane.f32.xlu1 %v2060_v3 }
 0xc48   : > { %v1946_v13 = vpop.f32.mrb[28].mxu0 }
 0xc49   : > { %v3496_v5 = vpop.f32.mrb[29].mxu0 }
 0xc4a   : > { %v1949_v8 = vpop.f32.mrb[30].mxu0 }
 0xc4b   : > { %v1954_v9 = vpack.c.bf16 %v1949_v8, %v1946_v13  ;;  %v3497_v12 = vpop.f32.mrb[31].mxu0 }
 0xc50   : > { %v2050_v15 = vpop.f32.mrb[32].mxu0 }
 0xc51   : > { %v2051_v16 = vadd.f32 %v2050_v15, %v5408_v48  ;;  %v3508_v17 = vpop.f32.mrb[33].mxu0 }
 0xc52   : > { %v2053_v19 = vpop.f32.mrb[34].mxu0 }
 0xc53   : > { %v2054_v27 = vadd.f32 %v2053_v19, %v5410_v50  ;;  %v3509_v22 = vpop.f32.mrb[35].mxu0  ;;  %v2063_v23 = vsel %vm1229_vm3, %v2051_v16, -inf }
 0xc54   : > { %2064 = vmax.xlane.f32.xlu0 %v2063_v23 }
 0xc55   : > { %v2066_v24 = vsel %vm1229_vm3, %v2054_v27, -inf }
 0xc58   : > { %2067 = vmax.xlane.f32.xlu0 %v2066_v24 }
 0xcce   : > { %v2059_v25 = vpop.xlane.xlu0 %2058 }
 0xccf   : > { %v2069_v26 = vsub.f32 %v2000_v61, %v2059_v25 }
 0xcd0   : > { %v2062_v30 = vpop.xlane.xlu1 %2061 }
 0xcd1   : > { %v2073_v31 = vmul.f32 1.442695, %v2069_v26  ;;  %v2070_v29 = vsub.f32 %v2003_v0, %v2062_v30  ;;  %v3756_v0 = vld [vmem:[%s5299_s15 + $0x8] sm:$0xff]  }
 0xcd3   : > { %3843 = vpow2.f32 %v2073_v31  ;;  %v2075_v32 = vmul.f32 1.442695, %v2070_v29 }
 0xcd5   : > { %3845 = vpow2.f32 %v2075_v32 }
 0xcdd   : > { %v3844_v48 = vpop.eup %3843 }
 0xcde   : > { %v2081_v41 = vsel %vm1229_vm3, %v3844_v48, 0.0 }
 0xcdf   : > { %v3846_v43 = vpop.eup %3845  ;;  %2082 = vadd.xlane.f32.xlu0 %v2081_v41 }
 0xce0   : > { %v2084_v50 = vsel %vm1229_vm3, %v3846_v43, 0.0 }
 0xce1   : > { %2085 = vadd.xlane.f32.xlu1 %v2084_v50  ;;  %v2065_v33 = vpop.xlane.xlu0 %2064 }
 0xce2   : > { %v2071_v35 = vsub.f32 %v2051_v16, %v2065_v33 }
 0xce4   : > { %v2077_v38 = vmul.f32 1.442695, %v2071_v35 }
 0xce5   : > { %v2068_v39 = vpop.xlane.xlu0 %2067 }
 0xce6   : > { %3847 = vpow2.f32 %v2077_v38  ;;  %v2072_v44 = vsub.f32 %v2054_v27, %v2068_v39  ;;  %v3899_v38 = vld [vmem:[%s5319_s27] sm:$0xff] }
 0xce8   : > { %v2079_v45 = vmul.f32 1.442695, %v2072_v44 }
 0xcea   : > { %3849 = vpow2.f32 %v2079_v45  ;;  %v3901_v45 = vld [vmem:[%s5319_s27 + $0x8] sm:$0xff] }
 0xcf0   : > { %v3848_v46 = vpop.eup %3847 }
 0xcf1   : > { %v2087_v47 = vsel %vm1229_vm3, %v3848_v46, 0.0 }
 0xcf2   : > { %2088 = vadd.xlane.f32.xlu0 %v2087_v47 }
 0xcf4   : > { %v3850_v49 = vpop.eup %3849 }
 0xcf5   : > { %v2090_v51 = vsel %vm1229_vm3, %v3850_v49, 0.0 }
 0xcf6   : > { %2091 = vadd.xlane.f32.xlu1 %v2090_v51  ;;  %v3902_v51 = vld [vmem:[%s5319_s27 + $0x18] sm:$0xff] }
 0xd07   : > { %2150 = vrot.lane.b32.xlu1 %v5387_v42, %s4554_s20 }
 0xd08   : > { %2103 = vrot.lane.b32.xlu0 %v5380_v28, %s4554_s20 }
 0xd0b   : > { %2201 = vrot.lane.b32.xlu1 %v1709_v21, %s4553_s13 }
 0xd0c   : > { %2207 = vrot.lane.b32.xlu0 %v1953_v56, %s4551_s5 }
 0xd0f   : > { %2203 = vrot.lane.b32.xlu1 %v1710_v37, %s4553_s13 }
 0xd13   : > { %2209 = vrot.lane.b32.xlu1 %v1954_v9, %s4551_s5 }
 0xd6c   : > { %v2083_v53 = vpop.xlane.xlu0 %2082 }
 0xd6e   : > { %v2086_v52 = vpop.xlane.xlu1 %2085 }
 0xd6f   : > { %3851 = vrcp.f32 %v2086_v52 }
 0xd70   : > { %3853 = vrcp.f32 %v2083_v53 }
 0xd79   : > { %v3852_v42 = vpop.eup %3851 }
 0xd7a   : > { %v3854_v54 = vpop.eup %3853  ;;  %v2098_v59 = vmul.f32 %v3852_v42, %v3846_v43 }
 0xd7b   : > { %v2097_v18 = vmul.f32 %v3854_v54, %v3844_v48 }
 0xd7d   : > { %v2101_v34 = vpack.c.bf16 %v2098_v59, %v2097_v18 }
 0xd7f   : > { %v2089_v28 = vpop.xlane.xlu0 %2088 }
 0xd80   : > { %3855 = vrcp.f32 %v2089_v28 }
 0xd83   : > { %v2092_v20 = vpop.xlane.xlu1 %2091  ;;  %v2104_v21 = vpop.permute.xlu0 %2103 }
 0xd84   : > { %3857 = vrcp.f32 %v2092_v20  ;;  %3511 = vmatpush3.bf16.msra.mxu1 %v2104_v21 }
 0xd85   : > { %3522 = vmatprep.subr.bf16.mxu1 %v3755_v63 }
 0xd87   : > { %v2151_v36 = vpop.permute.xlu1 %2150  ;;  %3513 = vmatmul.mubr.msk.bf16.vlgmr.msra.gmra.mrb[28].mxu1 %vm1229_vm3, %v2101_v34  ;;  %v2208_v22 = vpop.permute.xlu0 %2207 }
 0xd88   : > { %3517 = vmatpush3.bf16.msra.mxu0 %v2151_v36  ;;  %3523 = vmatpush3.bf16.msra.mxu1 %v3755_v63 }
 0xd89   : > { %3524 = vmatprep.subr.bf16.mxu1 %v3756_v0 }
 0xd8a   : > { %v3856_v37 = vpop.eup %3855 }
 0xd8b   : > { %v2099_v60 = vmul.f32 %v3856_v37, %v3848_v46  ;;  %v2202_v27 = vpop.permute.xlu1 %2201 }
 0xd8c   : > { %3525 = vmatpush3.bf16.msra.mxu1 %v3756_v0  ;;  %v2219_v23 = vsel %vm1229_vm3, %v1461_v58, %v2202_v27  ;;  %v3296_v58 = vld [vmem:[%s835_s2] ss:$0 sm:$0xff]  ;;  %v3768_v27 = vld [vmem:[%s5304_s12 + $0x30] ss:$8 sps:$4 sm:$0xff]  }
 0xd8d   : > { %3526 = vmatprep.subr.bf16.mxu1 %v3757_v1  ;;  %v2225_v24 = vsel %vm2223_vm4, %v2219_v23, %v2208_v22 }
 0xd8e   : > { %v3858_v56 = vpop.eup %3857 }
 0xd8f   : > { %v2100_v61 = vmul.f32 %v3858_v56, %v3850_v49  ;;  %v2204_v30 = vpop.permute.xlu1 %2203 }
 0xd90   : > { %3527 = vmatpush3.bf16.msra.mxu1 %v3757_v1  ;;  %v2222_v29 = vsel %vm1229_vm3, %v1462_v7, %v2204_v30  ;;  %v3900_v7 = vld [vmem:[%s5319_s27 + $0x10] sm:$0xff] }
 0xd91   : > { %v2102_v62 = vpack.c.bf16 %v2100_v61, %v2099_v60  ;;  %3528 = vmatprep.subr.bf16.mxu1 %v3758_v2 }
 0xd93   : > { %3519 = vmatmul.mubr.msk.bf16.vlgmr.msra.gmra.mrb[36].mxu0 %vm1229_vm3, %v2102_v62  ;;  %v2210_v31 = vpop.permute.xlu1 %2209 }
 0xd94   : > { %2503 = vmatprep.mubr.bf16.mxu0 %v4545_v40  ;;  %3529 = vmatpush3.bf16.msra.mxu1 %v3758_v2  ;;  %v2227_v32 = vsel %vm2223_vm4, %v2222_v29, %v2210_v31 }
 0xe5a   : > { %v2143_v3 = vpop.f32.mrb[28].mxu1 }
 0xe5b   : > { %v3514_v13 = vpop.f32.mrb[29].mxu1 }
 0xe5c   : > { %v2146_v5 = vpop.f32.mrb[30].mxu1 }
 0xe5d   : > { %v2197_v8 = vpack.c.bf16 %v2146_v5, %v2143_v3  ;;  %v3515_v9 = vpop.f32.mrb[31].mxu1 }
 0xe5e   : > { %v3759_v9 = vld [vmem:[%s5304_s12] ss:$8 sps:$4 sm:$0xff]  }
 0xe5f   : > { %2213 = vrot.lane.b32.xlu0 %v2197_v8, %s4549_s25  ;;  %v3761_v8 = vld [vmem:[%s5304_s12 + $0x4] ss:$8 sps:$4 sm:$0xff]  }
 0xe60   : > { %2471 = vmatprep.subr.bf16.mxu0 %v3761_v8 }
 0xe61   : > { %2472 = vmatpush1.bf16.msra.mxu0 %v3759_v9 }
 0xe66   : > { %v2190_v12 = vpop.f32.mrb[36].mxu0 }
 0xe67   : > { %v3520_v15 = vpop.f32.mrb[37].mxu0 }
 0xe68   : > { %v2193_v16 = vpop.f32.mrb[38].mxu0  ;;  %v3762_v15 = vld [vmem:[%s5304_s12 + $0x10] ss:$8 sps:$4 sm:$0xff]  }
 0xe69   : > { %v2198_v17 = vpack.c.bf16 %v2193_v16, %v2190_v12  ;;  %v3521_v19 = vpop.f32.mrb[39].mxu0  ;;  %v3764_v12 = vld [vmem:[%s5304_s12 + $0x14] ss:$8 sps:$4 sm:$0xff]   ;;  %v3767_v16 = vld [vmem:[%s5304_s12 + $0x24] ss:$8 sps:$4 sm:$0xff]  }
 0xe6a   : > { %2473 = vmatprep.subr.bf16.mxu0 %v3764_v12  ;;  %v3770_v19 = vld [vmem:[%s5304_s12 + $0x34] ss:$8 sps:$4 sm:$0xff]  }
 0xe6b   : > { %2215 = vrot.lane.b32.xlu1 %v2198_v17, %s4549_s25  ;;  %2474 = vmatpush1.bf16.msra.mxu0 %v3762_v15  ;;  %v3765_v17 = vld [vmem:[%s5304_s12 + $0x20] ss:$8 sps:$4 sm:$0xff]  }
 0xe6c   : > { %2475 = vmatprep.subr.bf16.mxu0 %v3767_v16 }
 0xe6f   : > { %2476 = vmatpush1.bf16.msra.mxu0 %v3765_v17 }
 0xe70   : > { %2477 = vmatprep.subr.bf16.mxu0 %v3770_v19 }
 0xe73   : > { %2478 = vmatpush1.bf16.msra.mxu0 %v3768_v27 }
 0xed1   : > { %v2214_v25 = vpop.permute.xlu0 %2213 }
 0xed2   : > { %v2230_v26 = vsel %vm2228_vm5, %v2225_v24, %v2214_v25 }
 0xed3   : > { %3530 = vmatprep.mubr.msk.bf16.mxu1 %vm1019_vm1, %v2230_v26 }
 0xedd   : > { %v2216_v55 = vpop.permute.xlu1 %2215 }
 0xede   : > { %v2232_v57 = vsel %vm2228_vm5, %v2227_v32, %v2216_v55 }
 0xedf   : > { %3531 = vmatmul.mubr.msk.bf16.vlgmr.msra.gmra.mrb[32].mxu1 %vm1019_vm1, %v2232_v57 }
 0xfb2   : > { %v3532_v48 = vpop.f32.mrb[32].mxu1 }
 0xfb3   : > { %v2310_v41 = vpop.f32.mrb[33].mxu1  ;;  %v2319_v43 = vadd.f32 %v3532_v48, %v3296_v58 }
 0xfb4   : > { %v2311_v50 = vadd.f32 %v3296_v58, %v2310_v41  ;;  %v3533_v33 = vpop.f32.mrb[34].mxu1  ;;  %v3303_v41 = vld [vmem:[%s843_s11] ss:$0 sm:$0xff] }
 0xfb5   : > { %v2313_v35 = vpop.f32.mrb[35].mxu1  ;;  %v5607_v39 = vadd.f32 %v3900_v7, %v2319_v43  ;;  %v2322_v44 = vadd.f32 %v3533_v33, %v3296_v58 }
 0xfb6   : > { %v5604_v4 = vadd.f32 %v3899_v38, %v2311_v50  ;;  %v2314_v6 = vadd.f32 %v3296_v58, %v2313_v35 }
 0xfb7   : > { %v5617_v52 = vadd.f32 %v3902_v51, %v2322_v44  ;;  %v2337_v53 = vsel %vm1019_vm1, %v5607_v39, 0.0 }
 0xfb8   : > { %v5610_v46 = vadd.f32 %v3901_v45, %v2314_v6  ;;  %v2331_v47 = vsel %vm1019_vm1, %v5604_v4, 0.0  ;;  %v3304_v6 = vld [vmem:[%s851_s28] ss:$0 sm:$0xff] }
 0xfb9   : > { %2332 = vadd.xlane.f32.xlu0 %v2331_v47  ;;  %v2340_v42 = vsel %vm1019_vm1, %v5617_v52, 0.0 }
 0xfba   : > { %v2334_v49 = vsel %vm1019_vm1, %v5610_v46, 0.0 }
 0xfbb   : > { %2335 = vadd.xlane.f32.xlu1 %v2334_v49 }
 0xfbd   : > { %2338 = vadd.xlane.f32.xlu0 %v2337_v53 }
 0xfc1   : > { %2341 = vadd.xlane.f32.xlu0 %v2340_v42 }
0x1046   : > { %v2333_v28 = vpop.xlane.xlu0 %2332 }
0x1047   : > { %v2343_v54 = vmul.f32 0.015625, %v2333_v28 }
0x1048   : > { %v2336_v59 = vpop.xlane.xlu1 %2335 }
0x1049   : > { %v2347_v18 = vsub.f32 %v5604_v4, %v2343_v54  ;;  %v2344_v20 = vmul.f32 0.015625, %v2336_v59 }
0x104a   : > { %v2339_v21 = vpop.xlane.xlu0 %2338 }
0x104b   : > { %v2348_v34 = vsub.f32 %v5610_v46, %v2344_v20  ;;  %v2345_v36 = vmul.f32 0.015625, %v2339_v21  ;;  %v2351_v37 = vmul.f32 %v2347_v18, %v2347_v18  ;;  %v3771_v20 = vld [vmem:[%s5308_s8 + $0x40] sm:$0xff]  }
0x104c   : > { %v3772_v21 = vld [vmem:[%s5308_s8] sm:$0xff]   ;;  %3398 = vmatprep.subr.bf16.mxu1 %v3771_v20 }
0x104d   : > { %v2349_v56 = vsub.f32 %v5607_v39, %v2345_v36  ;;  %v2355_v60 = vsel %vm1019_vm1, %v2351_v37, 0.0  ;;  %v2352_v61 = vmul.f32 %v2348_v34, %v2348_v34  ;;  %3399 = vmatpush3.bf16.msra.mxu1 %v3772_v21  ;;  %v3774_v36 = vld [vmem:[%s5308_s8 + $0x8] sm:$0xff]   ;;  %v3776_v37 = vld [vmem:[%s5308_s8 + $0x10] sm:$0xff]  }
0x104e   : > { %2356 = vadd.xlane.f32.xlu0 %v2355_v60  ;;  %v2342_v62 = vpop.xlane.xlu0 %2341  ;;  %v3778_v60 = vld [vmem:[%s5308_s8 + $0x18] sm:$0xff]  }
0x104f   : > { %v2346_v63 = vmul.f32 0.015625, %v2342_v62  ;;  %v2358_v0 = vsel %vm1019_vm1, %v2352_v61, 0.0  ;;  %v2353_v1 = vmul.f32 %v2349_v56, %v2349_v56  ;;  %v3779_v61 = vld [vmem:[%s5308_s8 + $0x60] sm:$0xff]  }
0x1050   : > { %2359 = vadd.xlane.f32.xlu1 %v2358_v0  ;;  %v3780_v62 = vld [vmem:[%s5308_s8 + $0x20] sm:$0xff]   ;;  %v3782_v0 = vld [vmem:[%s5308_s8 + $0x28] sm:$0xff]  }
0x1051   : > { %v2350_v2 = vsub.f32 %v5617_v52, %v2346_v63  ;;  %v2361_v3 = vsel %vm1019_vm1, %v2353_v1, 0.0  ;;  %v3781_v63 = vld [vmem:[%s5308_s8 + $0x68] sm:$0xff]   ;;  %v3783_v1 = vld [vmem:[%s5308_s8 + $0x70] sm:$0xff]  }
0x1052   : > { %2362 = vadd.xlane.f32.xlu0 %v2361_v3  ;;  %v3785_v3 = vld [vmem:[%s5308_s8 + $0x78] sm:$0xff]  }
0x1053   : > { %v2354_v13 = vmul.f32 %v2350_v2, %v2350_v2 }
0x1055   : > { %v2364_v5 = vsel %vm1019_vm1, %v2354_v13, 0.0  ;;  %v3786_v13 = vld [vmem:[%s5308_s8 + $0x38] sm:$0xff]  }
0x1056   : > { %2365 = vadd.xlane.f32.xlu1 %v2364_v5  ;;  %v2413_v5 = vld [vmem:[%s5306_s18] sm:$0x3] }
0x1057   : > { %v2418_v8 = vrot.slane %v2413_v5, %v1107_v11  ;;  %v2422_v9 = vrot.slane %v2413_v5, %v1111_v14 }
0x10db   : > { %v2357_v22 = vpop.xlane.xlu0 %2356 }
0x10dc   : > { %v2367_v23 = vmul.f32 0.015625, %v2357_v22 }
0x10dd   : > { %v2360_v24 = vpop.xlane.xlu1 %2359 }
0x10de   : > { %v2371_v25 = vadd.f32 1e-05, %v2367_v23  ;;  %v2368_v26 = vmul.f32 0.015625, %v2360_v24 }
0x10df   : > { %v2363_v30 = vpop.xlane.xlu0 %2362 }
0x10e0   : > { %3859 = vrsqrt.f32 %v2371_v25  ;;  %v2372_v31 = vadd.f32 1e-05, %v2368_v26  ;;  %v2369_v29 = vmul.f32 0.015625, %v2363_v30 }
0x10e2   : > { %3861 = vrsqrt.f32 %v2372_v31  ;;  %v2373_v32 = vadd.f32 1e-05, %v2369_v29 }
0x10e3   : > { %v2366_v55 = vpop.xlane.xlu1 %2365 }
0x10e4   : > { %3863 = vrsqrt.f32 %v2373_v32  ;;  %v2370_v57 = vmul.f32 0.015625, %v2366_v55 }
0x10e6   : > { %v2374_v58 = vadd.f32 1e-05, %v2370_v57 }
0x10e8   : > { %3865 = vrsqrt.f32 %v2374_v58 }
0x10ea   : > { %v3860_v48 = vpop.eup %3859 }
0x10eb   : > { %v2379_v43 = vmul.f32 %v3860_v48, %v2347_v18 }
0x10ec   : > { %v3862_v50 = vpop.eup %3861 }
0x10ed   : > { %v2389_v33 = vmul.f32 %v3303_v41, %v2379_v43  ;;  %v2380_v35 = vmul.f32 %v3862_v50, %v2348_v34  ;;  %v3773_v34 = vld [vmem:[%s5308_s8 + $0x48] sm:$0xff]  }
0x10ee   : > { %v3864_v38 = vpop.eup %3863  ;;  %3400 = vmatprep.subr.bf16.mxu1 %v3773_v34 }
0x10ef   : > { %v2390_v7 = vmul.f32 %v3303_v41, %v2380_v35  ;;  %v2381_v44 = vmul.f32 %v3864_v38, %v2349_v56  ;;  %v2399_v45 = vadd.f32 %v3304_v6, %v2389_v33  ;;  %3401 = vmatpush3.bf16.msra.mxu1 %v3774_v36  ;;  %v3777_v56 = vld [vmem:[%s5308_s8 + $0x58] sm:$0xff]  }
0x10f1   : > { %v2400_v47 = vadd.f32 %v3304_v6, %v2390_v7  ;;  %v2391_v42 = vmul.f32 %v3303_v41, %v2381_v44 }
0x10f2   : > { %v3866_v49 = vpop.eup %3865 }
0x10f3   : > { %v2382_v51 = vmul.f32 %v3866_v49, %v2350_v2  ;;  %v2403_v53 = vpack.c.bf16 %v2400_v47, %v2399_v45  ;;  %v2401_v59 = vadd.f32 %v3304_v6, %v2391_v42  ;;  %v3784_v2 = vld [vmem:[%s5308_s8 + $0x30] sm:$0xff]  }
0x10f5   : > { %3313 = vmatmul.mubr.msk.bf16.vlgmr.msra.gmra.mrb[40].mxu0 %vm1019_vm1, %v2403_v53  ;;  %v2392_v28 = vmul.f32 %v3303_v41, %v2382_v51 }
0x10f6   : > { %2513 = vmatprep.mubr.bf16.mxu0 %v4545_v40  ;;  %v3775_v40 = vld [vmem:[%s5308_s8 + $0x50] sm:$0xff]  }
0x10f7   : > { %v2402_v54 = vadd.f32 %v3304_v6, %v2392_v28  ;;  %3402 = vmatprep.subr.bf16.mxu1 %v3775_v40 }
0x10f8   : > { %3403 = vmatpush3.bf16.msra.mxu1 %v3776_v37 }
0x10f9   : > { %v2404_v18 = vpack.c.bf16 %v2402_v54, %v2401_v59  ;;  %3404 = vmatprep.subr.bf16.mxu1 %v3777_v56 }
0x10fc   : > { %3405 = vmatpush3.bf16.msra.mxu1 %v3778_v60 }
0x10fd   : > { %3314 = vmatmul.mubr.msk.bf16.gmra.mrb[44].mxu0 %vm1019_vm1, %v2404_v18  ;;  %3406 = vmatprep.subr.bf16.mxu1 %v3779_v61 }
0x1100   : > { %3407 = vmatpush3.bf16.msra.mxu1 %v3780_v62 }
0x1101   : > { %3408 = vmatprep.subr.bf16.mxu1 %v3781_v63 }
0x1104   : > { %3409 = vmatpush3.bf16.msra.mxu1 %v3782_v0 }
0x1105   : > { %3410 = vmatprep.subr.bf16.mxu1 %v3783_v1 }
0x1108   : > { %3411 = vmatpush3.bf16.msra.mxu1 %v3784_v2 }
0x1109   : > { %3412 = vmatprep.subr.bf16.mxu1 %v3785_v3 }
0x110c   : > { %3413 = vmatpush3.bf16.msra.mxu1 %v3786_v13 }
0x11c8   : > { %v2505_v12 = vpop.f32.mrb[40].mxu0 }
0x11c9   : > { %v5667_v15 = vadd.f32 %v2505_v12, %v2418_v8  ;;  %v2507_v16 = vpop.f32.mrb[41].mxu0 }
0x11ca   : > { %v5669_v17 = vadd.f32 %v2507_v16, %v2422_v9  ;;  %v2509_v19 = vpop.f32.mrb[42].mxu0 }
0x11cb   : > { %v3315_v27 = vmul.f32 -1.702, %v5667_v15  ;;  %v5672_v22 = vadd.f32 %v2509_v19, %v2418_v8  ;;  %v2511_v23 = vpop.f32.mrb[43].mxu0 }
0x11cc   : > { %v3316_v24 = vmul.f32 -1.702, %v5669_v17  ;;  %v2512_v25 = vadd.f32 %v2511_v23, %v2422_v9 }
0x11cd   : > { %v2540_v26 = vmul.f32 1.442695, %v3315_v27  ;;  %v3317_v11 = vmul.f32 -1.702, %v5672_v22 }
0x11ce   : > { %v2542_v10 = vmul.f32 1.442695, %v3316_v24  ;;  %v3318_v14 = vmul.f32 -1.702, %v2512_v25 }
0x11cf   : > { %3867 = vpow2.f32 %v2540_v26  ;;  %v2544_v30 = vmul.f32 1.442695, %v3317_v11 }
0x11d0   : > { %3869 = vpow2.f32 %v2542_v10  ;;  %v2546_v31 = vmul.f32 1.442695, %v3318_v14  ;;  %v2515_v29 = vpop.f32.mrb[44].mxu0 }
0x11d1   : > { %3871 = vpow2.f32 %v2544_v30  ;;  %v2516_v32 = vadd.f32 %v2515_v29, %v2418_v8  ;;  %v2517_v55 = vpop.f32.mrb[45].mxu0 }
0x11d2   : > { %3873 = vpow2.f32 %v2546_v31  ;;  %v2518_v57 = vadd.f32 %v2517_v55, %v2422_v9  ;;  %v2519_v58 = vpop.f32.mrb[46].mxu0 }
0x11d3   : > { %v3319_v48 = vmul.f32 -1.702, %v2516_v32  ;;  %v2520_v41 = vadd.f32 %v2519_v58, %v2418_v8  ;;  %v2521_v43 = vpop.f32.mrb[47].mxu0 }
0x11d4   : > { %v3320_v50 = vmul.f32 -1.702, %v2518_v57  ;;  %v2522_v33 = vadd.f32 %v2521_v43, %v2422_v9 }
0x11d5   : > { %v2548_v35 = vmul.f32 1.442695, %v3319_v48  ;;  %v3321_v38 = vmul.f32 -1.702, %v2520_v41 }
0x11d6   : > { %v2550_v6 = vmul.f32 1.442695, %v3320_v50  ;;  %v3322_v7 = vmul.f32 -1.702, %v2522_v33 }
0x11d7   : > { %3875 = vpow2.f32 %v2548_v35  ;;  %v2552_v44 = vmul.f32 1.442695, %v3321_v38 }
0x11d8   : > { %3877 = vpow2.f32 %v2550_v6  ;;  %v2554_v45 = vmul.f32 1.442695, %v3322_v7 }
0x11d9   : > { %v3868_v47 = vpop.eup %3867  ;;  %3879 = vpow2.f32 %v2552_v44 }
0x11da   : > { %v3870_v49 = vpop.eup %3869  ;;  %v2556_v51 = vadd.f32 1.0, %v3868_v47  ;;  %3881 = vpow2.f32 %v2554_v45 }
0x11db   : > { %v3872_v53 = vpop.eup %3871  ;;  %v2557_v42 = vadd.f32 1.0, %v3870_v49 }
0x11dc   : > { %v3874_v28 = vpop.eup %3873  ;;  %3883 = vrcp.f32 %v2556_v51  ;;  %v2558_v54 = vadd.f32 1.0, %v3872_v53 }
0x11dd   : > { %3885 = vrcp.f32 %v2557_v42  ;;  %v2559_v59 = vadd.f32 1.0, %v3874_v28 }
0x11de   : > { %3887 = vrcp.f32 %v2558_v54 }
0x11df   : > { %3889 = vrcp.f32 %v2559_v59 }
0x11e1   : > { %v3876_v18 = vpop.eup %3875 }
0x11e2   : > { %v3878_v20 = vpop.eup %3877  ;;  %v2560_v21 = vadd.f32 1.0, %v3876_v18 }
0x11e3   : > { %v3880_v34 = vpop.eup %3879  ;;  %v2561_v36 = vadd.f32 1.0, %v3878_v20 }
0x11e4   : > { %v3882_v40 = vpop.eup %3881  ;;  %3891 = vrcp.f32 %v2560_v21  ;;  %v2562_v37 = vadd.f32 1.0, %v3880_v34 }
0x11e5   : > { %3893 = vrcp.f32 %v2561_v36  ;;  %v2563_v56 = vadd.f32 1.0, %v3882_v40 }
0x11e6   : > { %v3884_v60 = vpop.eup %3883  ;;  %3895 = vrcp.f32 %v2562_v37 }
0x11e7   : > { %v3886_v61 = vpop.eup %3885  ;;  %3897 = vrcp.f32 %v2563_v56  ;;  %v2580_v0 = vmul.f32 %v3884_v60, %v5667_v15 }
0x11e8   : > { %v3888_v62 = vpop.eup %3887  ;;  %v2581_v2 = vmul.f32 %v3886_v61, %v5669_v17  ;;  %v3323_v17 = vld [vmem:[%s886_s14] ss:$0 sm:$0xff] }
0x11e9   : > { %v3890_v63 = vpop.eup %3889  ;;  %v2582_v1 = vmul.f32 %v3888_v62, %v5672_v22 }
0x11ea   : > { %v2583_v3 = vmul.f32 %v3890_v63, %v2512_v25 }
0x11eb   : > { %v2588_v13 = vpack.c.bf16 %v2582_v1, %v2580_v0 }
0x11ec   : > { %v2589_v5 = vpack.c.bf16 %v2583_v3, %v2581_v2 }
0x11ee   : > { %v3892_v8 = vpop.eup %3891  ;;  %2759 = vmatprep.mubr.bf16.mxu1 %v2589_v5 }
0x11ef   : > { %v3894_v9 = vpop.eup %3893  ;;  %2760 = vmatmul.mubr.bf16.vlgmr.msra.gmra.mrb[36].mxu1 %v2588_v13  ;;  %v2584_v19 = vmul.f32 %v3892_v8, %v2516_v32 }
0x11f0   : > { %v3896_v12 = vpop.eup %3895  ;;  %v2585_v23 = vmul.f32 %v3894_v9, %v2518_v57 }
0x11f1   : > { %v3898_v16 = vpop.eup %3897  ;;  %v2586_v27 = vmul.f32 %v3896_v12, %v2520_v41 }
0x11f2   : > { %v2587_v24 = vmul.f32 %v3898_v16, %v2522_v33 }
0x11f3   : > { %v2590_v26 = vpack.c.bf16 %v2586_v27, %v2584_v19 }
0x11f4   : > { %v2591_v15 = vpack.c.bf16 %v2587_v24, %v2585_v23 }
0x11f6   : > { %2767 = vmatprep.mubr.bf16.mxu1 %v2591_v15 }
0x11f7   : > { %2768 = vmatmul.mubr.bf16.gmra.mrb[40].mxu1 %v2590_v26 }
0x12c2   : > { %v3414_v22 = vpop.f32.mrb[36].mxu1 }
0x12c3   : > { %v3415_v25 = vpop.f32.mrb[37].mxu1 }
0x12c4   : > { %v3416_v11 = vadd.f32 %v3415_v25, %v3414_v22  ;;  %v3417_v10 = vpop.f32.mrb[38].mxu1 }
0x12c5   : > { %v3418_v14 = vpop.f32.mrb[39].mxu1 }
0x12c6   : > { %v2762_v30 = vadd.f32 %v3416_v11, %v3323_v17  ;;  %v3419_v31 = vadd.f32 %v3418_v14, %v3417_v10 }
0x12c8   : > { %v2776_v29 = vadd.f32 %v2762_v30, %v5604_v4  ;;  %v2765_v55 = vadd.f32 %v3419_v31, %v3323_v17 }
0x12ca   : > { %v2777_v32 = vadd.f32 %v2765_v55, %v5610_v46  ;;  %v3420_v57 = vpop.f32.mrb[40].mxu1  ;;  %2785 = vst.msk [vmem:[%s5319_s27] sm:$0xff] (!%p3340_p12), %vm1019_vm1, %v2776_v29 }
0x12cb   : > { %v3421_v58 = vpop.f32.mrb[41].mxu1 }
0x12cc   : > { %v3422_v48 = vadd.f32 %v3421_v58, %v3420_v57  ;;  %v3423_v41 = vpop.f32.mrb[42].mxu1  ;;  %2784 = sbr.rel (%p3340_p12) target bundleno = 4821 (0x12d5), region = 156  ;;  %2786 = vst.msk [vmem:[%s5319_s27 + $0x8] sm:$0xff] (!%p3340_p12), %vm1019_vm1, %v2777_v32 }
0x12cd   : > { %v3424_v43 = vpop.f32.mrb[43].mxu1 }
0x12ce   : > { %v2770_v50 = vadd.f32 %v3422_v48, %v3323_v17  ;;  %v3425_v33 = vadd.f32 %v3424_v43, %v3423_v41 }
0x12d0   : > { %v2778_v35 = vadd.f32 %v2770_v50, %v5607_v39  ;;  %v2773_v38 = vadd.f32 %v3425_v33, %v3323_v17 }
0x12d2   : > { %v2779_v6 = vadd.f32 %v2773_v38, %v5617_v52  ;;  %2787 = vst.msk [vmem:[%s5319_s27 + $0x10] sm:$0xff] (!%p3340_p12), %vm1019_vm1, %v2778_v35 }
0x12d4   : > { %2788 = vst.msk [vmem:[%s5319_s27 + $0x18] sm:$0xff] %vm1019_vm1, %v2779_v6 }
0x12d5 PF: > { %s5947_s24 = sld [smem:[#allocation35_spill]] }
0x12db   : > { %p3341_p2 = scmp.ne.s32.totalorder %s5947_s24, 1 }
0x12dc   : > { %v2794_v4 = vsel (!%p3341_p2), %vm1019_vm1, %v2776_v29, 0.0  ;;  %v2800_v39 = vsel (!%p3341_p2), %vm1019_vm1, %v2778_v35, 0.0  ;;  %v2797_v46 = vsel (!%p3341_p2), %vm1019_vm1, %v2777_v32, 0.0  ;;  %v2803_v52 = vsel (!%p3341_p2), %vm1019_vm1, %v2779_v6, 0.0  ;;  %v3342_v19 = vld [vmem:[#allocation19] ss:$0 sm:$0xff] (!%p3341_p2) }
0x12dd   : > { %2791 = sbr.rel (%p3341_p2) target bundleno = 5150 (0x141e), region = 160  ;;  %2795 = vadd.xlane.f32.xlu0 (!%p3341_p2), %v2794_v4  ;;  %2801 = vadd.xlane.f32.xlu1 (!%p3341_p2), %v2800_v39  ;;  %v3343_v23 = vld [vmem:[#allocation20] ss:$0 sm:$0xff] (!%p3341_p2) }
0x12e1   : > { %2798 = vadd.xlane.f32.xlu0 (!%p3341_p2), %v2797_v46  ;;  %2804 = vadd.xlane.f32.xlu1 (!%p3341_p2), %v2803_v52 }
0x136a   : > { %v2796_v7 = vpop.xlane.xlu0 %2795  ;;  %v2802_v44 = vpop.xlane.xlu1 %2801 }
0x136b   : > { %v2806_v45 = vmul.f32 0.015625, %v2796_v7  ;;  %v2808_v47 = vmul.f32 0.015625, %v2802_v44 }
0x136d   : > { %v2810_v49 = vsub.f32 %v2776_v29, %v2806_v45  ;;  %v2812_v51 = vsub.f32 %v2778_v35, %v2808_v47 }
0x136e   : > { %v2799_v53 = vpop.xlane.xlu0 %2798  ;;  %v2805_v42 = vpop.xlane.xlu1 %2804 }
0x136f   : > { %v2807_v28 = vmul.f32 0.015625, %v2799_v53  ;;  %v2809_v54 = vmul.f32 0.015625, %v2805_v42  ;;  %v2814_v59 = vmul.f32 %v2810_v49, %v2810_v49  ;;  %v2816_v18 = vmul.f32 %v2812_v51, %v2812_v51 }
0x1371   : > { %v2811_v20 = vsub.f32 %v2777_v32, %v2807_v28  ;;  %v2813_v21 = vsub.f32 %v2779_v6, %v2809_v54  ;;  %v2818_v34 = vsel %vm1019_vm1, %v2814_v59, 0.0  ;;  %v2824_v36 = vsel %vm1019_vm1, %v2816_v18, 0.0 }
0x1372   : > { %2819 = vadd.xlane.f32.xlu0 %v2818_v34 }
0x1373   : > { %v2815_v40 = vmul.f32 %v2811_v20, %v2811_v20  ;;  %v2817_v37 = vmul.f32 %v2813_v21, %v2813_v21 }
0x1375   : > { %v2821_v56 = vsel %vm1019_vm1, %v2815_v40, 0.0  ;;  %v2827_v60 = vsel %vm1019_vm1, %v2817_v37, 0.0 }
0x1376   : > { %2825 = vadd.xlane.f32.xlu0 %v2824_v36  ;;  %2822 = vadd.xlane.f32.xlu1 %v2821_v56 }
0x137a   : > { %2828 = vadd.xlane.f32.xlu1 %v2827_v60 }
0x13ff   : > { %v2820_v61 = vpop.xlane.xlu0 %2819 }
0x1400   : > { %v2830_v62 = vmul.f32 0.015625, %v2820_v61 }
0x1402   : > { %v2834_v63 = vadd.f32 1e-05, %v2830_v62 }
0x1403   : > { %v2823_v0 = vpop.xlane.xlu1 %2822  ;;  %v2826_v1 = vpop.xlane.xlu0 %2825 }
0x1404   : > { %3903 = vrsqrt.f32 %v2834_v63  ;;  %v2831_v2 = vmul.f32 0.015625, %v2823_v0  ;;  %v2832_v3 = vmul.f32 0.015625, %v2826_v1 }
0x1406   : > { %v2835_v13 = vadd.f32 1e-05, %v2831_v2  ;;  %v2836_v5 = vadd.f32 1e-05, %v2832_v3 }
0x1407   : > { %v2829_v8 = vpop.xlane.xlu1 %2828 }
0x1408   : > { %3905 = vrsqrt.f32 %v2835_v13  ;;  %v2833_v9 = vmul.f32 0.015625, %v2829_v8 }
0x1409   : > { %3907 = vrsqrt.f32 %v2836_v5 }
0x140a   : > { %v2837_v12 = vadd.f32 1e-05, %v2833_v9 }
0x140c   : > { %3909 = vrsqrt.f32 %v2837_v12 }
0x140e   : > { %v3904_v16 = vpop.eup %3903 }
0x140f   : > { %v2842_v27 = vmul.f32 %v3904_v16, %v2810_v49 }
0x1411   : > { %v2852_v24 = vmul.f32 %v3342_v19, %v2842_v27 }
0x1412   : > { %v3906_v26 = vpop.eup %3905 }
0x1413   : > { %v3908_v15 = vpop.eup %3907  ;;  %v2862_v22 = vadd.f32 %v3343_v23, %v2852_v24  ;;  %v2843_v17 = vmul.f32 %v3906_v26, %v2811_v20 }
0x1414   : > { %v2844_v25 = vmul.f32 %v3908_v15, %v2812_v51 }
0x1415   : > { %2866 = vst.msk [vmem:[%s5319_s27] sm:$0xff] %vm1019_vm1, %v2862_v22  ;;  %v2853_v11 = vmul.f32 %v3342_v19, %v2843_v17 }
0x1416   : > { %v3910_v10 = vpop.eup %3909  ;;  %v2854_v14 = vmul.f32 %v3342_v19, %v2844_v25 }
0x1417   : > { %v2863_v30 = vadd.f32 %v3343_v23, %v2853_v11  ;;  %v2845_v31 = vmul.f32 %v3910_v10, %v2813_v21 }
0x1418   : > { %v2864_v29 = vadd.f32 %v3343_v23, %v2854_v14 }
0x1419   : > { %2867 = vst.msk [vmem:[%s5319_s27 + $0x8] sm:$0xff] %vm1019_vm1, %v2863_v30  ;;  %v2855_v55 = vmul.f32 %v3342_v19, %v2845_v31 }
0x141a   : > { %2868 = vst.msk [vmem:[%s5319_s27 + $0x10] sm:$0xff] %vm1019_vm1, %v2864_v29 }
0x141b   : > { %v2865_v32 = vadd.f32 %v3343_v23, %v2855_v55 }
0x141d   : > { %2869 = vst.msk [vmem:[%s5319_s27 + $0x18] sm:$0xff] %vm1019_vm1, %v2865_v32 }
0x141e PF: > { %s5948_s6 = sld [smem:[#allocation36_spill]]  ;;  %s5950_s15 = sld [smem:[#allocation59_spill]] }
0x141f   : > { %s2885_s11 = sshll.u32 %s5319_s27, 4  ;;  %s5722_s28 = scalar_lea.sflag [#allocation4], %s778_s30  ;;  %s5718_s11 = int_to_ptr.vmem [resolvable:$true] %s2885_s11 }
0x1420   : > { %s4385_s12 = scalar_lea.vmem %s5718_s11, 512  ;;  %p5951_p13 = scmp.ne.s32.totalorder %s5916_s3, 0 }
0x1421   : > { %p4386_p1 = scmp.ne.s32.totalorder %s5718_s11, %s4385_s12  ;;  %s4555_s18 = smov [#allocation22]  }
0x1422   : > { %s4389_s8 = sshll.u32 %s4555_s18, 4  ;;  %s4390_s8 = int_to_ptr.vmem [resolvable:$false] %s4389_s8 }
0x1423   : > { %p4387_p8 = pnand %p4386_p1, %p5951_p13  ;;  %s4391_s14 = scalar_lea.vmem %s4390_s8, 1024 }
0x1424   : > { %s3359_s9 = sshll.u32 %s5948_s6, 9  ;;  %p4392_p11 = scmp.lt.s32.totalorder %s5718_s11, %s4390_s8 }
0x1425   : > { %s5715_s2 = scalar_lea.hbm %s5950_s15, %s3359_s9  ;;  %p4388_p9 = pneg %p4387_p8 }
0x1426   : > { %p4393_p4 = scmp.lt.s32.totalorder %s4391_s14, %s4385_s12 }
0x1428   : > { %p4394_p0 = por %p4393_p4, %p4392_p11 }
0x142a   : > { %p4395_p6 = pnand %p4394_p0, %p4388_p9 }
0x142c   : > { %4398 = shalt.err (!%p4395_p6)
}
0x142d   : > { %s4399_s30 = scalar_lea.hbm %s5715_s2, 512  ;;  %s4403_s19 = scalar_lea.hbm %s5950_s15, 1024 }
0x142e   : > { %p4400_p3 = scmp.ne.s32.totalorder %s5715_s2, %s4399_s30  ;;  %p4404_p7 = scmp.lt.u32.totalorder %s5715_s2, %s5950_s15 }
0x142f   : > { %p4405_p12 = scmp.lt.u32.totalorder %s4403_s19, %s4399_s30  ;;  %p4407_p1 = scmp.lt.u32.totalorder %s4399_s30, %s5715_s2 }
0x1430   : > { %p4401_p5 = pnand %p4400_p3, %p5951_p13 }
0x1431   : > { %p4406_p2 = por %p4405_p12, %p4404_p7 }
0x1432   : > { %p4402_p10 = pneg %p4401_p5 }
0x1433   : > { %p4408_p8 = por %p4407_p1, %p4406_p2 }
0x1435   : > { %p4409_p9 = pnand %p4408_p8, %p4402_p10 }
0x1437   : > { %4412 = shalt.err (!%p4409_p9)
}
0x1438   : > { %s4556_s5 = smov 128   ;;  %s4557_s21 = smov 8  }
0x1439   : > { %3572 = dma.vmem_to_hbm [thread:$0]  (%p5951_p13), %s5718_s11, 512, %s5715_s2, %s5722_s28, %s4556_s5, %s4556_s5, %s4557_s21  }
0x143a PF: > { %s5952_s13 = sld [smem:[#allocation32_spill]]  ;;  %s5953_s20 = sld [smem:[#allocation29_spill]] }
0x143b   : > { %p3635_p11 = scmp.ge.s32.totalorder %s4523_s0, 2 }
0x1440   : > { %s2900_s22 = sand.u32 1, %s5952_s13   ;;  %p5954_p4 = scmp.ne.s32.totalorder %s5953_s20, 0 }
0x1441   : > { %s2901_s24 = scalar_lea.sflag [#allocation4], %s2900_s22 }
0x1442   : > { %p3625_p0 = pnand %p3635_p11, %p5954_p4 }
0x1444   : > { %4478 = dma.done.wait (!%p3625_p0), %s2901_s24, 512  }
0x1445   : > { %4480 = vsyncadd (!%p3625_p0), %s2901_s24, 4294966784  ;;  %s34_s0 = sadd.s32 1, %s4523_s0   ;;  %s5955_s21 = sld [smem:[#allocation30_spill]] }
0x1446   : > { %p31_p6 = scmp.ge.s32.totalorder %s34_s0, 6   ;;  %s5956_s22 = sld [smem:[#allocation31_spill]] }
0x1447   : > { %s5957_s23 = sld [smem:[#allocation41_spill]]  ;;  %s5958_s24 = sld [smem:[#allocation33_spill]] }
0x1448   : > { %s5959_s25 = sld [smem:[#allocation34_spill]]  ;;  %s5960_s26 = sld [smem:[#allocation42_spill]] }
0x1449   : > { %s5961_s27 = sld [smem:[#allocation37_spill]]  ;;  %s5962_s28 = sld [smem:[#allocation38_spill]] }
0x144a   : > { %s5963_s29 = sld [smem:[#allocation39_spill]]  ;;  %s5964_s30 = sld [smem:[#allocation40_spill]] }
0x144b   :  { %33 = sbr.rel (!%p31_p6) target bundleno = 29 (0x1d), region = 285 }
0x1452   :  { %2906 = vsyncpa [#allocation3], 1 }
0x1453   :  { %2908 = vsyncpa [#allocation3 + $0x1], 1 }
0x1454   :  { %2909 = vsyncpa [#allocation6], 1 }
0x1455   :  { %2910 = vsyncpa [#allocation21], 1 }
0x1456   :  { %2911 = vsyncpa [#allocation4], 1 }
0x1457   :  { %2913 = vsyncpa [#allocation4 + $0x1], 1 }

</bundles_post_ra>
